<compile_context>
chip_gen: v6e
topology: v6e:2x2x1
jax: 0.10.0
libtpu: 0.0.40
codegen_flags: <defaults>
</compile_context>

<pallas_src>
import functools

import jax
import jax.numpy as jnp
from jax.experimental import pallas as pl
from jax.experimental.pallas import tpu as pltpu


# Scoped VMEM cap (actual usage here is ~3 MiB: weights + one batch block).
VMEM_LIMIT_BYTES = 32 * 1024 * 1024
NB_MAX = 32   # batch rows per grid block: >=2 blocks at batch>=64 engages
              # pipelining and v7x's second TensorCore.


# ---------------------------------------------------------------------------
# Network geometry (VALID convs: 8/4, 4/2, 3/1)
# ---------------------------------------------------------------------------
def conv_geometry(input_dims):
    c_in, h, w = input_dims
    h1, w1 = (h - 8) // 4 + 1, (w - 8) // 4 + 1
    h2, w2 = (h1 - 4) // 2 + 1, (w1 - 4) // 2 + 1
    h3, w3 = (h2 - 3) // 1 + 1, (w2 - 3) // 1 + 1
    return {"cin": c_in, "l1": (h1, w1, 32), "l2": (h2, w2, 64), "l3": (h3, w3, 64)}


# ---------------------------------------------------------------------------
# Fused forward kernel (conv1 matmul -> conv2 -> conv3 -> fc1 -> fc2)
# ---------------------------------------------------------------------------
def _make_fused_kernel(nb, geo):
    h1, w1, c1 = geo["l1"]
    h2, w2, c2 = geo["l2"]
    h3, w3, c3 = geo["l3"]

    def kernel(p1_ref, w1_ref, b1_ref, w2_ref, b2_ref, w3_ref, b3_ref,
               wf1_ref, bf1_ref, wf2_ref, bf2_ref, o_ref,
               a1_s, a2_s, a3_s):
        f32 = jnp.float32

        # ---- conv1 (8x8, stride 4): patches precomputed in the wrapper.
        # One matmul per output column; results stored channel-packed
        # (n, y, x*C1) so conv2's taps are contiguous lane slices.
        for ox in range(w1):
            y = jnp.dot(p1_ref[ox], w1_ref[...], preferred_element_type=f32)
            y = jnp.maximum(y + b1_ref[...], 0.0)
            a1_s[:, :, ox * c1:(ox + 1) * c1] = (
                y.reshape(nb, h1, c1).astype(a1_s.dtype))

        # ---- generic in-VMEM conv: per output position, one matmul per tap
        # row (contiguous kw*cin lane window), f32 accumulate, ReLU, store
        # channel-packed for the next layer.
        def conv_step(src, w_ref, b_ref, dst, kh, kw, s, oh, ow, cin, cout):
            for oy in range(oh):
                for ox in range(ow):
                    acc = jnp.zeros((nb, cout), f32)
                    lane0 = (s * ox) * cin
                    for i in range(kh):
                        lhs = src[:, s * oy + i, lane0:lane0 + kw * cin]
                        acc = acc + jnp.dot(
                            lhs, w_ref[i * kw * cin:(i + 1) * kw * cin, :],
                            preferred_element_type=f32)
                    v = jnp.maximum(acc + b_ref[...], 0.0)
                    dst[:, oy, ox * cout:(ox + 1) * cout] = v.astype(dst.dtype)

        conv_step(a1_s, w2_ref, b2_ref, a2_s, 4, 4, 2, h2, w2, c1, c2)   # conv2
        conv_step(a2_s, w3_ref, b3_ref, a3_s, 3, 3, 1, h3, w3, c2, c3)   # conv3

        # ---- fc1 (+ReLU) and fc2: hidden activation never leaves VMEM/vregs.
        nh = wf1_ref.shape[1]
        row = w3 * c3
        h = jnp.zeros((nb, nh), f32)
        for y3 in range(h3):
            h = h + jnp.dot(a3_s[:, y3, :], wf1_ref[y3 * row:(y3 + 1) * row, :],
                            preferred_element_type=f32)
        h = jnp.maximum(h + bf1_ref[...], 0.0).astype(jnp.bfloat16)

        out = jnp.dot(h, wf2_ref[...], preferred_element_type=f32)
        o_ref[...] = out + bf2_ref[...]          # lane-dense (128-wide) store

    return kernel


def _fused_forward_pallas(p1, pp, *, n, nb, geo, npad):
    h1, w1, c1 = geo["l1"]
    h2, w2, c2 = geo["l2"]
    h3, w3, c3 = geo["l3"]
    k1 = p1.shape[-1]
    n_hidden = pp["w_fc1"].shape[1]

    kernel = _make_fused_kernel(nb, geo)

    def full(a):
        return pl.BlockSpec(a.shape, lambda b, _nd=a.ndim: (0,) * _nd)

    flops = 2 * n * (h1 * w1 * k1 * c1
                     + h2 * w2 * 16 * c1 * c2
                     + h3 * w3 * 9 * c2 * c3
                     + h3 * w3 * c3 * n_hidden
                     + n_hidden * npad)
    weight_keys = ("w1", "b1", "w2", "b2", "w3", "b3",
                   "w_fc1", "b_fc1", "w_fc2", "b_fc2")
    bytes_accessed = (int(p1.size) * 2
                      + sum(int(pp[k].size) * pp[k].dtype.itemsize for k in weight_keys)
                      + n * npad * 4)

    return pl.pallas_call(
        kernel,
        out_shape=jax.ShapeDtypeStruct((n, npad), jnp.float32),
        grid_spec=pltpu.PrefetchScalarGridSpec(
            num_scalar_prefetch=0,
            grid=(pl.cdiv(n, nb),),
            in_specs=[
                pl.BlockSpec((w1, nb * h1, k1), lambda b: (0, b, 0)),
                full(pp["w1"]), full(pp["b1"]),
                full(pp["w2"]), full(pp["b2"]),
                full(pp["w3"]), full(pp["b3"]),
                full(pp["w_fc1"]), full(pp["b_fc1"]),
                full(pp["w_fc2"]), full(pp["b_fc2"]),
            ],
            out_specs=pl.BlockSpec((nb, npad), lambda b: (b, 0)),
            scratch_shapes=[
                pltpu.VMEM((nb, h1, w1 * c1), jnp.bfloat16),   # conv1 out
                pltpu.VMEM((nb, h2, w2 * c2), jnp.bfloat16),   # conv2 out
                pltpu.VMEM((nb, h3, w3 * c3), jnp.bfloat16),   # conv3 out
            ],
        ),
        compiler_params=pltpu.CompilerParams(
            dimension_semantics=("parallel",),
            vmem_limit_bytes=VMEM_LIMIT_BYTES),
        cost_estimate=pl.CostEstimate(flops=int(flops), transcendentals=0,
                                      bytes_accessed=int(bytes_accessed)),
    )(p1, pp["w1"], pp["b1"], pp["w2"], pp["b2"], pp["w3"], pp["b3"],
      pp["w_fc1"], pp["b_fc1"], pp["w_fc2"], pp["b_fc2"])


# ---------------------------------------------------------------------------
# Wrapper-side conv1 im2col (single XLA fusion on the tiny raw input)
# ---------------------------------------------------------------------------
def _conv1_patches(state_nchw, h1, w1):
    x = jnp.transpose(state_nchw, (0, 2, 3, 1))             # NHWC
    n = x.shape[0]
    cols = []
    for i in range(8):
        for j in range(8):
            cols.append(x[:, i:i + 4 * (h1 - 1) + 1:4,
                          j:j + 4 * (w1 - 1) + 1:4, :])
    p = jnp.concatenate(cols, axis=-1)                       # (n, h1, w1, 64*cin)
    k1 = p.shape[-1]
    # (w1, n*h1, k1): kernel indexes the leading (output-column) dim.
    p = jnp.transpose(p, (2, 0, 1, 3)).reshape(w1, n * h1, k1)
    return p.astype(jnp.bfloat16)


# ---------------------------------------------------------------------------
# One-time parameter preparation (re-layouts + bf16 casts, off the hot path)
# ---------------------------------------------------------------------------
def prepare_params(params, input_dims):
    geo = conv_geometry(input_dims)
    h3, w3, c3 = geo["l3"]

    def conv_w(w):
        # (Cout,Cin,KH,KW) -> (KH*KW*Cin, Cout): tap-major, channel-minor,
        # matching both the wrapper im2col and the kernel's tap-row slicing.
        cout, cin, kh, kw = w.shape
        return (jnp.transpose(w, (2, 3, 1, 0))
                .reshape(kh * kw * cin, cout).astype(jnp.bfloat16))

    # fc1: PyTorch flatten order is (c,h,w); kernel's is (h,w,c). Permute once.
    w_fc1 = params["w_fc1"]
    n_hidden = w_fc1.shape[0]
    w_fc1 = (jnp.transpose(w_fc1.reshape(n_hidden, c3, h3, w3), (2, 3, 1, 0))
             .reshape(h3 * w3 * c3, n_hidden).astype(jnp.bfloat16))

    # fc2: transpose + zero-pad the action dim to 128 lanes (lane-dense store).
    n_act = params["w_fc2"].shape[0]
    npad = ((n_act + 127) // 128) * 128
    w_fc2 = jnp.zeros((n_hidden, npad), jnp.bfloat16)
    w_fc2 = w_fc2.at[:, :n_act].set(params["w_fc2"].T.astype(jnp.bfloat16))
    b_fc2 = jnp.zeros((1, npad), jnp.float32).at[:, :n_act].set(params["b_fc2"])

    f32 = jnp.float32
    return {
        "w1": conv_w(params["w1"]), "b1": params["b1"].reshape(1, -1).astype(f32),
        "w2": conv_w(params["w2"]), "b2": params["b2"].reshape(1, -1).astype(f32),
        "w3": conv_w(params["w3"]), "b3": params["b3"].reshape(1, -1).astype(f32),
        "w_fc1": w_fc1, "b_fc1": params["b_fc1"].reshape(1, -1).astype(f32),
        "w_fc2": w_fc2, "b_fc2": b_fc2,
    }


# ---------------------------------------------------------------------------
# Forward pass
# ---------------------------------------------------------------------------
@functools.partial(jax.jit, static_argnames=("n_actions",))
def q_forward(prepped, state_nchw, *, n_actions):
    n, c, hh, ww = state_nchw.shape
    geo = conv_geometry((c, hh, ww))
    h1, w1, _ = geo["l1"]

    p1 = _conv1_patches(state_nchw, h1, w1)     # (w1, n*h1, 64*c) bf16
    nb = min(n, NB_MAX)
    npad = prepped["w_fc2"].shape[1]

    out_pad = _fused_forward_pallas(p1, prepped, n=n, nb=nb, geo=geo, npad=npad)
    return out_pad[:, :n_actions]


# ---------------------------------------------------------------------------
# Pure-JAX f32 reference (mirrors the PyTorch forward exactly)
# ---------------------------------------------------------------------------
def ref_forward(params, state_nchw):
    dn = ("NCHW", "OIHW", "NCHW")

    def conv(x, w, b, s):
        y = jax.lax.conv_general_dilated(x, w, (s, s), "VALID",
                                         dimension_numbers=dn)
        return jnp.maximum(y + b[None, :, None, None], 0.0)

    y = conv(state_nchw, params["w1"], params["b1"], 4)
    y = conv(y, params["w2"], params["b2"], 2)
    y = conv(y, params["w3"], params["b3"], 1)
    flat = y.reshape(y.shape[0], -1)                         # (c,h,w) order
    h = jnp.maximum(flat @ params["w_fc1"].T + params["b_fc1"], 0.0)
    return h @ params["w_fc2"].T + params["b_fc2"]


# ---------------------------------------------------------------------------
# Deterministic parameter init (PyTorch-layout shapes)
# ---------------------------------------------------------------------------
def init_params(key, input_dims, n_actions):
    c_in, _, _ = input_dims
    geo = conv_geometry(input_dims)
    h3, w3, c3 = geo["l3"]
    fc_in = c3 * h3 * w3
    ks = jax.random.split(key, 10)

    def u(k, shape, fan_in):
        bound = float(fan_in) ** -0.5
        return jax.random.uniform(k, shape, jnp.float32, -bound, bound)

    return {
        "w1": u(ks[0], (32, c_in, 8, 8), c_in * 8 * 8),
        "b1": u(ks[1], (32,), c_in * 8 * 8),
        "w2": u(ks[2], (64, 32, 4, 4), 32 * 4 * 4),
        "b2": u(ks[3], (64,), 32 * 4 * 4),
        "w3": u(ks[4], (64, 64, 3, 3), 64 * 3 * 3),
        "b3": u(ks[5], (64,), 64 * 3 * 3),
        "w_fc1": u(ks[6], (512, fc_in), fc_in),
        "b_fc1": u(ks[7], (512,), fc_in),
        "w_fc2": u(ks[8], (n_actions, 512), 512),
        "b_fc2": u(ks[9], (n_actions,), 512),
    }


if __name__ == "__main__":
    key = jax.random.PRNGKey(0)
    input_dims = (4, 36, 36)   # (C, H, W): smallest input the conv stack accepts
    n_actions = 6
    batch = 2

    pkey, xkey = jax.random.split(key)
    params = init_params(pkey, input_dims, n_actions)
    state = jax.random.uniform(xkey, (batch,) + input_dims, jnp.float32)

    prepped = prepare_params(params, input_dims)            # one-time re-layout
    out = jax.block_until_ready(q_forward(prepped, state, n_actions=n_actions))
    assert out.shape == (batch, n_actions), out.shape

    ref = jax.block_until_ready(ref_forward(params, state))
    max_err = float(jnp.max(jnp.abs(out - ref)))
    # bf16 weights/activations with f32 accumulation -> 2e-2 tolerance.
    if not bool(jnp.allclose(out, ref, atol=2e-2, rtol=2e-2)):
        raise AssertionError(f"Pallas result mismatch, max abs err {max_err}")

    print("KERNEL_OK")
</pallas_src>

<mosaic_0001>
module attributes {stable_mosaic.version = 11 : i64} {
  func.func @kernel(%arg0: i32, %arg1: memref<8x16x256xbf16, #tpu.memory_space<vmem>>, %arg2: memref<256x32xbf16, #tpu.memory_space<vmem>>, %arg3: memref<1x32xf32, #tpu.memory_space<vmem>>, %arg4: memref<512x64xbf16, #tpu.memory_space<vmem>>, %arg5: memref<1x64xf32, #tpu.memory_space<vmem>>, %arg6: memref<576x64xbf16, #tpu.memory_space<vmem>>, %arg7: memref<1x64xf32, #tpu.memory_space<vmem>>, %arg8: memref<64x512xbf16, #tpu.memory_space<vmem>>, %arg9: memref<1x512xf32, #tpu.memory_space<vmem>>, %arg10: memref<512x128xbf16, #tpu.memory_space<vmem>>, %arg11: memref<1x128xf32, #tpu.memory_space<vmem>>, %arg12: memref<2x128xf32, #tpu.memory_space<vmem>>, %arg13: memref<2x8x256xbf16, #tpu.memory_space<vmem>>, %arg14: memref<2x3x192xbf16, #tpu.memory_space<vmem>>, %arg15: memref<2x1x64xbf16, #tpu.memory_space<vmem>>) attributes {dimension_semantics = [#tpu.dimension_semantics<parallel>], iteration_bounds = array<i64: 1>, scalar_prefetch = 0 : i64, scratch_operands = 3 : i64, tpu.core_type = #tpu.core_type<tc>, window_params = [{transform_indices = @transform_0, window_bounds = array<i64: 8, 16, 256>}, {pipeline_mode = #tpu.pipeline_mode<synchronous>, transform_indices = @transform_1, window_bounds = array<i64: 256, 32>}, {pipeline_mode = #tpu.pipeline_mode<synchronous>, transform_indices = @transform_2, window_bounds = array<i64: 1, 32>}, {pipeline_mode = #tpu.pipeline_mode<synchronous>, transform_indices = @transform_3, window_bounds = array<i64: 512, 64>}, {pipeline_mode = #tpu.pipeline_mode<synchronous>, transform_indices = @transform_4, window_bounds = array<i64: 1, 64>}, {pipeline_mode = #tpu.pipeline_mode<synchronous>, transform_indices = @transform_5, window_bounds = array<i64: 576, 64>}, {pipeline_mode = #tpu.pipeline_mode<synchronous>, transform_indices = @transform_6, window_bounds = array<i64: 1, 64>}, {pipeline_mode = #tpu.pipeline_mode<synchronous>, transform_indices = @transform_7, window_bounds = array<i64: 64, 512>}, {pipeline_mode = #tpu.pipeline_mode<synchronous>, transform_indices = @transform_8, window_bounds = array<i64: 1, 512>}, {pipeline_mode = #tpu.pipeline_mode<synchronous>, transform_indices = @transform_9, window_bounds = array<i64: 512, 128>}, {pipeline_mode = #tpu.pipeline_mode<synchronous>, transform_indices = @transform_10, window_bounds = array<i64: 1, 128>}, {transform_indices = @transform_11, window_bounds = array<i64: 2, 128>}]} {
    %c0 = arith.constant 0 : index
    %c0_0 = arith.constant 0 : index
    %c0_1 = arith.constant 0 : index
    %0 = vector.load %arg1[%c0, %c0_0, %c0_1] : memref<8x16x256xbf16, #tpu.memory_space<vmem>>, vector<1x16x256xbf16>
    %1 = vector.shape_cast %0 : vector<1x16x256xbf16> to vector<16x256xbf16>
    %c0_2 = arith.constant 0 : index
    %c0_3 = arith.constant 0 : index
    %2 = vector.load %arg2[%c0_2, %c0_3] : memref<256x32xbf16, #tpu.memory_space<vmem>>, vector<256x32xbf16>
    %cst = arith.constant dense<0.000000e+00> : vector<16x32xf32>
    %3 = tpu.matmul %1, %2, %cst {dimension_numbers = #tpu.dot_dimension_numbers<[1], [0], [0], [1], [0, 0, 1, 1], [], []>} : vector<16x256xbf16>, vector<256x32xbf16>, vector<16x32xf32> -> vector<16x32xf32>
    %c0_4 = arith.constant 0 : index
    %c0_5 = arith.constant 0 : index
    %4 = vector.load %arg3[%c0_4, %c0_5] : memref<1x32xf32, #tpu.memory_space<vmem>>, vector<1x32xf32>
    %5 = vector.broadcast %4 : vector<1x32xf32> to vector<16x32xf32>
    %6 = arith.addf %3, %5 : vector<16x32xf32>
    %cst_6 = arith.constant 0.000000e+00 : f32
    %7 = vector.broadcast %cst_6 : f32 to vector<16x32xf32>
    %8 = arith.maximumf %6, %7 : vector<16x32xf32>
    %9 = vector.shape_cast %8 : vector<16x32xf32> to vector<2x8x32xf32>
    %10 = arith.truncf %9 : vector<2x8x32xf32> to vector<2x8x32xbf16>
    %c0_7 = arith.constant 0 : index
    %c0_8 = arith.constant 0 : index
    %c0_9 = arith.constant 0 : index
    %11 = vector.load %arg13[%c0_7, %c0_8, %c0_9] : memref<2x8x256xbf16, #tpu.memory_space<vmem>>, vector<2x8x32xbf16>
    tpu.vector_store %arg13[%c0_7, %c0_8, %c0_9], %10 {strides = array<i32>} : memref<2x8x256xbf16, #tpu.memory_space<vmem>>, vector<2x8x32xbf16>,
    %c1 = arith.constant 1 : index
    %c0_10 = arith.constant 0 : index
    %c0_11 = arith.constant 0 : index
    %12 = vector.load %arg1[%c1, %c0_10, %c0_11] : memref<8x16x256xbf16, #tpu.memory_space<vmem>>, vector<1x16x256xbf16>
    %13 = vector.shape_cast %12 : vector<1x16x256xbf16> to vector<16x256xbf16>
    %c0_12 = arith.constant 0 : index
    %c0_13 = arith.constant 0 : index
    %14 = vector.load %arg2[%c0_12, %c0_13] : memref<256x32xbf16, #tpu.memory_space<vmem>>, vector<256x32xbf16>
    %cst_14 = arith.constant dense<0.000000e+00> : vector<16x32xf32>
    %15 = tpu.matmul %13, %14, %cst_14 {dimension_numbers = #tpu.dot_dimension_numbers<[1], [0], [0], [1], [0, 0, 1, 1], [], []>} : vector<16x256xbf16>, vector<256x32xbf16>, vector<16x32xf32> -> vector<16x32xf32>
    %c0_15 = arith.constant 0 : index
    %c0_16 = arith.constant 0 : index
    %16 = vector.load %arg3[%c0_15, %c0_16] : memref<1x32xf32, #tpu.memory_space<vmem>>, vector<1x32xf32>
    %17 = vector.broadcast %16 : vector<1x32xf32> to vector<16x32xf32>
    %18 = arith.addf %15, %17 : vector<16x32xf32>
    %cst_17 = arith.constant 0.000000e+00 : f32
    %19 = vector.broadcast %cst_17 : f32 to vector<16x32xf32>
    %20 = arith.maximumf %18, %19 : vector<16x32xf32>
    %21 = vector.shape_cast %20 : vector<16x32xf32> to vector<2x8x32xf32>
    %22 = arith.truncf %21 : vector<2x8x32xf32> to vector<2x8x32xbf16>
    %c0_18 = arith.constant 0 : index
    %c0_19 = arith.constant 0 : index
    %c32 = arith.constant 32 : index
    %23 = vector.load %arg13[%c0_18, %c0_19, %c32] : memref<2x8x256xbf16, #tpu.memory_space<vmem>>, vector<2x8x32xbf16>
    tpu.vector_store %arg13[%c0_18, %c0_19, %c32], %22 {strides = array<i32>} : memref<2x8x256xbf16, #tpu.memory_space<vmem>>, vector<2x8x32xbf16>,
    %c2 = arith.constant 2 : index
    %c0_20 = arith.constant 0 : index
    %c0_21 = arith.constant 0 : index
    %24 = vector.load %arg1[%c2, %c0_20, %c0_21] : memref<8x16x256xbf16, #tpu.memory_space<vmem>>, vector<1x16x256xbf16>
    %25 = vector.shape_cast %24 : vector<1x16x256xbf16> to vector<16x256xbf16>
    %c0_22 = arith.constant 0 : index
    %c0_23 = arith.constant 0 : index
    %26 = vector.load %arg2[%c0_22, %c0_23] : memref<256x32xbf16, #tpu.memory_space<vmem>>, vector<256x32xbf16>
    %cst_24 = arith.constant dense<0.000000e+00> : vector<16x32xf32>
    %27 = tpu.matmul %25, %26, %cst_24 {dimension_numbers = #tpu.dot_dimension_numbers<[1], [0], [0], [1], [0, 0, 1, 1], [], []>} : vector<16x256xbf16>, vector<256x32xbf16>, vector<16x32xf32> -> vector<16x32xf32>
    %c0_25 = arith.constant 0 : index
    %c0_26 = arith.constant 0 : index
    %28 = vector.load %arg3[%c0_25, %c0_26] : memref<1x32xf32, #tpu.memory_space<vmem>>, vector<1x32xf32>
    %29 = vector.broadcast %28 : vector<1x32xf32> to vector<16x32xf32>
    %30 = arith.addf %27, %29 : vector<16x32xf32>
    %cst_27 = arith.constant 0.000000e+00 : f32
    %31 = vector.broadcast %cst_27 : f32 to vector<16x32xf32>
    %32 = arith.maximumf %30, %31 : vector<16x32xf32>
    %33 = vector.shape_cast %32 : vector<16x32xf32> to vector<2x8x32xf32>
    %34 = arith.truncf %33 : vector<2x8x32xf32> to vector<2x8x32xbf16>
    %c0_28 = arith.constant 0 : index
    %c0_29 = arith.constant 0 : index
    %c64 = arith.constant 64 : index
    %35 = vector.load %arg13[%c0_28, %c0_29, %c64] : memref<2x8x256xbf16, #tpu.memory_space<vmem>>, vector<2x8x32xbf16>
    tpu.vector_store %arg13[%c0_28, %c0_29, %c64], %34 {strides = array<i32>} : memref<2x8x256xbf16, #tpu.memory_space<vmem>>, vector<2x8x32xbf16>,
    %c3 = arith.constant 3 : index
    %c0_30 = arith.constant 0 : index
    %c0_31 = arith.constant 0 : index
    %36 = vector.load %arg1[%c3, %c0_30, %c0_31] : memref<8x16x256xbf16, #tpu.memory_space<vmem>>, vector<1x16x256xbf16>
    %37 = vector.shape_cast %36 : vector<1x16x256xbf16> to vector<16x256xbf16>
    %c0_32 = arith.constant 0 : index
    %c0_33 = arith.constant 0 : index
    %38 = vector.load %arg2[%c0_32, %c0_33] : memref<256x32xbf16, #tpu.memory_space<vmem>>, vector<256x32xbf16>
    %cst_34 = arith.constant dense<0.000000e+00> : vector<16x32xf32>
    %39 = tpu.matmul %37, %38, %cst_34 {dimension_numbers = #tpu.dot_dimension_numbers<[1], [0], [0], [1], [0, 0, 1, 1], [], []>} : vector<16x256xbf16>, vector<256x32xbf16>, vector<16x32xf32> -> vector<16x32xf32>
    %c0_35 = arith.constant 0 : index
    %c0_36 = arith.constant 0 : index
    %40 = vector.load %arg3[%c0_35, %c0_36] : memref<1x32xf32, #tpu.memory_space<vmem>>, vector<1x32xf32>
    %41 = vector.broadcast %40 : vector<1x32xf32> to vector<16x32xf32>
    %42 = arith.addf %39, %41 : vector<16x32xf32>
    %cst_37 = arith.constant 0.000000e+00 : f32
    %43 = vector.broadcast %cst_37 : f32 to vector<16x32xf32>
    %44 = arith.maximumf %42, %43 : vector<16x32xf32>
    %45 = vector.shape_cast %44 : vector<16x32xf32> to vector<2x8x32xf32>
    %46 = arith.truncf %45 : vector<2x8x32xf32> to vector<2x8x32xbf16>
    %c0_38 = arith.constant 0 : index
    %c0_39 = arith.constant 0 : index
    %c96 = arith.constant 96 : index
    %47 = vector.load %arg13[%c0_38, %c0_39, %c96] : memref<2x8x256xbf16, #tpu.memory_space<vmem>>, vector<2x8x32xbf16>
    tpu.vector_store %arg13[%c0_38, %c0_39, %c96], %46 {strides = array<i32>} : memref<2x8x256xbf16, #tpu.memory_space<vmem>>, vector<2x8x32xbf16>,
    %c4 = arith.constant 4 : index
    %c0_40 = arith.constant 0 : index
    %c0_41 = arith.constant 0 : index
    %48 = vector.load %arg1[%c4, %c0_40, %c0_41] : memref<8x16x256xbf16, #tpu.memory_space<vmem>>, vector<1x16x256xbf16>
    %49 = vector.shape_cast %48 : vector<1x16x256xbf16> to vector<16x256xbf16>
    %c0_42 = arith.constant 0 : index
    %c0_43 = arith.constant 0 : index
    %50 = vector.load %arg2[%c0_42, %c0_43] : memref<256x32xbf16, #tpu.memory_space<vmem>>, vector<256x32xbf16>
    %cst_44 = arith.constant dense<0.000000e+00> : vector<16x32xf32>
    %51 = tpu.matmul %49, %50, %cst_44 {dimension_numbers = #tpu.dot_dimension_numbers<[1], [0], [0], [1], [0, 0, 1, 1], [], []>} : vector<16x256xbf16>, vector<256x32xbf16>, vector<16x32xf32> -> vector<16x32xf32>
    %c0_45 = arith.constant 0 : index
    %c0_46 = arith.constant 0 : index
    %52 = vector.load %arg3[%c0_45, %c0_46] : memref<1x32xf32, #tpu.memory_space<vmem>>, vector<1x32xf32>
    %53 = vector.broadcast %52 : vector<1x32xf32> to vector<16x32xf32>
    %54 = arith.addf %51, %53 : vector<16x32xf32>
    %cst_47 = arith.constant 0.000000e+00 : f32
    %55 = vector.broadcast %cst_47 : f32 to vector<16x32xf32>
    %56 = arith.maximumf %54, %55 : vector<16x32xf32>
    %57 = vector.shape_cast %56 : vector<16x32xf32> to vector<2x8x32xf32>
    %58 = arith.truncf %57 : vector<2x8x32xf32> to vector<2x8x32xbf16>
    %c0_48 = arith.constant 0 : index
    %c0_49 = arith.constant 0 : index
    %c128 = arith.constant 128 : index
    %59 = vector.load %arg13[%c0_48, %c0_49, %c128] : memref<2x8x256xbf16, #tpu.memory_space<vmem>>, vector<2x8x32xbf16>
    tpu.vector_store %arg13[%c0_48, %c0_49, %c128], %58 {strides = array<i32>} : memref<2x8x256xbf16, #tpu.memory_space<vmem>>, vector<2x8x32xbf16>,
    %c5 = arith.constant 5 : index
    %c0_50 = arith.constant 0 : index
    %c0_51 = arith.constant 0 : index
    %60 = vector.load %arg1[%c5, %c0_50, %c0_51] : memref<8x16x256xbf16, #tpu.memory_space<vmem>>, vector<1x16x256xbf16>
    %61 = vector.shape_cast %60 : vector<1x16x256xbf16> to vector<16x256xbf16>
    %c0_52 = arith.constant 0 : index
    %c0_53 = arith.constant 0 : index
    %62 = vector.load %arg2[%c0_52, %c0_53] : memref<256x32xbf16, #tpu.memory_space<vmem>>, vector<256x32xbf16>
    %cst_54 = arith.constant dense<0.000000e+00> : vector<16x32xf32>
    %63 = tpu.matmul %61, %62, %cst_54 {dimension_numbers = #tpu.dot_dimension_numbers<[1], [0], [0], [1], [0, 0, 1, 1], [], []>} : vector<16x256xbf16>, vector<256x32xbf16>, vector<16x32xf32> -> vector<16x32xf32>
    %c0_55 = arith.constant 0 : index
    %c0_56 = arith.constant 0 : index
    %64 = vector.load %arg3[%c0_55, %c0_56] : memref<1x32xf32, #tpu.memory_space<vmem>>, vector<1x32xf32>
    %65 = vector.broadcast %64 : vector<1x32xf32> to vector<16x32xf32>
    %66 = arith.addf %63, %65 : vector<16x32xf32>
    %cst_57 = arith.constant 0.000000e+00 : f32
    %67 = vector.broadcast %cst_57 : f32 to vector<16x32xf32>
    %68 = arith.maximumf %66, %67 : vector<16x32xf32>
    %69 = vector.shape_cast %68 : vector<16x32xf32> to vector<2x8x32xf32>
    %70 = arith.truncf %69 : vector<2x8x32xf32> to vector<2x8x32xbf16>
    %c0_58 = arith.constant 0 : index
    %c0_59 = arith.constant 0 : index
    %c160 = arith.constant 160 : index
    %71 = vector.load %arg13[%c0_58, %c0_59, %c160] : memref<2x8x256xbf16, #tpu.memory_space<vmem>>, vector<2x8x32xbf16>
    tpu.vector_store %arg13[%c0_58, %c0_59, %c160], %70 {strides = array<i32>} : memref<2x8x256xbf16, #tpu.memory_space<vmem>>, vector<2x8x32xbf16>,
    %c6 = arith.constant 6 : index
    %c0_60 = arith.constant 0 : index
    %c0_61 = arith.constant 0 : index
    %72 = vector.load %arg1[%c6, %c0_60, %c0_61] : memref<8x16x256xbf16, #tpu.memory_space<vmem>>, vector<1x16x256xbf16>
    %73 = vector.shape_cast %72 : vector<1x16x256xbf16> to vector<16x256xbf16>
    %c0_62 = arith.constant 0 : index
    %c0_63 = arith.constant 0 : index
    %74 = vector.load %arg2[%c0_62, %c0_63] : memref<256x32xbf16, #tpu.memory_space<vmem>>, vector<256x32xbf16>
    %cst_64 = arith.constant dense<0.000000e+00> : vector<16x32xf32>
    %75 = tpu.matmul %73, %74, %cst_64 {dimension_numbers = #tpu.dot_dimension_numbers<[1], [0], [0], [1], [0, 0, 1, 1], [], []>} : vector<16x256xbf16>, vector<256x32xbf16>, vector<16x32xf32> -> vector<16x32xf32>
    %c0_65 = arith.constant 0 : index
    %c0_66 = arith.constant 0 : index
    %76 = vector.load %arg3[%c0_65, %c0_66] : memref<1x32xf32, #tpu.memory_space<vmem>>, vector<1x32xf32>
    %77 = vector.broadcast %76 : vector<1x32xf32> to vector<16x32xf32>
    %78 = arith.addf %75, %77 : vector<16x32xf32>
    %cst_67 = arith.constant 0.000000e+00 : f32
    %79 = vector.broadcast %cst_67 : f32 to vector<16x32xf32>
    %80 = arith.maximumf %78, %79 : vector<16x32xf32>
    %81 = vector.shape_cast %80 : vector<16x32xf32> to vector<2x8x32xf32>
    %82 = arith.truncf %81 : vector<2x8x32xf32> to vector<2x8x32xbf16>
    %c0_68 = arith.constant 0 : index
    %c0_69 = arith.constant 0 : index
    %c192 = arith.constant 192 : index
    %83 = vector.load %arg13[%c0_68, %c0_69, %c192] : memref<2x8x256xbf16, #tpu.memory_space<vmem>>, vector<2x8x32xbf16>
    tpu.vector_store %arg13[%c0_68, %c0_69, %c192], %82 {strides = array<i32>} : memref<2x8x256xbf16, #tpu.memory_space<vmem>>, vector<2x8x32xbf16>,
    %c7 = arith.constant 7 : index
    %c0_70 = arith.constant 0 : index
    %c0_71 = arith.constant 0 : index
    %84 = vector.load %arg1[%c7, %c0_70, %c0_71] : memref<8x16x256xbf16, #tpu.memory_space<vmem>>, vector<1x16x256xbf16>
    %85 = vector.shape_cast %84 : vector<1x16x256xbf16> to vector<16x256xbf16>
    %c0_72 = arith.constant 0 : index
    %c0_73 = arith.constant 0 : index
    %86 = vector.load %arg2[%c0_72, %c0_73] : memref<256x32xbf16, #tpu.memory_space<vmem>>, vector<256x32xbf16>
    %cst_74 = arith.constant dense<0.000000e+00> : vector<16x32xf32>
    %87 = tpu.matmul %85, %86, %cst_74 {dimension_numbers = #tpu.dot_dimension_numbers<[1], [0], [0], [1], [0, 0, 1, 1], [], []>} : vector<16x256xbf16>, vector<256x32xbf16>, vector<16x32xf32> -> vector<16x32xf32>
    %c0_75 = arith.constant 0 : index
    %c0_76 = arith.constant 0 : index
    %88 = vector.load %arg3[%c0_75, %c0_76] : memref<1x32xf32, #tpu.memory_space<vmem>>, vector<1x32xf32>
    %89 = vector.broadcast %88 : vector<1x32xf32> to vector<16x32xf32>
    %90 = arith.addf %87, %89 : vector<16x32xf32>
    %cst_77 = arith.constant 0.000000e+00 : f32
    %91 = vector.broadcast %cst_77 : f32 to vector<16x32xf32>
    %92 = arith.maximumf %90, %91 : vector<16x32xf32>
    %93 = vector.shape_cast %92 : vector<16x32xf32> to vector<2x8x32xf32>
    %94 = arith.truncf %93 : vector<2x8x32xf32> to vector<2x8x32xbf16>
    %c0_78 = arith.constant 0 : index
    %c0_79 = arith.constant 0 : index
    %c224 = arith.constant 224 : index
    %95 = vector.load %arg13[%c0_78, %c0_79, %c224] : memref<2x8x256xbf16, #tpu.memory_space<vmem>>, vector<2x8x32xbf16>
    tpu.vector_store %arg13[%c0_78, %c0_79, %c224], %94 {strides = array<i32>} : memref<2x8x256xbf16, #tpu.memory_space<vmem>>, vector<2x8x32xbf16>,
    %cst_80 = arith.constant 0.000000e+00 : f32
    %96 = vector.broadcast %cst_80 : f32 to vector<2x64xf32>
    %c0_81 = arith.constant 0 : index
    %c0_82 = arith.constant 0 : index
    %c0_83 = arith.constant 0 : index
    %97 = vector.load %arg13[%c0_81, %c0_82, %c0_83] : memref<2x8x256xbf16, #tpu.memory_space<vmem>>, vector<2x1x128xbf16>
    %98 = vector.shape_cast %97 : vector<2x1x128xbf16> to vector<2x128xbf16>
    %c0_84 = arith.constant 0 : index
    %c0_85 = arith.constant 0 : index
    %99 = vector.load %arg4[%c0_84, %c0_85] : memref<512x64xbf16, #tpu.memory_space<vmem>>, vector<128x64xbf16>
    %cst_86 = arith.constant dense<0.000000e+00> : vector<2x64xf32>
    %100 = tpu.matmul %98, %99, %cst_86 {dimension_numbers = #tpu.dot_dimension_numbers<[1], [0], [0], [1], [0, 0, 1, 1], [], []>} : vector<2x128xbf16>, vector<128x64xbf16>, vector<2x64xf32> -> vector<2x64xf32>
    %101 = arith.addf %96, %100 : vector<2x64xf32>
    %c0_87 = arith.constant 0 : index
    %c1_88 = arith.constant 1 : index
    %c0_89 = arith.constant 0 : index
    %102 = vector.load %arg13[%c0_87, %c1_88, %c0_89] : memref<2x8x256xbf16, #tpu.memory_space<vmem>>, vector<2x1x128xbf16>
    %103 = vector.shape_cast %102 : vector<2x1x128xbf16> to vector<2x128xbf16>
    %c128_90 = arith.constant 128 : index
    %c0_91 = arith.constant 0 : index
    %104 = vector.load %arg4[%c128_90, %c0_91] : memref<512x64xbf16, #tpu.memory_space<vmem>>, vector<128x64xbf16>
    %cst_92 = arith.constant dense<0.000000e+00> : vector<2x64xf32>
    %105 = tpu.matmul %103, %104, %cst_92 {dimension_numbers = #tpu.dot_dimension_numbers<[1], [0], [0], [1], [0, 0, 1, 1], [], []>} : vector<2x128xbf16>, vector<128x64xbf16>, vector<2x64xf32> -> vector<2x64xf32>
    %106 = arith.addf %101, %105 : vector<2x64xf32>
    %c0_93 = arith.constant 0 : index
    %c2_94 = arith.constant 2 : index
    %c0_95 = arith.constant 0 : index
    %107 = vector.load %arg13[%c0_93, %c2_94, %c0_95] : memref<2x8x256xbf16, #tpu.memory_space<vmem>>, vector<2x1x128xbf16>
    %108 = vector.shape_cast %107 : vector<2x1x128xbf16> to vector<2x128xbf16>
    %c256 = arith.constant 256 : index
    %c0_96 = arith.constant 0 : index
    %109 = vector.load %arg4[%c256, %c0_96] : memref<512x64xbf16, #tpu.memory_space<vmem>>, vector<128x64xbf16>
    %cst_97 = arith.constant dense<0.000000e+00> : vector<2x64xf32>
    %110 = tpu.matmul %108, %109, %cst_97 {dimension_numbers = #tpu.dot_dimension_numbers<[1], [0], [0], [1], [0, 0, 1, 1], [], []>} : vector<2x128xbf16>, vector<128x64xbf16>, vector<2x64xf32> -> vector<2x64xf32>
    %111 = arith.addf %106, %110 : vector<2x64xf32>
    %c0_98 = arith.constant 0 : index
    %c3_99 = arith.constant 3 : index
    %c0_100 = arith.constant 0 : index
    %112 = vector.load %arg13[%c0_98, %c3_99, %c0_100] : memref<2x8x256xbf16, #tpu.memory_space<vmem>>, vector<2x1x128xbf16>
    %113 = vector.shape_cast %112 : vector<2x1x128xbf16> to vector<2x128xbf16>
    %c384 = arith.constant 384 : index
    %c0_101 = arith.constant 0 : index
    %114 = vector.load %arg4[%c384, %c0_101] : memref<512x64xbf16, #tpu.memory_space<vmem>>, vector<128x64xbf16>
    %cst_102 = arith.constant dense<0.000000e+00> : vector<2x64xf32>
    %115 = tpu.matmul %113, %114, %cst_102 {dimension_numbers = #tpu.dot_dimension_numbers<[1], [0], [0], [1], [0, 0, 1, 1], [], []>} : vector<2x128xbf16>, vector<128x64xbf16>, vector<2x64xf32> -> vector<2x64xf32>
    %116 = arith.addf %111, %115 : vector<2x64xf32>
    %c0_103 = arith.constant 0 : index
    %c0_104 = arith.constant 0 : index
    %117 = vector.load %arg5[%c0_103, %c0_104] : memref<1x64xf32, #tpu.memory_space<vmem>>, vector<1x64xf32>
    %118 = vector.broadcast %117 : vector<1x64xf32> to vector<2x64xf32>
    %119 = arith.addf %116, %118 : vector<2x64xf32>
    %cst_105 = arith.constant 0.000000e+00 : f32
    %120 = vector.broadcast %cst_105 : f32 to vector<2x64xf32>
    %121 = arith.maximumf %119, %120 : vector<2x64xf32>
    %122 = arith.truncf %121 : vector<2x64xf32> to vector<2x64xbf16>
    %c0_106 = arith.constant 0 : index
    %c0_107 = arith.constant 0 : index
    %c0_108 = arith.constant 0 : index
    %123 = vector.load %arg14[%c0_106, %c0_107, %c0_108] : memref<2x3x192xbf16, #tpu.memory_space<vmem>>, vector<2x1x64xbf16>
    %124 = vector.shape_cast %123 : vector<2x1x64xbf16> to vector<2x64xbf16>
    %125 = vector.shape_cast %122 : vector<2x64xbf16> to vector<2x1x64xbf16>
    tpu.vector_store %arg14[%c0_106, %c0_107, %c0_108], %125 {strides = array<i32>} : memref<2x3x192xbf16, #tpu.memory_space<vmem>>, vector<2x1x64xbf16>,
    %cst_109 = arith.constant 0.000000e+00 : f32
    %126 = vector.broadcast %cst_109 : f32 to vector<2x64xf32>
    %c0_110 = arith.constant 0 : index
    %c0_111 = arith.constant 0 : index
    %c64_112 = arith.constant 64 : index
    %127 = vector.load %arg13[%c0_110, %c0_111, %c64_112] : memref<2x8x256xbf16, #tpu.memory_space<vmem>>, vector<2x1x128xbf16>
    %128 = vector.shape_cast %127 : vector<2x1x128xbf16> to vector<2x128xbf16>
    %c0_113 = arith.constant 0 : index
    %c0_114 = arith.constant 0 : index
    %129 = vector.load %arg4[%c0_113, %c0_114] : memref<512x64xbf16, #tpu.memory_space<vmem>>, vector<128x64xbf16>
    %cst_115 = arith.constant dense<0.000000e+00> : vector<2x64xf32>
    %130 = tpu.matmul %128, %129, %cst_115 {dimension_numbers = #tpu.dot_dimension_numbers<[1], [0], [0], [1], [0, 0, 1, 1], [], []>} : vector<2x128xbf16>, vector<128x64xbf16>, vector<2x64xf32> -> vector<2x64xf32>
    %131 = arith.addf %126, %130 : vector<2x64xf32>
    %c0_116 = arith.constant 0 : index
    %c1_117 = arith.constant 1 : index
    %c64_118 = arith.constant 64 : index
    %132 = vector.load %arg13[%c0_116, %c1_117, %c64_118] : memref<2x8x256xbf16, #tpu.memory_space<vmem>>, vector<2x1x128xbf16>
    %133 = vector.shape_cast %132 : vector<2x1x128xbf16> to vector<2x128xbf16>
    %c128_119 = arith.constant 128 : index
    %c0_120 = arith.constant 0 : index
    %134 = vector.load %arg4[%c128_119, %c0_120] : memref<512x64xbf16, #tpu.memory_space<vmem>>, vector<128x64xbf16>
    %cst_121 = arith.constant dense<0.000000e+00> : vector<2x64xf32>
    %135 = tpu.matmul %133, %134, %cst_121 {dimension_numbers = #tpu.dot_dimension_numbers<[1], [0], [0], [1], [0, 0, 1, 1], [], []>} : vector<2x128xbf16>, vector<128x64xbf16>, vector<2x64xf32> -> vector<2x64xf32>
    %136 = arith.addf %131, %135 : vector<2x64xf32>
    %c0_122 = arith.constant 0 : index
    %c2_123 = arith.constant 2 : index
    %c64_124 = arith.constant 64 : index
    %137 = vector.load %arg13[%c0_122, %c2_123, %c64_124] : memref<2x8x256xbf16, #tpu.memory_space<vmem>>, vector<2x1x128xbf16>
    %138 = vector.shape_cast %137 : vector<2x1x128xbf16> to vector<2x128xbf16>
    %c256_125 = arith.constant 256 : index
    %c0_126 = arith.constant 0 : index
    %139 = vector.load %arg4[%c256_125, %c0_126] : memref<512x64xbf16, #tpu.memory_space<vmem>>, vector<128x64xbf16>
    %cst_127 = arith.constant dense<0.000000e+00> : vector<2x64xf32>
    %140 = tpu.matmul %138, %139, %cst_127 {dimension_numbers = #tpu.dot_dimension_numbers<[1], [0], [0], [1], [0, 0, 1, 1], [], []>} : vector<2x128xbf16>, vector<128x64xbf16>, vector<2x64xf32> -> vector<2x64xf32>
    %141 = arith.addf %136, %140 : vector<2x64xf32>
    %c0_128 = arith.constant 0 : index
    %c3_129 = arith.constant 3 : index
    %c64_130 = arith.constant 64 : index
    %142 = vector.load %arg13[%c0_128, %c3_129, %c64_130] : memref<2x8x256xbf16, #tpu.memory_space<vmem>>, vector<2x1x128xbf16>
    %143 = vector.shape_cast %142 : vector<2x1x128xbf16> to vector<2x128xbf16>
    %c384_131 = arith.constant 384 : index
    %c0_132 = arith.constant 0 : index
    %144 = vector.load %arg4[%c384_131, %c0_132] : memref<512x64xbf16, #tpu.memory_space<vmem>>, vector<128x64xbf16>
    %cst_133 = arith.constant dense<0.000000e+00> : vector<2x64xf32>
    %145 = tpu.matmul %143, %144, %cst_133 {dimension_numbers = #tpu.dot_dimension_numbers<[1], [0], [0], [1], [0, 0, 1, 1], [], []>} : vector<2x128xbf16>, vector<128x64xbf16>, vector<2x64xf32> -> vector<2x64xf32>
    %146 = arith.addf %141, %145 : vector<2x64xf32>
    %c0_134 = arith.constant 0 : index
    %c0_135 = arith.constant 0 : index
    %147 = vector.load %arg5[%c0_134, %c0_135] : memref<1x64xf32, #tpu.memory_space<vmem>>, vector<1x64xf32>
    %148 = vector.broadcast %147 : vector<1x64xf32> to vector<2x64xf32>
    %149 = arith.addf %146, %148 : vector<2x64xf32>
    %cst_136 = arith.constant 0.000000e+00 : f32
    %150 = vector.broadcast %cst_136 : f32 to vector<2x64xf32>
    %151 = arith.maximumf %149, %150 : vector<2x64xf32>
    %152 = arith.truncf %151 : vector<2x64xf32> to vector<2x64xbf16>
    %c0_137 = arith.constant 0 : index
    %c0_138 = arith.constant 0 : index
    %c64_139 = arith.constant 64 : index
    %153 = vector.load %arg14[%c0_137, %c0_138, %c64_139] : memref<2x3x192xbf16, #tpu.memory_space<vmem>>, vector<2x1x64xbf16>
    %154 = vector.shape_cast %153 : vector<2x1x64xbf16> to vector<2x64xbf16>
    %155 = vector.shape_cast %152 : vector<2x64xbf16> to vector<2x1x64xbf16>
    tpu.vector_store %arg14[%c0_137, %c0_138, %c64_139], %155 {strides = array<i32>} : memref<2x3x192xbf16, #tpu.memory_space<vmem>>, vector<2x1x64xbf16>,
    %cst_140 = arith.constant 0.000000e+00 : f32
    %156 = vector.broadcast %cst_140 : f32 to vector<2x64xf32>
    %c0_141 = arith.constant 0 : index
    %c0_142 = arith.constant 0 : index
    %c128_143 = arith.constant 128 : index
    %157 = vector.load %arg13[%c0_141, %c0_142, %c128_143] : memref<2x8x256xbf16, #tpu.memory_space<vmem>>, vector<2x1x128xbf16>
    %158 = vector.shape_cast %157 : vector<2x1x128xbf16> to vector<2x128xbf16>
    %c0_144 = arith.constant 0 : index
    %c0_145 = arith.constant 0 : index
    %159 = vector.load %arg4[%c0_144, %c0_145] : memref<512x64xbf16, #tpu.memory_space<vmem>>, vector<128x64xbf16>
    %cst_146 = arith.constant dense<0.000000e+00> : vector<2x64xf32>
    %160 = tpu.matmul %158, %159, %cst_146 {dimension_numbers = #tpu.dot_dimension_numbers<[1], [0], [0], [1], [0, 0, 1, 1], [], []>} : vector<2x128xbf16>, vector<128x64xbf16>, vector<2x64xf32> -> vector<2x64xf32>
    %161 = arith.addf %156, %160 : vector<2x64xf32>
    %c0_147 = arith.constant 0 : index
    %c1_148 = arith.constant 1 : index
    %c128_149 = arith.constant 128 : index
    %162 = vector.load %arg13[%c0_147, %c1_148, %c128_149] : memref<2x8x256xbf16, #tpu.memory_space<vmem>>, vector<2x1x128xbf16>
    %163 = vector.shape_cast %162 : vector<2x1x128xbf16> to vector<2x128xbf16>
    %c128_150 = arith.constant 128 : index
    %c0_151 = arith.constant 0 : index
    %164 = vector.load %arg4[%c128_150, %c0_151] : memref<512x64xbf16, #tpu.memory_space<vmem>>, vector<128x64xbf16>
    %cst_152 = arith.constant dense<0.000000e+00> : vector<2x64xf32>
    %165 = tpu.matmul %163, %164, %cst_152 {dimension_numbers = #tpu.dot_dimension_numbers<[1], [0], [0], [1], [0, 0, 1, 1], [], []>} : vector<2x128xbf16>, vector<128x64xbf16>, vector<2x64xf32> -> vector<2x64xf32>
    %166 = arith.addf %161, %165 : vector<2x64xf32>
    %c0_153 = arith.constant 0 : index
    %c2_154 = arith.constant 2 : index
    %c128_155 = arith.constant 128 : index
    %167 = vector.load %arg13[%c0_153, %c2_154, %c128_155] : memref<2x8x256xbf16, #tpu.memory_space<vmem>>, vector<2x1x128xbf16>
    %168 = vector.shape_cast %167 : vector<2x1x128xbf16> to vector<2x128xbf16>
    %c256_156 = arith.constant 256 : index
    %c0_157 = arith.constant 0 : index
    %169 = vector.load %arg4[%c256_156, %c0_157] : memref<512x64xbf16, #tpu.memory_space<vmem>>, vector<128x64xbf16>
    %cst_158 = arith.constant dense<0.000000e+00> : vector<2x64xf32>
    %170 = tpu.matmul %168, %169, %cst_158 {dimension_numbers = #tpu.dot_dimension_numbers<[1], [0], [0], [1], [0, 0, 1, 1], [], []>} : vector<2x128xbf16>, vector<128x64xbf16>, vector<2x64xf32> -> vector<2x64xf32>
    %171 = arith.addf %166, %170 : vector<2x64xf32>
    %c0_159 = arith.constant 0 : index
    %c3_160 = arith.constant 3 : index
    %c128_161 = arith.constant 128 : index
    %172 = vector.load %arg13[%c0_159, %c3_160, %c128_161] : memref<2x8x256xbf16, #tpu.memory_space<vmem>>, vector<2x1x128xbf16>
    %173 = vector.shape_cast %172 : vector<2x1x128xbf16> to vector<2x128xbf16>
    %c384_162 = arith.constant 384 : index
    %c0_163 = arith.constant 0 : index
    %174 = vector.load %arg4[%c384_162, %c0_163] : memref<512x64xbf16, #tpu.memory_space<vmem>>, vector<128x64xbf16>
    %cst_164 = arith.constant dense<0.000000e+00> : vector<2x64xf32>
    %175 = tpu.matmul %173, %174, %cst_164 {dimension_numbers = #tpu.dot_dimension_numbers<[1], [0], [0], [1], [0, 0, 1, 1], [], []>} : vector<2x128xbf16>, vector<128x64xbf16>, vector<2x64xf32> -> vector<2x64xf32>
    %176 = arith.addf %171, %175 : vector<2x64xf32>
    %c0_165 = arith.constant 0 : index
    %c0_166 = arith.constant 0 : index
    %177 = vector.load %arg5[%c0_165, %c0_166] : memref<1x64xf32, #tpu.memory_space<vmem>>, vector<1x64xf32>
    %178 = vector.broadcast %177 : vector<1x64xf32> to vector<2x64xf32>
    %179 = arith.addf %176, %178 : vector<2x64xf32>
    %cst_167 = arith.constant 0.000000e+00 : f32
    %180 = vector.broadcast %cst_167 : f32 to vector<2x64xf32>
    %181 = arith.maximumf %179, %180 : vector<2x64xf32>
    %182 = arith.truncf %181 : vector<2x64xf32> to vector<2x64xbf16>
    %c0_168 = arith.constant 0 : index
    %c0_169 = arith.constant 0 : index
    %c128_170 = arith.constant 128 : index
    %183 = vector.load %arg14[%c0_168, %c0_169, %c128_170] : memref<2x3x192xbf16, #tpu.memory_space<vmem>>, vector<2x1x64xbf16>
    %184 = vector.shape_cast %183 : vector<2x1x64xbf16> to vector<2x64xbf16>
    %185 = vector.shape_cast %182 : vector<2x64xbf16> to vector<2x1x64xbf16>
    tpu.vector_store %arg14[%c0_168, %c0_169, %c128_170], %185 {strides = array<i32>} : memref<2x3x192xbf16, #tpu.memory_space<vmem>>, vector<2x1x64xbf16>,
    %cst_171 = arith.constant 0.000000e+00 : f32
    %186 = vector.broadcast %cst_171 : f32 to vector<2x64xf32>
    %c0_172 = arith.constant 0 : index
    %c2_173 = arith.constant 2 : index
    %c0_174 = arith.constant 0 : index
    %187 = vector.load %arg13[%c0_172, %c2_173, %c0_174] : memref<2x8x256xbf16, #tpu.memory_space<vmem>>, vector<2x1x128xbf16>
    %188 = vector.shape_cast %187 : vector<2x1x128xbf16> to vector<2x128xbf16>
    %c0_175 = arith.constant 0 : index
    %c0_176 = arith.constant 0 : index
    %189 = vector.load %arg4[%c0_175, %c0_176] : memref<512x64xbf16, #tpu.memory_space<vmem>>, vector<128x64xbf16>
    %cst_177 = arith.constant dense<0.000000e+00> : vector<2x64xf32>
    %190 = tpu.matmul %188, %189, %cst_177 {dimension_numbers = #tpu.dot_dimension_numbers<[1], [0], [0], [1], [0, 0, 1, 1], [], []>} : vector<2x128xbf16>, vector<128x64xbf16>, vector<2x64xf32> -> vector<2x64xf32>
    %191 = arith.addf %186, %190 : vector<2x64xf32>
    %c0_178 = arith.constant 0 : index
    %c3_179 = arith.constant 3 : index
    %c0_180 = arith.constant 0 : index
    %192 = vector.load %arg13[%c0_178, %c3_179, %c0_180] : memref<2x8x256xbf16, #tpu.memory_space<vmem>>, vector<2x1x128xbf16>
    %193 = vector.shape_cast %192 : vector<2x1x128xbf16> to vector<2x128xbf16>
    %c128_181 = arith.constant 128 : index
    %c0_182 = arith.constant 0 : index
    %194 = vector.load %arg4[%c128_181, %c0_182] : memref<512x64xbf16, #tpu.memory_space<vmem>>, vector<128x64xbf16>
    %cst_183 = arith.constant dense<0.000000e+00> : vector<2x64xf32>
    %195 = tpu.matmul %193, %194, %cst_183 {dimension_numbers = #tpu.dot_dimension_numbers<[1], [0], [0], [1], [0, 0, 1, 1], [], []>} : vector<2x128xbf16>, vector<128x64xbf16>, vector<2x64xf32> -> vector<2x64xf32>
    %196 = arith.addf %191, %195 : vector<2x64xf32>
    %c0_184 = arith.constant 0 : index
    %c4_185 = arith.constant 4 : index
    %c0_186 = arith.constant 0 : index
    %197 = vector.load %arg13[%c0_184, %c4_185, %c0_186] : memref<2x8x256xbf16, #tpu.memory_space<vmem>>, vector<2x1x128xbf16>
    %198 = vector.shape_cast %197 : vector<2x1x128xbf16> to vector<2x128xbf16>
    %c256_187 = arith.constant 256 : index
    %c0_188 = arith.constant 0 : index
    %199 = vector.load %arg4[%c256_187, %c0_188] : memref<512x64xbf16, #tpu.memory_space<vmem>>, vector<128x64xbf16>
    %cst_189 = arith.constant dense<0.000000e+00> : vector<2x64xf32>
    %200 = tpu.matmul %198, %199, %cst_189 {dimension_numbers = #tpu.dot_dimension_numbers<[1], [0], [0], [1], [0, 0, 1, 1], [], []>} : vector<2x128xbf16>, vector<128x64xbf16>, vector<2x64xf32> -> vector<2x64xf32>
    %201 = arith.addf %196, %200 : vector<2x64xf32>
    %c0_190 = arith.constant 0 : index
    %c5_191 = arith.constant 5 : index
    %c0_192 = arith.constant 0 : index
    %202 = vector.load %arg13[%c0_190, %c5_191, %c0_192] : memref<2x8x256xbf16, #tpu.memory_space<vmem>>, vector<2x1x128xbf16>
    %203 = vector.shape_cast %202 : vector<2x1x128xbf16> to vector<2x128xbf16>
    %c384_193 = arith.constant 384 : index
    %c0_194 = arith.constant 0 : index
    %204 = vector.load %arg4[%c384_193, %c0_194] : memref<512x64xbf16, #tpu.memory_space<vmem>>, vector<128x64xbf16>
    %cst_195 = arith.constant dense<0.000000e+00> : vector<2x64xf32>
    %205 = tpu.matmul %203, %204, %cst_195 {dimension_numbers = #tpu.dot_dimension_numbers<[1], [0], [0], [1], [0, 0, 1, 1], [], []>} : vector<2x128xbf16>, vector<128x64xbf16>, vector<2x64xf32> -> vector<2x64xf32>
    %206 = arith.addf %201, %205 : vector<2x64xf32>
    %c0_196 = arith.constant 0 : index
    %c0_197 = arith.constant 0 : index
    %207 = vector.load %arg5[%c0_196, %c0_197] : memref<1x64xf32, #tpu.memory_space<vmem>>, vector<1x64xf32>
    %208 = vector.broadcast %207 : vector<1x64xf32> to vector<2x64xf32>
    %209 = arith.addf %206, %208 : vector<2x64xf32>
    %cst_198 = arith.constant 0.000000e+00 : f32
    %210 = vector.broadcast %cst_198 : f32 to vector<2x64xf32>
    %211 = arith.maximumf %209, %210 : vector<2x64xf32>
    %212 = arith.truncf %211 : vector<2x64xf32> to vector<2x64xbf16>
    %c0_199 = arith.constant 0 : index
    %c1_200 = arith.constant 1 : index
    %c0_201 = arith.constant 0 : index
    %213 = vector.load %arg14[%c0_199, %c1_200, %c0_201] : memref<2x3x192xbf16, #tpu.memory_space<vmem>>, vector<2x1x64xbf16>
    %214 = vector.shape_cast %213 : vector<2x1x64xbf16> to vector<2x64xbf16>
    %215 = vector.shape_cast %212 : vector<2x64xbf16> to vector<2x1x64xbf16>
    tpu.vector_store %arg14[%c0_199, %c1_200, %c0_201], %215 {strides = array<i32>} : memref<2x3x192xbf16, #tpu.memory_space<vmem>>, vector<2x1x64xbf16>,
    %cst_202 = arith.constant 0.000000e+00 : f32
    %216 = vector.broadcast %cst_202 : f32 to vector<2x64xf32>
    %c0_203 = arith.constant 0 : index
    %c2_204 = arith.constant 2 : index
    %c64_205 = arith.constant 64 : index
    %217 = vector.load %arg13[%c0_203, %c2_204, %c64_205] : memref<2x8x256xbf16, #tpu.memory_space<vmem>>, vector<2x1x128xbf16>
    %218 = vector.shape_cast %217 : vector<2x1x128xbf16> to vector<2x128xbf16>
    %c0_206 = arith.constant 0 : index
    %c0_207 = arith.constant 0 : index
    %219 = vector.load %arg4[%c0_206, %c0_207] : memref<512x64xbf16, #tpu.memory_space<vmem>>, vector<128x64xbf16>
    %cst_208 = arith.constant dense<0.000000e+00> : vector<2x64xf32>
    %220 = tpu.matmul %218, %219, %cst_208 {dimension_numbers = #tpu.dot_dimension_numbers<[1], [0], [0], [1], [0, 0, 1, 1], [], []>} : vector<2x128xbf16>, vector<128x64xbf16>, vector<2x64xf32> -> vector<2x64xf32>
    %221 = arith.addf %216, %220 : vector<2x64xf32>
    %c0_209 = arith.constant 0 : index
    %c3_210 = arith.constant 3 : index
    %c64_211 = arith.constant 64 : index
    %222 = vector.load %arg13[%c0_209, %c3_210, %c64_211] : memref<2x8x256xbf16, #tpu.memory_space<vmem>>, vector<2x1x128xbf16>
    %223 = vector.shape_cast %222 : vector<2x1x128xbf16> to vector<2x128xbf16>
    %c128_212 = arith.constant 128 : index
    %c0_213 = arith.constant 0 : index
    %224 = vector.load %arg4[%c128_212, %c0_213] : memref<512x64xbf16, #tpu.memory_space<vmem>>, vector<128x64xbf16>
    %cst_214 = arith.constant dense<0.000000e+00> : vector<2x64xf32>
    %225 = tpu.matmul %223, %224, %cst_214 {dimension_numbers = #tpu.dot_dimension_numbers<[1], [0], [0], [1], [0, 0, 1, 1], [], []>} : vector<2x128xbf16>, vector<128x64xbf16>, vector<2x64xf32> -> vector<2x64xf32>
    %226 = arith.addf %221, %225 : vector<2x64xf32>
    %c0_215 = arith.constant 0 : index
    %c4_216 = arith.constant 4 : index
    %c64_217 = arith.constant 64 : index
    %227 = vector.load %arg13[%c0_215, %c4_216, %c64_217] : memref<2x8x256xbf16, #tpu.memory_space<vmem>>, vector<2x1x128xbf16>
    %228 = vector.shape_cast %227 : vector<2x1x128xbf16> to vector<2x128xbf16>
    %c256_218 = arith.constant 256 : index
    %c0_219 = arith.constant 0 : index
    %229 = vector.load %arg4[%c256_218, %c0_219] : memref<512x64xbf16, #tpu.memory_space<vmem>>, vector<128x64xbf16>
    %cst_220 = arith.constant dense<0.000000e+00> : vector<2x64xf32>
    %230 = tpu.matmul %228, %229, %cst_220 {dimension_numbers = #tpu.dot_dimension_numbers<[1], [0], [0], [1], [0, 0, 1, 1], [], []>} : vector<2x128xbf16>, vector<128x64xbf16>, vector<2x64xf32> -> vector<2x64xf32>
    %231 = arith.addf %226, %230 : vector<2x64xf32>
    %c0_221 = arith.constant 0 : index
    %c5_222 = arith.constant 5 : index
    %c64_223 = arith.constant 64 : index
    %232 = vector.load %arg13[%c0_221, %c5_222, %c64_223] : memref<2x8x256xbf16, #tpu.memory_space<vmem>>, vector<2x1x128xbf16>
    %233 = vector.shape_cast %232 : vector<2x1x128xbf16> to vector<2x128xbf16>
    %c384_224 = arith.constant 384 : index
    %c0_225 = arith.constant 0 : index
    %234 = vector.load %arg4[%c384_224, %c0_225] : memref<512x64xbf16, #tpu.memory_space<vmem>>, vector<128x64xbf16>
    %cst_226 = arith.constant dense<0.000000e+00> : vector<2x64xf32>
    %235 = tpu.matmul %233, %234, %cst_226 {dimension_numbers = #tpu.dot_dimension_numbers<[1], [0], [0], [1], [0, 0, 1, 1], [], []>} : vector<2x128xbf16>, vector<128x64xbf16>, vector<2x64xf32> -> vector<2x64xf32>
    %236 = arith.addf %231, %235 : vector<2x64xf32>
    %c0_227 = arith.constant 0 : index
    %c0_228 = arith.constant 0 : index
    %237 = vector.load %arg5[%c0_227, %c0_228] : memref<1x64xf32, #tpu.memory_space<vmem>>, vector<1x64xf32>
    %238 = vector.broadcast %237 : vector<1x64xf32> to vector<2x64xf32>
    %239 = arith.addf %236, %238 : vector<2x64xf32>
    %cst_229 = arith.constant 0.000000e+00 : f32
    %240 = vector.broadcast %cst_229 : f32 to vector<2x64xf32>
    %241 = arith.maximumf %239, %240 : vector<2x64xf32>
    %242 = arith.truncf %241 : vector<2x64xf32> to vector<2x64xbf16>
    %c0_230 = arith.constant 0 : index
    %c1_231 = arith.constant 1 : index
    %c64_232 = arith.constant 64 : index
    %243 = vector.load %arg14[%c0_230, %c1_231, %c64_232] : memref<2x3x192xbf16, #tpu.memory_space<vmem>>, vector<2x1x64xbf16>
    %244 = vector.shape_cast %243 : vector<2x1x64xbf16> to vector<2x64xbf16>
    %245 = vector.shape_cast %242 : vector<2x64xbf16> to vector<2x1x64xbf16>
    tpu.vector_store %arg14[%c0_230, %c1_231, %c64_232], %245 {strides = array<i32>} : memref<2x3x192xbf16, #tpu.memory_space<vmem>>, vector<2x1x64xbf16>,
    %cst_233 = arith.constant 0.000000e+00 : f32
    %246 = vector.broadcast %cst_233 : f32 to vector<2x64xf32>
    %c0_234 = arith.constant 0 : index
    %c2_235 = arith.constant 2 : index
    %c128_236 = arith.constant 128 : index
    %247 = vector.load %arg13[%c0_234, %c2_235, %c128_236] : memref<2x8x256xbf16, #tpu.memory_space<vmem>>, vector<2x1x128xbf16>
    %248 = vector.shape_cast %247 : vector<2x1x128xbf16> to vector<2x128xbf16>
    %c0_237 = arith.constant 0 : index
    %c0_238 = arith.constant 0 : index
    %249 = vector.load %arg4[%c0_237, %c0_238] : memref<512x64xbf16, #tpu.memory_space<vmem>>, vector<128x64xbf16>
    %cst_239 = arith.constant dense<0.000000e+00> : vector<2x64xf32>
    %250 = tpu.matmul %248, %249, %cst_239 {dimension_numbers = #tpu.dot_dimension_numbers<[1], [0], [0], [1], [0, 0, 1, 1], [], []>} : vector<2x128xbf16>, vector<128x64xbf16>, vector<2x64xf32> -> vector<2x64xf32>
    %251 = arith.addf %246, %250 : vector<2x64xf32>
    %c0_240 = arith.constant 0 : index
    %c3_241 = arith.constant 3 : index
    %c128_242 = arith.constant 128 : index
    %252 = vector.load %arg13[%c0_240, %c3_241, %c128_242] : memref<2x8x256xbf16, #tpu.memory_space<vmem>>, vector<2x1x128xbf16>
    %253 = vector.shape_cast %252 : vector<2x1x128xbf16> to vector<2x128xbf16>
    %c128_243 = arith.constant 128 : index
    %c0_244 = arith.constant 0 : index
    %254 = vector.load %arg4[%c128_243, %c0_244] : memref<512x64xbf16, #tpu.memory_space<vmem>>, vector<128x64xbf16>
    %cst_245 = arith.constant dense<0.000000e+00> : vector<2x64xf32>
    %255 = tpu.matmul %253, %254, %cst_245 {dimension_numbers = #tpu.dot_dimension_numbers<[1], [0], [0], [1], [0, 0, 1, 1], [], []>} : vector<2x128xbf16>, vector<128x64xbf16>, vector<2x64xf32> -> vector<2x64xf32>
    %256 = arith.addf %251, %255 : vector<2x64xf32>
    %c0_246 = arith.constant 0 : index
    %c4_247 = arith.constant 4 : index
    %c128_248 = arith.constant 128 : index
    %257 = vector.load %arg13[%c0_246, %c4_247, %c128_248] : memref<2x8x256xbf16, #tpu.memory_space<vmem>>, vector<2x1x128xbf16>
    %258 = vector.shape_cast %257 : vector<2x1x128xbf16> to vector<2x128xbf16>
    %c256_249 = arith.constant 256 : index
    %c0_250 = arith.constant 0 : index
    %259 = vector.load %arg4[%c256_249, %c0_250] : memref<512x64xbf16, #tpu.memory_space<vmem>>, vector<128x64xbf16>
    %cst_251 = arith.constant dense<0.000000e+00> : vector<2x64xf32>
    %260 = tpu.matmul %258, %259, %cst_251 {dimension_numbers = #tpu.dot_dimension_numbers<[1], [0], [0], [1], [0, 0, 1, 1], [], []>} : vector<2x128xbf16>, vector<128x64xbf16>, vector<2x64xf32> -> vector<2x64xf32>
    %261 = arith.addf %256, %260 : vector<2x64xf32>
    %c0_252 = arith.constant 0 : index
    %c5_253 = arith.constant 5 : index
    %c128_254 = arith.constant 128 : index
    %262 = vector.load %arg13[%c0_252, %c5_253, %c128_254] : memref<2x8x256xbf16, #tpu.memory_space<vmem>>, vector<2x1x128xbf16>
    %263 = vector.shape_cast %262 : vector<2x1x128xbf16> to vector<2x128xbf16>
    %c384_255 = arith.constant 384 : index
    %c0_256 = arith.constant 0 : index
    %264 = vector.load %arg4[%c384_255, %c0_256] : memref<512x64xbf16, #tpu.memory_space<vmem>>, vector<128x64xbf16>
    %cst_257 = arith.constant dense<0.000000e+00> : vector<2x64xf32>
    %265 = tpu.matmul %263, %264, %cst_257 {dimension_numbers = #tpu.dot_dimension_numbers<[1], [0], [0], [1], [0, 0, 1, 1], [], []>} : vector<2x128xbf16>, vector<128x64xbf16>, vector<2x64xf32> -> vector<2x64xf32>
    %266 = arith.addf %261, %265 : vector<2x64xf32>
    %c0_258 = arith.constant 0 : index
    %c0_259 = arith.constant 0 : index
    %267 = vector.load %arg5[%c0_258, %c0_259] : memref<1x64xf32, #tpu.memory_space<vmem>>, vector<1x64xf32>
    %268 = vector.broadcast %267 : vector<1x64xf32> to vector<2x64xf32>
    %269 = arith.addf %266, %268 : vector<2x64xf32>
    %cst_260 = arith.constant 0.000000e+00 : f32
    %270 = vector.broadcast %cst_260 : f32 to vector<2x64xf32>
    %271 = arith.maximumf %269, %270 : vector<2x64xf32>
    %272 = arith.truncf %271 : vector<2x64xf32> to vector<2x64xbf16>
    %c0_261 = arith.constant 0 : index
    %c1_262 = arith.constant 1 : index
    %c128_263 = arith.constant 128 : index
    %273 = vector.load %arg14[%c0_261, %c1_262, %c128_263] : memref<2x3x192xbf16, #tpu.memory_space<vmem>>, vector<2x1x64xbf16>
    %274 = vector.shape_cast %273 : vector<2x1x64xbf16> to vector<2x64xbf16>
    %275 = vector.shape_cast %272 : vector<2x64xbf16> to vector<2x1x64xbf16>
    tpu.vector_store %arg14[%c0_261, %c1_262, %c128_263], %275 {strides = array<i32>} : memref<2x3x192xbf16, #tpu.memory_space<vmem>>, vector<2x1x64xbf16>,
    %cst_264 = arith.constant 0.000000e+00 : f32
    %276 = vector.broadcast %cst_264 : f32 to vector<2x64xf32>
    %c0_265 = arith.constant 0 : index
    %c4_266 = arith.constant 4 : index
    %c0_267 = arith.constant 0 : index
    %277 = vector.load %arg13[%c0_265, %c4_266, %c0_267] : memref<2x8x256xbf16, #tpu.memory_space<vmem>>, vector<2x1x128xbf16>
    %278 = vector.shape_cast %277 : vector<2x1x128xbf16> to vector<2x128xbf16>
    %c0_268 = arith.constant 0 : index
    %c0_269 = arith.constant 0 : index
    %279 = vector.load %arg4[%c0_268, %c0_269] : memref<512x64xbf16, #tpu.memory_space<vmem>>, vector<128x64xbf16>
    %cst_270 = arith.constant dense<0.000000e+00> : vector<2x64xf32>
    %280 = tpu.matmul %278, %279, %cst_270 {dimension_numbers = #tpu.dot_dimension_numbers<[1], [0], [0], [1], [0, 0, 1, 1], [], []>} : vector<2x128xbf16>, vector<128x64xbf16>, vector<2x64xf32> -> vector<2x64xf32>
    %281 = arith.addf %276, %280 : vector<2x64xf32>
    %c0_271 = arith.constant 0 : index
    %c5_272 = arith.constant 5 : index
    %c0_273 = arith.constant 0 : index
    %282 = vector.load %arg13[%c0_271, %c5_272, %c0_273] : memref<2x8x256xbf16, #tpu.memory_space<vmem>>, vector<2x1x128xbf16>
    %283 = vector.shape_cast %282 : vector<2x1x128xbf16> to vector<2x128xbf16>
    %c128_274 = arith.constant 128 : index
    %c0_275 = arith.constant 0 : index
    %284 = vector.load %arg4[%c128_274, %c0_275] : memref<512x64xbf16, #tpu.memory_space<vmem>>, vector<128x64xbf16>
    %cst_276 = arith.constant dense<0.000000e+00> : vector<2x64xf32>
    %285 = tpu.matmul %283, %284, %cst_276 {dimension_numbers = #tpu.dot_dimension_numbers<[1], [0], [0], [1], [0, 0, 1, 1], [], []>} : vector<2x128xbf16>, vector<128x64xbf16>, vector<2x64xf32> -> vector<2x64xf32>
    %286 = arith.addf %281, %285 : vector<2x64xf32>
    %c0_277 = arith.constant 0 : index
    %c6_278 = arith.constant 6 : index
    %c0_279 = arith.constant 0 : index
    %287 = vector.load %arg13[%c0_277, %c6_278, %c0_279] : memref<2x8x256xbf16, #tpu.memory_space<vmem>>, vector<2x1x128xbf16>
    %288 = vector.shape_cast %287 : vector<2x1x128xbf16> to vector<2x128xbf16>
    %c256_280 = arith.constant 256 : index
    %c0_281 = arith.constant 0 : index
    %289 = vector.load %arg4[%c256_280, %c0_281] : memref<512x64xbf16, #tpu.memory_space<vmem>>, vector<128x64xbf16>
    %cst_282 = arith.constant dense<0.000000e+00> : vector<2x64xf32>
    %290 = tpu.matmul %288, %289, %cst_282 {dimension_numbers = #tpu.dot_dimension_numbers<[1], [0], [0], [1], [0, 0, 1, 1], [], []>} : vector<2x128xbf16>, vector<128x64xbf16>, vector<2x64xf32> -> vector<2x64xf32>
    %291 = arith.addf %286, %290 : vector<2x64xf32>
    %c0_283 = arith.constant 0 : index
    %c7_284 = arith.constant 7 : index
    %c0_285 = arith.constant 0 : index
    %292 = vector.load %arg13[%c0_283, %c7_284, %c0_285] : memref<2x8x256xbf16, #tpu.memory_space<vmem>>, vector<2x1x128xbf16>
    %293 = vector.shape_cast %292 : vector<2x1x128xbf16> to vector<2x128xbf16>
    %c384_286 = arith.constant 384 : index
    %c0_287 = arith.constant 0 : index
    %294 = vector.load %arg4[%c384_286, %c0_287] : memref<512x64xbf16, #tpu.memory_space<vmem>>, vector<128x64xbf16>
    %cst_288 = arith.constant dense<0.000000e+00> : vector<2x64xf32>
    %295 = tpu.matmul %293, %294, %cst_288 {dimension_numbers = #tpu.dot_dimension_numbers<[1], [0], [0], [1], [0, 0, 1, 1], [], []>} : vector<2x128xbf16>, vector<128x64xbf16>, vector<2x64xf32> -> vector<2x64xf32>
    %296 = arith.addf %291, %295 : vector<2x64xf32>
    %c0_289 = arith.constant 0 : index
    %c0_290 = arith.constant 0 : index
    %297 = vector.load %arg5[%c0_289, %c0_290] : memref<1x64xf32, #tpu.memory_space<vmem>>, vector<1x64xf32>
    %298 = vector.broadcast %297 : vector<1x64xf32> to vector<2x64xf32>
    %299 = arith.addf %296, %298 : vector<2x64xf32>
    %cst_291 = arith.constant 0.000000e+00 : f32
    %300 = vector.broadcast %cst_291 : f32 to vector<2x64xf32>
    %301 = arith.maximumf %299, %300 : vector<2x64xf32>
    %302 = arith.truncf %301 : vector<2x64xf32> to vector<2x64xbf16>
    %c0_292 = arith.constant 0 : index
    %c2_293 = arith.constant 2 : index
    %c0_294 = arith.constant 0 : index
    %303 = vector.load %arg14[%c0_292, %c2_293, %c0_294] : memref<2x3x192xbf16, #tpu.memory_space<vmem>>, vector<2x1x64xbf16>
    %304 = vector.shape_cast %303 : vector<2x1x64xbf16> to vector<2x64xbf16>
    %305 = vector.shape_cast %302 : vector<2x64xbf16> to vector<2x1x64xbf16>
    tpu.vector_store %arg14[%c0_292, %c2_293, %c0_294], %305 {strides = array<i32>} : memref<2x3x192xbf16, #tpu.memory_space<vmem>>, vector<2x1x64xbf16>,
    %cst_295 = arith.constant 0.000000e+00 : f32
    %306 = vector.broadcast %cst_295 : f32 to vector<2x64xf32>
    %c0_296 = arith.constant 0 : index
    %c4_297 = arith.constant 4 : index
    %c64_298 = arith.constant 64 : index
    %307 = vector.load %arg13[%c0_296, %c4_297, %c64_298] : memref<2x8x256xbf16, #tpu.memory_space<vmem>>, vector<2x1x128xbf16>
    %308 = vector.shape_cast %307 : vector<2x1x128xbf16> to vector<2x128xbf16>
    %c0_299 = arith.constant 0 : index
    %c0_300 = arith.constant 0 : index
    %309 = vector.load %arg4[%c0_299, %c0_300] : memref<512x64xbf16, #tpu.memory_space<vmem>>, vector<128x64xbf16>
    %cst_301 = arith.constant dense<0.000000e+00> : vector<2x64xf32>
    %310 = tpu.matmul %308, %309, %cst_301 {dimension_numbers = #tpu.dot_dimension_numbers<[1], [0], [0], [1], [0, 0, 1, 1], [], []>} : vector<2x128xbf16>, vector<128x64xbf16>, vector<2x64xf32> -> vector<2x64xf32>
    %311 = arith.addf %306, %310 : vector<2x64xf32>
    %c0_302 = arith.constant 0 : index
    %c5_303 = arith.constant 5 : index
    %c64_304 = arith.constant 64 : index
    %312 = vector.load %arg13[%c0_302, %c5_303, %c64_304] : memref<2x8x256xbf16, #tpu.memory_space<vmem>>, vector<2x1x128xbf16>
    %313 = vector.shape_cast %312 : vector<2x1x128xbf16> to vector<2x128xbf16>
    %c128_305 = arith.constant 128 : index
    %c0_306 = arith.constant 0 : index
    %314 = vector.load %arg4[%c128_305, %c0_306] : memref<512x64xbf16, #tpu.memory_space<vmem>>, vector<128x64xbf16>
    %cst_307 = arith.constant dense<0.000000e+00> : vector<2x64xf32>
    %315 = tpu.matmul %313, %314, %cst_307 {dimension_numbers = #tpu.dot_dimension_numbers<[1], [0], [0], [1], [0, 0, 1, 1], [], []>} : vector<2x128xbf16>, vector<128x64xbf16>, vector<2x64xf32> -> vector<2x64xf32>
    %316 = arith.addf %311, %315 : vector<2x64xf32>
    %c0_308 = arith.constant 0 : index
    %c6_309 = arith.constant 6 : index
    %c64_310 = arith.constant 64 : index
    %317 = vector.load %arg13[%c0_308, %c6_309, %c64_310] : memref<2x8x256xbf16, #tpu.memory_space<vmem>>, vector<2x1x128xbf16>
    %318 = vector.shape_cast %317 : vector<2x1x128xbf16> to vector<2x128xbf16>
    %c256_311 = arith.constant 256 : index
    %c0_312 = arith.constant 0 : index
    %319 = vector.load %arg4[%c256_311, %c0_312] : memref<512x64xbf16, #tpu.memory_space<vmem>>, vector<128x64xbf16>
    %cst_313 = arith.constant dense<0.000000e+00> : vector<2x64xf32>
    %320 = tpu.matmul %318, %319, %cst_313 {dimension_numbers = #tpu.dot_dimension_numbers<[1], [0], [0], [1], [0, 0, 1, 1], [], []>} : vector<2x128xbf16>, vector<128x64xbf16>, vector<2x64xf32> -> vector<2x64xf32>
    %321 = arith.addf %316, %320 : vector<2x64xf32>
    %c0_314 = arith.constant 0 : index
    %c7_315 = arith.constant 7 : index
    %c64_316 = arith.constant 64 : index
    %322 = vector.load %arg13[%c0_314, %c7_315, %c64_316] : memref<2x8x256xbf16, #tpu.memory_space<vmem>>, vector<2x1x128xbf16>
    %323 = vector.shape_cast %322 : vector<2x1x128xbf16> to vector<2x128xbf16>
    %c384_317 = arith.constant 384 : index
    %c0_318 = arith.constant 0 : index
    %324 = vector.load %arg4[%c384_317, %c0_318] : memref<512x64xbf16, #tpu.memory_space<vmem>>, vector<128x64xbf16>
    %cst_319 = arith.constant dense<0.000000e+00> : vector<2x64xf32>
    %325 = tpu.matmul %323, %324, %cst_319 {dimension_numbers = #tpu.dot_dimension_numbers<[1], [0], [0], [1], [0, 0, 1, 1], [], []>} : vector<2x128xbf16>, vector<128x64xbf16>, vector<2x64xf32> -> vector<2x64xf32>
    %326 = arith.addf %321, %325 : vector<2x64xf32>
    %c0_320 = arith.constant 0 : index
    %c0_321 = arith.constant 0 : index
    %327 = vector.load %arg5[%c0_320, %c0_321] : memref<1x64xf32, #tpu.memory_space<vmem>>, vector<1x64xf32>
    %328 = vector.broadcast %327 : vector<1x64xf32> to vector<2x64xf32>
    %329 = arith.addf %326, %328 : vector<2x64xf32>
    %cst_322 = arith.constant 0.000000e+00 : f32
    %330 = vector.broadcast %cst_322 : f32 to vector<2x64xf32>
    %331 = arith.maximumf %329, %330 : vector<2x64xf32>
    %332 = arith.truncf %331 : vector<2x64xf32> to vector<2x64xbf16>
    %c0_323 = arith.constant 0 : index
    %c2_324 = arith.constant 2 : index
    %c64_325 = arith.constant 64 : index
    %333 = vector.load %arg14[%c0_323, %c2_324, %c64_325] : memref<2x3x192xbf16, #tpu.memory_space<vmem>>, vector<2x1x64xbf16>
    %334 = vector.shape_cast %333 : vector<2x1x64xbf16> to vector<2x64xbf16>
    %335 = vector.shape_cast %332 : vector<2x64xbf16> to vector<2x1x64xbf16>
    tpu.vector_store %arg14[%c0_323, %c2_324, %c64_325], %335 {strides = array<i32>} : memref<2x3x192xbf16, #tpu.memory_space<vmem>>, vector<2x1x64xbf16>,
    %cst_326 = arith.constant 0.000000e+00 : f32
    %336 = vector.broadcast %cst_326 : f32 to vector<2x64xf32>
    %c0_327 = arith.constant 0 : index
    %c4_328 = arith.constant 4 : index
    %c128_329 = arith.constant 128 : index
    %337 = vector.load %arg13[%c0_327, %c4_328, %c128_329] : memref<2x8x256xbf16, #tpu.memory_space<vmem>>, vector<2x1x128xbf16>
    %338 = vector.shape_cast %337 : vector<2x1x128xbf16> to vector<2x128xbf16>
    %c0_330 = arith.constant 0 : index
    %c0_331 = arith.constant 0 : index
    %339 = vector.load %arg4[%c0_330, %c0_331] : memref<512x64xbf16, #tpu.memory_space<vmem>>, vector<128x64xbf16>
    %cst_332 = arith.constant dense<0.000000e+00> : vector<2x64xf32>
    %340 = tpu.matmul %338, %339, %cst_332 {dimension_numbers = #tpu.dot_dimension_numbers<[1], [0], [0], [1], [0, 0, 1, 1], [], []>} : vector<2x128xbf16>, vector<128x64xbf16>, vector<2x64xf32> -> vector<2x64xf32>
    %341 = arith.addf %336, %340 : vector<2x64xf32>
    %c0_333 = arith.constant 0 : index
    %c5_334 = arith.constant 5 : index
    %c128_335 = arith.constant 128 : index
    %342 = vector.load %arg13[%c0_333, %c5_334, %c128_335] : memref<2x8x256xbf16, #tpu.memory_space<vmem>>, vector<2x1x128xbf16>
    %343 = vector.shape_cast %342 : vector<2x1x128xbf16> to vector<2x128xbf16>
    %c128_336 = arith.constant 128 : index
    %c0_337 = arith.constant 0 : index
    %344 = vector.load %arg4[%c128_336, %c0_337] : memref<512x64xbf16, #tpu.memory_space<vmem>>, vector<128x64xbf16>
    %cst_338 = arith.constant dense<0.000000e+00> : vector<2x64xf32>
    %345 = tpu.matmul %343, %344, %cst_338 {dimension_numbers = #tpu.dot_dimension_numbers<[1], [0], [0], [1], [0, 0, 1, 1], [], []>} : vector<2x128xbf16>, vector<128x64xbf16>, vector<2x64xf32> -> vector<2x64xf32>
    %346 = arith.addf %341, %345 : vector<2x64xf32>
    %c0_339 = arith.constant 0 : index
    %c6_340 = arith.constant 6 : index
    %c128_341 = arith.constant 128 : index
    %347 = vector.load %arg13[%c0_339, %c6_340, %c128_341] : memref<2x8x256xbf16, #tpu.memory_space<vmem>>, vector<2x1x128xbf16>
    %348 = vector.shape_cast %347 : vector<2x1x128xbf16> to vector<2x128xbf16>
    %c256_342 = arith.constant 256 : index
    %c0_343 = arith.constant 0 : index
    %349 = vector.load %arg4[%c256_342, %c0_343] : memref<512x64xbf16, #tpu.memory_space<vmem>>, vector<128x64xbf16>
    %cst_344 = arith.constant dense<0.000000e+00> : vector<2x64xf32>
    %350 = tpu.matmul %348, %349, %cst_344 {dimension_numbers = #tpu.dot_dimension_numbers<[1], [0], [0], [1], [0, 0, 1, 1], [], []>} : vector<2x128xbf16>, vector<128x64xbf16>, vector<2x64xf32> -> vector<2x64xf32>
    %351 = arith.addf %346, %350 : vector<2x64xf32>
    %c0_345 = arith.constant 0 : index
    %c7_346 = arith.constant 7 : index
    %c128_347 = arith.constant 128 : index
    %352 = vector.load %arg13[%c0_345, %c7_346, %c128_347] : memref<2x8x256xbf16, #tpu.memory_space<vmem>>, vector<2x1x128xbf16>
    %353 = vector.shape_cast %352 : vector<2x1x128xbf16> to vector<2x128xbf16>
    %c384_348 = arith.constant 384 : index
    %c0_349 = arith.constant 0 : index
    %354 = vector.load %arg4[%c384_348, %c0_349] : memref<512x64xbf16, #tpu.memory_space<vmem>>, vector<128x64xbf16>
    %cst_350 = arith.constant dense<0.000000e+00> : vector<2x64xf32>
    %355 = tpu.matmul %353, %354, %cst_350 {dimension_numbers = #tpu.dot_dimension_numbers<[1], [0], [0], [1], [0, 0, 1, 1], [], []>} : vector<2x128xbf16>, vector<128x64xbf16>, vector<2x64xf32> -> vector<2x64xf32>
    %356 = arith.addf %351, %355 : vector<2x64xf32>
    %c0_351 = arith.constant 0 : index
    %c0_352 = arith.constant 0 : index
    %357 = vector.load %arg5[%c0_351, %c0_352] : memref<1x64xf32, #tpu.memory_space<vmem>>, vector<1x64xf32>
    %358 = vector.broadcast %357 : vector<1x64xf32> to vector<2x64xf32>
    %359 = arith.addf %356, %358 : vector<2x64xf32>
    %cst_353 = arith.constant 0.000000e+00 : f32
    %360 = vector.broadcast %cst_353 : f32 to vector<2x64xf32>
    %361 = arith.maximumf %359, %360 : vector<2x64xf32>
    %362 = arith.truncf %361 : vector<2x64xf32> to vector<2x64xbf16>
    %c0_354 = arith.constant 0 : index
    %c2_355 = arith.constant 2 : index
    %c128_356 = arith.constant 128 : index
    %363 = vector.load %arg14[%c0_354, %c2_355, %c128_356] : memref<2x3x192xbf16, #tpu.memory_space<vmem>>, vector<2x1x64xbf16>
    %364 = vector.shape_cast %363 : vector<2x1x64xbf16> to vector<2x64xbf16>
    %365 = vector.shape_cast %362 : vector<2x64xbf16> to vector<2x1x64xbf16>
    tpu.vector_store %arg14[%c0_354, %c2_355, %c128_356], %365 {strides = array<i32>} : memref<2x3x192xbf16, #tpu.memory_space<vmem>>, vector<2x1x64xbf16>,
    %cst_357 = arith.constant 0.000000e+00 : f32
    %366 = vector.broadcast %cst_357 : f32 to vector<2x64xf32>
    %c0_358 = arith.constant 0 : index
    %c0_359 = arith.constant 0 : index
    %c0_360 = arith.constant 0 : index
    %367 = vector.load %arg14[%c0_358, %c0_359, %c0_360] : memref<2x3x192xbf16, #tpu.memory_space<vmem>>, vector<2x1x192xbf16>
    %368 = vector.shape_cast %367 : vector<2x1x192xbf16> to vector<2x192xbf16>
    %c0_361 = arith.constant 0 : index
    %c0_362 = arith.constant 0 : index
    %369 = vector.load %arg6[%c0_361, %c0_362] : memref<576x64xbf16, #tpu.memory_space<vmem>>, vector<192x64xbf16>
    %cst_363 = arith.constant dense<0.000000e+00> : vector<2x64xf32>
    %370 = tpu.matmul %368, %369, %cst_363 {dimension_numbers = #tpu.dot_dimension_numbers<[1], [0], [0], [1], [0, 0, 1, 1], [], []>} : vector<2x192xbf16>, vector<192x64xbf16>, vector<2x64xf32> -> vector<2x64xf32>
    %371 = arith.addf %366, %370 : vector<2x64xf32>
    %c0_364 = arith.constant 0 : index
    %c1_365 = arith.constant 1 : index
    %c0_366 = arith.constant 0 : index
    %372 = vector.load %arg14[%c0_364, %c1_365, %c0_366] : memref<2x3x192xbf16, #tpu.memory_space<vmem>>, vector<2x1x192xbf16>
    %373 = vector.shape_cast %372 : vector<2x1x192xbf16> to vector<2x192xbf16>
    %c192_367 = arith.constant 192 : index
    %c0_368 = arith.constant 0 : index
    %374 = vector.load %arg6[%c192_367, %c0_368] : memref<576x64xbf16, #tpu.memory_space<vmem>>, vector<192x64xbf16>
    %cst_369 = arith.constant dense<0.000000e+00> : vector<2x64xf32>
    %375 = tpu.matmul %373, %374, %cst_369 {dimension_numbers = #tpu.dot_dimension_numbers<[1], [0], [0], [1], [0, 0, 1, 1], [], []>} : vector<2x192xbf16>, vector<192x64xbf16>, vector<2x64xf32> -> vector<2x64xf32>
    %376 = arith.addf %371, %375 : vector<2x64xf32>
    %c0_370 = arith.constant 0 : index
    %c2_371 = arith.constant 2 : index
    %c0_372 = arith.constant 0 : index
    %377 = vector.load %arg14[%c0_370, %c2_371, %c0_372] : memref<2x3x192xbf16, #tpu.memory_space<vmem>>, vector<2x1x192xbf16>
    %378 = vector.shape_cast %377 : vector<2x1x192xbf16> to vector<2x192xbf16>
    %c384_373 = arith.constant 384 : index
    %c0_374 = arith.constant 0 : index
    %379 = vector.load %arg6[%c384_373, %c0_374] : memref<576x64xbf16, #tpu.memory_space<vmem>>, vector<192x64xbf16>
    %cst_375 = arith.constant dense<0.000000e+00> : vector<2x64xf32>
    %380 = tpu.matmul %378, %379, %cst_375 {dimension_numbers = #tpu.dot_dimension_numbers<[1], [0], [0], [1], [0, 0, 1, 1], [], []>} : vector<2x192xbf16>, vector<192x64xbf16>, vector<2x64xf32> -> vector<2x64xf32>
    %381 = arith.addf %376, %380 : vector<2x64xf32>
    %c0_376 = arith.constant 0 : index
    %c0_377 = arith.constant 0 : index
    %382 = vector.load %arg7[%c0_376, %c0_377] : memref<1x64xf32, #tpu.memory_space<vmem>>, vector<1x64xf32>
    %383 = vector.broadcast %382 : vector<1x64xf32> to vector<2x64xf32>
    %384 = arith.addf %381, %383 : vector<2x64xf32>
    %cst_378 = arith.constant 0.000000e+00 : f32
    %385 = vector.broadcast %cst_378 : f32 to vector<2x64xf32>
    %386 = arith.maximumf %384, %385 : vector<2x64xf32>
    %387 = arith.truncf %386 : vector<2x64xf32> to vector<2x64xbf16>
    %c0_379 = arith.constant 0 : index
    %c0_380 = arith.constant 0 : index
    %c0_381 = arith.constant 0 : index
    %388 = vector.load %arg15[%c0_379, %c0_380, %c0_381] : memref<2x1x64xbf16, #tpu.memory_space<vmem>>, vector<2x1x64xbf16>
    %389 = vector.shape_cast %388 : vector<2x1x64xbf16> to vector<2x64xbf16>
    %390 = vector.shape_cast %387 : vector<2x64xbf16> to vector<2x1x64xbf16>
    tpu.vector_store %arg15[%c0_379, %c0_380, %c0_381], %390 {strides = array<i32>} : memref<2x1x64xbf16, #tpu.memory_space<vmem>>, vector<2x1x64xbf16>,
    %cst_382 = arith.constant 0.000000e+00 : f32
    %391 = vector.broadcast %cst_382 : f32 to vector<2x512xf32>
    %c0_383 = arith.constant 0 : index
    %c0_384 = arith.constant 0 : index
    %c0_385 = arith.constant 0 : index
    %392 = vector.load %arg15[%c0_383, %c0_384, %c0_385] : memref<2x1x64xbf16, #tpu.memory_space<vmem>>, vector<2x1x64xbf16>
    %393 = vector.shape_cast %392 : vector<2x1x64xbf16> to vector<2x64xbf16>
    %c0_386 = arith.constant 0 : index
    %c0_387 = arith.constant 0 : index
    %394 = vector.load %arg8[%c0_386, %c0_387] : memref<64x512xbf16, #tpu.memory_space<vmem>>, vector<64x512xbf16>
    %cst_388 = arith.constant dense<0.000000e+00> : vector<2x512xf32>
    %395 = tpu.matmul %393, %394, %cst_388 {dimension_numbers = #tpu.dot_dimension_numbers<[1], [0], [0], [1], [0, 0, 1, 1], [], []>} : vector<2x64xbf16>, vector<64x512xbf16>, vector<2x512xf32> -> vector<2x512xf32>
    %396 = arith.addf %391, %395 : vector<2x512xf32>
    %c0_389 = arith.constant 0 : index
    %c0_390 = arith.constant 0 : index
    %397 = vector.load %arg9[%c0_389, %c0_390] : memref<1x512xf32, #tpu.memory_space<vmem>>, vector<1x512xf32>
    %398 = vector.broadcast %397 : vector<1x512xf32> to vector<2x512xf32>
    %399 = arith.addf %396, %398 : vector<2x512xf32>
    %cst_391 = arith.constant 0.000000e+00 : f32
    %400 = vector.broadcast %cst_391 : f32 to vector<2x512xf32>
    %401 = arith.maximumf %399, %400 : vector<2x512xf32>
    %402 = arith.truncf %401 : vector<2x512xf32> to vector<2x512xbf16>
    %c0_392 = arith.constant 0 : index
    %c0_393 = arith.constant 0 : index
    %403 = vector.load %arg10[%c0_392, %c0_393] : memref<512x128xbf16, #tpu.memory_space<vmem>>, vector<512x128xbf16>
    %cst_394 = arith.constant dense<0.000000e+00> : vector<2x128xf32>
    %404 = tpu.matmul %402, %403, %cst_394 {dimension_numbers = #tpu.dot_dimension_numbers<[1], [0], [0], [1], [0, 0, 1, 1], [], []>} : vector<2x512xbf16>, vector<512x128xbf16>, vector<2x128xf32> -> vector<2x128xf32>
    %c0_395 = arith.constant 0 : index
    %c0_396 = arith.constant 0 : index
    %405 = vector.load %arg11[%c0_395, %c0_396] : memref<1x128xf32, #tpu.memory_space<vmem>>, vector<1x128xf32>
    %406 = vector.broadcast %405 : vector<1x128xf32> to vector<2x128xf32>
    %407 = arith.addf %404, %406 : vector<2x128xf32>
    %c0_397 = arith.constant 0 : index
    %c0_398 = arith.constant 0 : index
    %408 = vector.load %arg12[%c0_397, %c0_398] : memref<2x128xf32, #tpu.memory_space<vmem>>, vector<2x128xf32>
    tpu.vector_store %arg12[%c0_397, %c0_398], %407 {strides = array<i32>} : memref<2x128xf32, #tpu.memory_space<vmem>>, vector<2x128xf32>,
    return
  }
  func.func @transform_0(%arg0: i32) -> (i32, i32, i32) {
    %c0_i32 = arith.constant 0 : i32
    %c0_i32_0 = arith.constant 0 : i32
    %c0_i32_1 = arith.constant 0 : i32
    return %c0_i32, %arg0, %c0_i32_0 : i32, i32, i32
  }
  func.func @transform_1(%arg0: i32) -> (i32, i32) {
    %c0_i32 = arith.constant 0 : i32
    %c0_i32_0 = arith.constant 0 : i32
    %c0_i32_1 = arith.constant 0 : i32
    return %c0_i32, %c0_i32_0 : i32, i32
  }
  func.func @transform_2(%arg0: i32) -> (i32, i32) {
    %c0_i32 = arith.constant 0 : i32
    %c0_i32_0 = arith.constant 0 : i32
    %c0_i32_1 = arith.constant 0 : i32
    return %c0_i32, %c0_i32_0 : i32, i32
  }
  func.func @transform_3(%arg0: i32) -> (i32, i32) {
    %c0_i32 = arith.constant 0 : i32
    %c0_i32_0 = arith.constant 0 : i32
    %c0_i32_1 = arith.constant 0 : i32
    return %c0_i32, %c0_i32_0 : i32, i32
  }
  func.func @transform_4(%arg0: i32) -> (i32, i32) {
    %c0_i32 = arith.constant 0 : i32
    %c0_i32_0 = arith.constant 0 : i32
    %c0_i32_1 = arith.constant 0 : i32
    return %c0_i32, %c0_i32_0 : i32, i32
  }
  func.func @transform_5(%arg0: i32) -> (i32, i32) {
    %c0_i32 = arith.constant 0 : i32
    %c0_i32_0 = arith.constant 0 : i32
    %c0_i32_1 = arith.constant 0 : i32
    return %c0_i32, %c0_i32_0 : i32, i32
  }
  func.func @transform_6(%arg0: i32) -> (i32, i32) {
    %c0_i32 = arith.constant 0 : i32
    %c0_i32_0 = arith.constant 0 : i32
    %c0_i32_1 = arith.constant 0 : i32
    return %c0_i32, %c0_i32_0 : i32, i32
  }
  func.func @transform_7(%arg0: i32) -> (i32, i32) {
    %c0_i32 = arith.constant 0 : i32
    %c0_i32_0 = arith.constant 0 : i32
    %c0_i32_1 = arith.constant 0 : i32
    return %c0_i32, %c0_i32_0 : i32, i32
  }
  func.func @transform_8(%arg0: i32) -> (i32, i32) {
    %c0_i32 = arith.constant 0 : i32
    %c0_i32_0 = arith.constant 0 : i32
    %c0_i32_1 = arith.constant 0 : i32
    return %c0_i32, %c0_i32_0 : i32, i32
  }
  func.func @transform_9(%arg0: i32) -> (i32, i32) {
    %c0_i32 = arith.constant 0 : i32
    %c0_i32_0 = arith.constant 0 : i32
    %c0_i32_1 = arith.constant 0 : i32
    return %c0_i32, %c0_i32_0 : i32, i32
  }
  func.func @transform_10(%arg0: i32) -> (i32, i32) {
    %c0_i32 = arith.constant 0 : i32
    %c0_i32_0 = arith.constant 0 : i32
    %c0_i32_1 = arith.constant 0 : i32
    return %c0_i32, %c0_i32_0 : i32, i32
  }
  func.func @transform_11(%arg0: i32) -> (i32, i32) {
    %c0_i32 = arith.constant 0 : i32
    %c0_i32_0 = arith.constant 0 : i32
    return %arg0, %c0_i32 : i32, i32
  }
}

</mosaic_0001>

<bundles_post_ra>
// kernel: q_forward.1
= control target key start
LH: loop header
LB: loop body
LE: loop exit
PB: predicated region body
PF: predicated region fallthrough
CT: control target
= control target key end

     0   :  { %vm232_vm0 = vcmask 257024   ;;  %s10070_s12 = smov 32   ;;  %vm10071_vm1 = vmmov 0   ;;  %s10072_s26 = smov 64   ;;  %vm440_vm2 = vcmask 519424   ;;  %vm648_vm3 = vcmask 781824   ;;  %s12423_s0 = inlined_call_operand.vmem [shape: bf16[8,16,256], index: 0, kind: input, shape index: {}]   ;;  %s12424_s1 = inlined_call_operand.vmem [shape: bf16[256,32], index: 1, kind: input, shape index: {}]   ;;  %s12425_s2 = inlined_call_operand.vmem [shape: f32[1,32], index: 2, kind: input, shape index: {}]   ;;  %s12426_s3 = inlined_call_operand.vmem [shape: bf16[512,64], index: 3, kind: input, shape index: {}]   ;;  %s12427_s4 = inlined_call_operand.vmem [shape: f32[1,64], index: 4, kind: input, shape index: {}]   ;;  %s12428_s5 = inlined_call_operand.vmem [shape: bf16[576,64], index: 5, kind: input, shape index: {}]   ;;  %s12429_s6 = inlined_call_operand.vmem [shape: f32[1,64], index: 6, kind: input, shape index: {}]   ;;  %s12430_s7 = inlined_call_operand.vmem [shape: bf16[64,512], index: 7, kind: input, shape index: {}]   ;;  %s12431_s8 = inlined_call_operand.vmem [shape: f32[1,512], index: 8, kind: input, shape index: {}]   ;;  %s12432_s9 = inlined_call_operand.vmem [shape: bf16[512,128], index: 9, kind: input, shape index: {}]   ;;  %s12433_s10 = inlined_call_operand.vmem [shape: f32[1,128], index: 10, kind: input, shape index: {}]   ;;  %s12434_s11 = inlined_call_operand.hbm [shape: f32[2,128], index: 11, kind: output, shape index: {}]  }
   0x1   :  { %v9467_v0 = vld [vmem:[%s12424_s1 + $0x78] sm:$0xff]   ;;  %v9471_v4 = vld [vmem:[%s12424_s1 + $0x70] sm:$0xff]   ;;  %v9475_v8 = vld [vmem:[%s12424_s1 + $0x68] sm:$0xff]   ;;  %s10073_s29 = smov 96   ;;  %vm856_vm4 = vcmask 1044224  }
   0x2   :  { %v9468_v1 = vld [vmem:[%s12424_s1 + $0x78] sm:$0xff]   ;;  %8194 = vmatprep.subr.bf16.mxu0 %v9467_v0  ;;  %v9472_v5 = vld [vmem:[%s12424_s1 + $0x70] sm:$0xff]   ;;  %v9476_v9 = vld [vmem:[%s12424_s1 + $0x68] sm:$0xff]  }
   0x3   :  { %v9469_v2 = vld [vmem:[%s12424_s1 + $0x38] sm:$0xff]   ;;  %8216 = vmatprep.subr.bf16.mxu1 %v9468_v1  ;;  %v9473_v6 = vld [vmem:[%s12424_s1 + $0x30] sm:$0xff]   ;;  %v9477_v10 = vld [vmem:[%s12424_s1 + $0x28] sm:$0xff]  }
   0x4   :  { %v9470_v3 = vld [vmem:[%s12424_s1 + $0x38] sm:$0xff]   ;;  %8195 = vmatpush3.bf16.msra.mxu0 %v9469_v2  ;;  %v9474_v7 = vld [vmem:[%s12424_s1 + $0x30] sm:$0xff]   ;;  %v9478_v11 = vld [vmem:[%s12424_s1 + $0x28] sm:$0xff]  }
   0x5   :  { %8217 = vmatpush3.bf16.msra.mxu1 %v9470_v3  ;;  %8196 = vmatprep.subr.bf16.mxu0 %v9471_v4  ;;  %v9479_v12 = vld [vmem:[%s12424_s1 + $0x60] sm:$0xff]   ;;  %v9483_v16 = vld [vmem:[%s12424_s1 + $0x58] sm:$0xff]   ;;  %v9487_v20 = vld [vmem:[%s12424_s1 + $0x50] sm:$0xff]  }
   0x6   :  { %8218 = vmatprep.subr.bf16.mxu1 %v9472_v5  ;;  %v9480_v13 = vld [vmem:[%s12424_s1 + $0x60] sm:$0xff]   ;;  %v9484_v17 = vld [vmem:[%s12424_s1 + $0x58] sm:$0xff]   ;;  %v9488_v21 = vld [vmem:[%s12424_s1 + $0x50] sm:$0xff]  }
   0x7   :  { %v9481_v14 = vld [vmem:[%s12424_s1 + $0x20] sm:$0xff]   ;;  %v9485_v18 = vld [vmem:[%s12424_s1 + $0x18] sm:$0xff]   ;;  %v9489_v22 = vld [vmem:[%s12424_s1 + $0x10] sm:$0xff]  }
   0x8   :  { %8197 = vmatpush3.bf16.msra.mxu0 %v9473_v6  ;;  %v9482_v15 = vld [vmem:[%s12424_s1 + $0x20] sm:$0xff]   ;;  %v9486_v19 = vld [vmem:[%s12424_s1 + $0x18] sm:$0xff]   ;;  %v9490_v23 = vld [vmem:[%s12424_s1 + $0x10] sm:$0xff]  }
   0x9   :  { %8219 = vmatpush3.bf16.msra.mxu1 %v9474_v7  ;;  %8198 = vmatprep.subr.bf16.mxu0 %v9475_v8  ;;  %v9491_v24 = vld [vmem:[%s12424_s1 + $0x48] sm:$0xff]   ;;  %v9495_v28 = vld [vmem:[%s12424_s1 + $0x40] sm:$0xff]   ;;  %v9502_v34 = vld [vmem:[%s12423_s0 + $0x10] ss:$8 sps:$4 sm:$0xff]  }
   0xa   :  { %8220 = vmatprep.subr.bf16.mxu1 %v9476_v9  ;;  %v9492_v25 = vld [vmem:[%s12424_s1 + $0x48] sm:$0xff]   ;;  %v9496_v29 = vld [vmem:[%s12424_s1 + $0x40] sm:$0xff]   ;;  %v9504_v35 = vld [vmem:[%s12423_s0 + $0x14] ss:$8 sps:$4 sm:$0xff]  }
   0xb   :  { %v9493_v26 = vld [vmem:[%s12424_s1 + $0x8] sm:$0xff]   ;;  %v9497_v30 = vld [vmem:[%s12424_s1] sm:$0xff]   ;;  %v9505_v36 = vld [vmem:[%s12424_s1 + $0x78] sm:$0xff]   ;;  %415 = vmatprep.mubr.bf16.mxu1 %v9504_v35 }
   0xc   :  { %8199 = vmatpush3.bf16.msra.mxu0 %v9477_v10  ;;  %v9494_v27 = vld [vmem:[%s12424_s1 + $0x8] sm:$0xff]   ;;  %v9498_v31 = vld [vmem:[%s12424_s1] sm:$0xff]   ;;  %v9506_v37 = vld [vmem:[%s12424_s1 + $0x78] sm:$0xff]  }
   0xd   :  { %8221 = vmatpush3.bf16.msra.mxu1 %v9478_v11  ;;  %8200 = vmatprep.subr.bf16.mxu0 %v9479_v12  ;;  %v9499_v32 = vld [vmem:[%s12423_s0] ss:$8 sps:$4 sm:$0xff]   ;;  %v9501_v33 = vld [vmem:[%s12423_s0 + $0x4] ss:$8 sps:$4 sm:$0xff]   ;;  %v9507_v38 = vld [vmem:[%s12424_s1 + $0x38] sm:$0xff]  }
   0xe   :  { %8222 = vmatprep.subr.bf16.mxu1 %v9480_v13  ;;  %219 = vmatprep.mubr.bf16.mxu0 %v9501_v33  ;;  %v9508_v39 = vld [vmem:[%s12424_s1 + $0x38] sm:$0xff]   ;;  %v9509_v40 = vld [vmem:[%s12424_s1 + $0x70] sm:$0xff]   ;;  %v9513_v44 = vld [vmem:[%s12424_s1 + $0x68] sm:$0xff]  }
   0xf   :  { %v9510_v41 = vld [vmem:[%s12424_s1 + $0x70] sm:$0xff]   ;;  %v9514_v45 = vld [vmem:[%s12424_s1 + $0x68] sm:$0xff]   ;;  %v9517_v48 = vld [vmem:[%s12424_s1 + $0x60] sm:$0xff]  }
  0x10   :  { %8201 = vmatpush3.bf16.msra.mxu0 %v9481_v14  ;;  %v9511_v42 = vld [vmem:[%s12424_s1 + $0x30] sm:$0xff]   ;;  %v9515_v46 = vld [vmem:[%s12424_s1 + $0x28] sm:$0xff]   ;;  %v9518_v49 = vld [vmem:[%s12424_s1 + $0x60] sm:$0xff]  }
  0x11   :  { %8223 = vmatpush3.bf16.msra.mxu1 %v9482_v15  ;;  %8202 = vmatprep.subr.bf16.mxu0 %v9483_v16  ;;  %v9512_v43 = vld [vmem:[%s12424_s1 + $0x30] sm:$0xff]   ;;  %v9516_v47 = vld [vmem:[%s12424_s1 + $0x28] sm:$0xff]   ;;  %v9519_v50 = vld [vmem:[%s12424_s1 + $0x20] sm:$0xff]  }
  0x12   :  { %8224 = vmatprep.subr.bf16.mxu1 %v9484_v17  ;;  %v9520_v51 = vld [vmem:[%s12424_s1 + $0x20] sm:$0xff]   ;;  %v9521_v52 = vld [vmem:[%s12424_s1 + $0x58] sm:$0xff]   ;;  %v9525_v56 = vld [vmem:[%s12424_s1 + $0x50] sm:$0xff]  }
  0x13   :  { %v9522_v53 = vld [vmem:[%s12424_s1 + $0x58] sm:$0xff]   ;;  %v9526_v57 = vld [vmem:[%s12424_s1 + $0x50] sm:$0xff]   ;;  %v9529_v60 = vld [vmem:[%s12424_s1 + $0x48] sm:$0xff]  }
  0x14   :  { %8203 = vmatpush3.bf16.msra.mxu0 %v9485_v18  ;;  %v9523_v54 = vld [vmem:[%s12424_s1 + $0x18] sm:$0xff]   ;;  %v9527_v58 = vld [vmem:[%s12424_s1 + $0x10] sm:$0xff]   ;;  %v9530_v61 = vld [vmem:[%s12424_s1 + $0x48] sm:$0xff]  }
  0x15   :  { %8225 = vmatpush3.bf16.msra.mxu1 %v9486_v19  ;;  %8204 = vmatprep.subr.bf16.mxu0 %v9487_v20  ;;  %v9524_v55 = vld [vmem:[%s12424_s1 + $0x18] sm:$0xff]   ;;  %v9528_v59 = vld [vmem:[%s12424_s1 + $0x10] sm:$0xff]   ;;  %v9531_v62 = vld [vmem:[%s12424_s1 + $0x8] sm:$0xff]  }
  0x16   :  { %8226 = vmatprep.subr.bf16.mxu1 %v9488_v21  ;;  %v9532_v63 = vld [vmem:[%s12424_s1 + $0x8] sm:$0xff]   ;;  %v9533_v0 = vld [vmem:[%s12424_s1 + $0x40] sm:$0xff]   ;;  %v9540_v6 = vld [vmem:[%s12423_s0 + $0x30] ss:$8 sps:$4 sm:$0xff]  }
  0x17   :  { %v9534_v1 = vld [vmem:[%s12424_s1 + $0x40] sm:$0xff]   ;;  %v9542_v7 = vld [vmem:[%s12423_s0 + $0x34] ss:$8 sps:$4 sm:$0xff]   ;;  %v9551_v16 = vld [vmem:[%s12424_s1 + $0x68] sm:$0xff]  }
  0x18   :  { %8205 = vmatpush3.bf16.msra.mxu0 %v9489_v22  ;;  %v9535_v2 = vld [vmem:[%s12424_s1] sm:$0xff]   ;;  %v9543_v8 = vld [vmem:[%s12424_s1 + $0x78] sm:$0xff]   ;;  %v9547_v12 = vld [vmem:[%s12424_s1 + $0x70] sm:$0xff]  }
  0x19   :  { %8227 = vmatpush3.bf16.msra.mxu1 %v9490_v23  ;;  %8206 = vmatprep.subr.bf16.mxu0 %v9491_v24  ;;  %v9536_v3 = vld [vmem:[%s12424_s1] sm:$0xff]   ;;  %v9544_v9 = vld [vmem:[%s12424_s1 + $0x78] sm:$0xff]   ;;  %v9548_v13 = vld [vmem:[%s12424_s1 + $0x70] sm:$0xff]  }
  0x1a   :  { %8228 = vmatprep.subr.bf16.mxu1 %v9492_v25  ;;  %v9537_v4 = vld [vmem:[%s12423_s0 + $0x20] ss:$8 sps:$4 sm:$0xff]   ;;  %v9539_v5 = vld [vmem:[%s12423_s0 + $0x24] ss:$8 sps:$4 sm:$0xff]   ;;  %v9545_v10 = vld [vmem:[%s12424_s1 + $0x38] sm:$0xff]  }
  0x1b   :  { %v9546_v11 = vld [vmem:[%s12424_s1 + $0x38] sm:$0xff]   ;;  %v9549_v14 = vld [vmem:[%s12424_s1 + $0x30] sm:$0xff]   ;;  %v9552_v17 = vld [vmem:[%s12424_s1 + $0x68] sm:$0xff]  }
  0x1c   :  { %8207 = vmatpush3.bf16.msra.mxu0 %v9493_v26  ;;  %v9550_v15 = vld [vmem:[%s12424_s1 + $0x30] sm:$0xff]   ;;  %v9553_v18 = vld [vmem:[%s12424_s1 + $0x28] sm:$0xff]   ;;  %v9555_v20 = vld [vmem:[%s12424_s1 + $0x60] sm:$0xff]  }
  0x1d   :  { %8229 = vmatpush3.bf16.msra.mxu1 %v9494_v27  ;;  %8208 = vmatprep.subr.bf16.mxu0 %v9495_v28  ;;  %v9554_v19 = vld [vmem:[%s12424_s1 + $0x28] sm:$0xff]   ;;  %v9556_v21 = vld [vmem:[%s12424_s1 + $0x60] sm:$0xff]   ;;  %v9559_v24 = vld [vmem:[%s12424_s1 + $0x58] sm:$0xff]  }
  0x1e   :  { %8230 = vmatprep.subr.bf16.mxu1 %v9496_v29  ;;  %v9557_v22 = vld [vmem:[%s12424_s1 + $0x20] sm:$0xff]   ;;  %v9560_v25 = vld [vmem:[%s12424_s1 + $0x58] sm:$0xff]   ;;  %v9563_v28 = vld [vmem:[%s12424_s1 + $0x50] sm:$0xff]  }
  0x1f   :  { %v9558_v23 = vld [vmem:[%s12424_s1 + $0x20] sm:$0xff]   ;;  %v9561_v26 = vld [vmem:[%s12424_s1 + $0x18] sm:$0xff]   ;;  %v9564_v29 = vld [vmem:[%s12424_s1 + $0x50] sm:$0xff]  }
  0x20   :  { %8209 = vmatpush3.bf16.msra.mxu0 %v9497_v30  ;;  %v9562_v27 = vld [vmem:[%s12424_s1 + $0x18] sm:$0xff]   ;;  %v9565_v30 = vld [vmem:[%s12424_s1 + $0x10] sm:$0xff]   ;;  %v9568_v33 = vld [vmem:[%s12424_s1 + $0x48] sm:$0xff]  }
  0x21   :  { %8231 = vmatpush3.bf16.msra.mxu1 %v9498_v31  ;;  %8238 = vmatprep.subr.bf16.mxu0 %v9505_v36  ;;  %v9566_v31 = vld [vmem:[%s12424_s1 + $0x10] sm:$0xff]   ;;  %v9570_v35 = vld [vmem:[%s12424_s1 + $0x8] sm:$0xff]   ;;  %v9571_v36 = vld [vmem:[%s12424_s1 + $0x40] sm:$0xff]  }
  0x22   :  { %8260 = vmatprep.subr.bf16.mxu1 %v9506_v37  ;;  %v9572_v37 = vld [vmem:[%s12424_s1 + $0x40] sm:$0xff]  }
  0x23   :  { %220 = vmatmul.mubr.bf16.vlgmr.msra.gmra.mxu0 %v9499_v32  ;;  %v9567_v32 = vld [vmem:[%s12424_s1 + $0x48] sm:$0xff]  }
  0x24   :  { %416 = vmatmul.mubr.bf16.vlgmr.msra.gmra.mxu1 %v9502_v34  ;;  %8239 = vmatpush3.bf16.msra.mxu0 %v9507_v38  ;;  %v9569_v34 = vld [vmem:[%s12424_s1 + $0x8] sm:$0xff]   ;;  %v9573_v38 = vld [vmem:[%s12424_s1] sm:$0xff]  }
  0x25   :  { %8261 = vmatpush3.bf16.msra.mxu1 %v9508_v39  ;;  %8240 = vmatprep.subr.bf16.mxu0 %v9509_v40  ;;  %v9574_v39 = vld [vmem:[%s12424_s1] sm:$0xff]  }
  0x26   :  { %8262 = vmatprep.subr.bf16.mxu1 %v9510_v41  ;;  %623 = vmatprep.mubr.bf16.mxu0 %v9539_v5  ;;  %v9575_v40 = vld [vmem:[%s12423_s0 + $0x40] ss:$8 sps:$4 sm:$0xff]   ;;  %v9577_v41 = vld [vmem:[%s12423_s0 + $0x44] ss:$8 sps:$4 sm:$0xff]  }
  0x27   :  { %831 = vmatprep.mubr.bf16.mxu1 %v9542_v7  ;;  %v9606_v5 = vld [vmem:[%s12424_s1 + $0x48] sm:$0xff]  }
  0x28   :  { %8241 = vmatpush3.bf16.msra.mxu0 %v9511_v42  ;;  %v9578_v42 = vld [vmem:[%s12423_s0 + $0x50] ss:$8 sps:$4 sm:$0xff]   ;;  %v9608_v7 = vld [vmem:[%s12424_s1 + $0x8] sm:$0xff]  }
  0x29   :  { %8263 = vmatpush3.bf16.msra.mxu1 %v9512_v43  ;;  %8242 = vmatprep.subr.bf16.mxu0 %v9513_v44  ;;  %v9580_v43 = vld [vmem:[%s12423_s0 + $0x54] ss:$8 sps:$4 sm:$0xff]  }
  0x2a   :  { %8264 = vmatprep.subr.bf16.mxu1 %v9514_v45  ;;  %v9581_v44 = vld [vmem:[%s12424_s1 + $0x78] sm:$0xff]  }
  0x2b   :  { %v9582_v45 = vld [vmem:[%s12424_s1 + $0x78] sm:$0xff]  }
  0x2c   :  { %8243 = vmatpush3.bf16.msra.mxu0 %v9515_v46  ;;  %v9583_v46 = vld [vmem:[%s12424_s1 + $0x38] sm:$0xff]  }
  0x2d   :  { %8265 = vmatpush3.bf16.msra.mxu1 %v9516_v47  ;;  %8244 = vmatprep.subr.bf16.mxu0 %v9517_v48  ;;  %v9584_v47 = vld [vmem:[%s12424_s1 + $0x38] sm:$0xff]   ;;  %v9585_v48 = vld [vmem:[%s12424_s1 + $0x70] sm:$0xff]  }
  0x2e   :  { %8266 = vmatprep.subr.bf16.mxu1 %v9518_v49  ;;  %v9586_v49 = vld [vmem:[%s12424_s1 + $0x70] sm:$0xff]  }
  0x30   :  { %8245 = vmatpush3.bf16.msra.mxu0 %v9519_v50  ;;  %v9587_v50 = vld [vmem:[%s12424_s1 + $0x30] sm:$0xff]  }
  0x31   :  { %8267 = vmatpush3.bf16.msra.mxu1 %v9520_v51  ;;  %8246 = vmatprep.subr.bf16.mxu0 %v9521_v52  ;;  %v9588_v51 = vld [vmem:[%s12424_s1 + $0x30] sm:$0xff]   ;;  %v9589_v52 = vld [vmem:[%s12424_s1 + $0x68] sm:$0xff]  }
  0x32   :  { %8268 = vmatprep.subr.bf16.mxu1 %v9522_v53  ;;  %v9590_v53 = vld [vmem:[%s12424_s1 + $0x68] sm:$0xff]  }
  0x34   :  { %8247 = vmatpush3.bf16.msra.mxu0 %v9523_v54  ;;  %v9591_v54 = vld [vmem:[%s12424_s1 + $0x28] sm:$0xff]  }
  0x35   :  { %8269 = vmatpush3.bf16.msra.mxu1 %v9524_v55  ;;  %8248 = vmatprep.subr.bf16.mxu0 %v9525_v56  ;;  %v9592_v55 = vld [vmem:[%s12424_s1 + $0x28] sm:$0xff]   ;;  %v9593_v56 = vld [vmem:[%s12424_s1 + $0x60] sm:$0xff]  }
  0x36   :  { %8270 = vmatprep.subr.bf16.mxu1 %v9526_v57  ;;  %v9594_v57 = vld [vmem:[%s12424_s1 + $0x60] sm:$0xff]  }
  0x38   :  { %8249 = vmatpush3.bf16.msra.mxu0 %v9527_v58  ;;  %v9595_v58 = vld [vmem:[%s12424_s1 + $0x20] sm:$0xff]  }
  0x39   :  { %8271 = vmatpush3.bf16.msra.mxu1 %v9528_v59  ;;  %8250 = vmatprep.subr.bf16.mxu0 %v9529_v60  ;;  %v9596_v59 = vld [vmem:[%s12424_s1 + $0x20] sm:$0xff]   ;;  %v9597_v60 = vld [vmem:[%s12424_s1 + $0x58] sm:$0xff]  }
  0x3a   :  { %8272 = vmatprep.subr.bf16.mxu1 %v9530_v61  ;;  %v9598_v61 = vld [vmem:[%s12424_s1 + $0x58] sm:$0xff]  }
  0x3c   :  { %8251 = vmatpush3.bf16.msra.mxu0 %v9531_v62  ;;  %v9599_v62 = vld [vmem:[%s12424_s1 + $0x18] sm:$0xff]  }
  0x3d   :  { %8273 = vmatpush3.bf16.msra.mxu1 %v9532_v63  ;;  %8252 = vmatprep.subr.bf16.mxu0 %v9533_v0  ;;  %v9600_v63 = vld [vmem:[%s12424_s1 + $0x18] sm:$0xff]   ;;  %v9601_v0 = vld [vmem:[%s12424_s1 + $0x50] sm:$0xff]  }
  0x3e   :  { %8274 = vmatprep.subr.bf16.mxu1 %v9534_v1  ;;  %v9602_v1 = vld [vmem:[%s12424_s1 + $0x50] sm:$0xff]  }
  0x40   :  { %8253 = vmatpush3.bf16.msra.mxu0 %v9535_v2  ;;  %v9603_v2 = vld [vmem:[%s12424_s1 + $0x10] sm:$0xff]  }
  0x41   :  { %8275 = vmatpush3.bf16.msra.mxu1 %v9536_v3  ;;  %8282 = vmatprep.subr.bf16.mxu0 %v9543_v8  ;;  %v9604_v3 = vld [vmem:[%s12424_s1 + $0x10] sm:$0xff]   ;;  %v9609_v8 = vld [vmem:[%s12424_s1 + $0x40] sm:$0xff]  }
  0x42   :  { %8304 = vmatprep.subr.bf16.mxu1 %v9544_v9  ;;  %v9610_v9 = vld [vmem:[%s12424_s1 + $0x40] sm:$0xff]  }
  0x43   :  { %624 = vmatmul.mubr.bf16.vlgmr.msra.gmra.mxu0 %v9537_v4  ;;  %v9605_v4 = vld [vmem:[%s12424_s1 + $0x48] sm:$0xff]  }
  0x44   :  { %832 = vmatmul.mubr.bf16.vlgmr.msra.gmra.mxu1 %v9540_v6  ;;  %8283 = vmatpush3.bf16.msra.mxu0 %v9545_v10  ;;  %v9607_v6 = vld [vmem:[%s12424_s1 + $0x8] sm:$0xff]   ;;  %v9611_v10 = vld [vmem:[%s12424_s1] sm:$0xff]  }
  0x45   :  { %8305 = vmatpush3.bf16.msra.mxu1 %v9546_v11  ;;  %8284 = vmatprep.subr.bf16.mxu0 %v9547_v12  ;;  %v9612_v11 = vld [vmem:[%s12424_s1] sm:$0xff]  }
  0x46   :  { %8306 = vmatprep.subr.bf16.mxu1 %v9548_v13  ;;  %1039 = vmatprep.mubr.bf16.mxu0 %v9577_v41  ;;  %v9613_v12 = vld [vmem:[%s12423_s0 + $0x60] ss:$8 sps:$4 sm:$0xff]   ;;  %v9615_v13 = vld [vmem:[%s12423_s0 + $0x64] ss:$8 sps:$4 sm:$0xff]  }
  0x47   :  { %1234 = vmatprep.mubr.bf16.mxu1 %v9580_v43 }
  0x48   :  { %8285 = vmatpush3.bf16.msra.mxu0 %v9549_v14  ;;  %v9616_v14 = vld [vmem:[%s12423_s0 + $0x70] ss:$8 sps:$4 sm:$0xff]  }
  0x49   :  { %8307 = vmatpush3.bf16.msra.mxu1 %v9550_v15  ;;  %8286 = vmatprep.subr.bf16.mxu0 %v9551_v16  ;;  %v9618_v15 = vld [vmem:[%s12423_s0 + $0x74] ss:$8 sps:$4 sm:$0xff]  }
  0x4a   :  { %8308 = vmatprep.subr.bf16.mxu1 %v9552_v17  ;;  %v10573_v17 = vld [vmem:[%s12425_s2] ss:$0 sm:$0xff] }
  0x4c   :  { %8287 = vmatpush3.bf16.msra.mxu0 %v9553_v18 }
  0x4d   :  { %8309 = vmatpush3.bf16.msra.mxu1 %v9554_v19  ;;  %8288 = vmatprep.subr.bf16.mxu0 %v9555_v20 }
  0x4e   :  { %8310 = vmatprep.subr.bf16.mxu1 %v9556_v21 }
  0x50   :  { %8289 = vmatpush3.bf16.msra.mxu0 %v9557_v22  ;;  %v9619_v22 = vld [vmem:[%s12426_s3 + $0x78] sm:$0xff]  }
  0x51   :  { %8311 = vmatpush3.bf16.msra.mxu1 %v9558_v23  ;;  %8290 = vmatprep.subr.bf16.mxu0 %v9559_v24  ;;  %v9620_v23 = vld [vmem:[%s12426_s3 + $0x38] sm:$0xff]  }
  0x52   :  { %8312 = vmatprep.subr.bf16.mxu1 %v9560_v25 }
  0x54   :  { %8291 = vmatpush3.bf16.msra.mxu0 %v9561_v26  ;;  %v10069_v26 = vmov 0.0  }
  0x55   :  { %8313 = vmatpush3.bf16.msra.mxu1 %v9562_v27  ;;  %8292 = vmatprep.subr.bf16.mxu0 %v9563_v28  ;;  %v9621_v27 = vld [vmem:[%s12426_s3 + $0x70] sm:$0xff]  }
  0x56   :  { %8314 = vmatprep.subr.bf16.mxu1 %v9564_v29  ;;  %v9622_v28 = vld [vmem:[%s12426_s3 + $0x30] sm:$0xff]  }
  0x58   :  { %8293 = vmatpush3.bf16.msra.mxu0 %v9565_v30 }
  0x59   :  { %8315 = vmatpush3.bf16.msra.mxu1 %v9566_v31  ;;  %8294 = vmatprep.subr.bf16.mxu0 %v9567_v32 }
  0x5a   :  { %8316 = vmatprep.subr.bf16.mxu1 %v9568_v33 }
  0x5c   :  { %8295 = vmatpush3.bf16.msra.mxu0 %v9569_v34 }
  0x5d   :  { %8317 = vmatpush3.bf16.msra.mxu1 %v9570_v35  ;;  %8296 = vmatprep.subr.bf16.mxu0 %v9571_v36  ;;  %v9623_v36 = vld [vmem:[%s12426_s3 + $0x68] sm:$0xff]  }
  0x5e   :  { %8318 = vmatprep.subr.bf16.mxu1 %v9572_v37  ;;  %v9624_v37 = vld [vmem:[%s12426_s3 + $0x28] sm:$0xff]  }
  0x60   :  { %8297 = vmatpush3.bf16.msra.mxu0 %v9573_v38 }
  0x61   :  { %8319 = vmatpush3.bf16.msra.mxu1 %v9574_v39  ;;  %8326 = vmatprep.subr.bf16.mxu0 %v9581_v44 }
  0x62   :  { %8348 = vmatprep.subr.bf16.mxu1 %v9582_v45 }
  0x63   :  { %1040 = vmatmul.mubr.bf16.vlgmr.msra.gmra.mxu0 %v9575_v40 }
  0x64   :  { %1235 = vmatmul.mubr.bf16.vlgmr.msra.gmra.mxu1 %v9578_v42  ;;  %8327 = vmatpush3.bf16.msra.mxu0 %v9583_v46 }
  0x65   :  { %8349 = vmatpush3.bf16.msra.mxu1 %v9584_v47  ;;  %8328 = vmatprep.subr.bf16.mxu0 %v9585_v48 }
  0x66   :  { %8350 = vmatprep.subr.bf16.mxu1 %v9586_v49  ;;  %1441 = vmatprep.mubr.bf16.mxu0 %v9615_v13  ;;  %v9625_v49 = vld [vmem:[%s12426_s3 + $0x60] sm:$0xff]  }
  0x67   :  { %1648 = vmatprep.mubr.bf16.mxu1 %v9618_v15  ;;  %v9633_v13 = vld [vmem:[%s12426_s3 + $0x40] sm:$0xff]  }
  0x68   :  { %8329 = vmatpush3.bf16.msra.mxu0 %v9587_v50  ;;  %v9626_v50 = vld [vmem:[%s12426_s3 + $0x20] sm:$0xff]  }
  0x69   :  { %8351 = vmatpush3.bf16.msra.mxu1 %v9588_v51  ;;  %8330 = vmatprep.subr.bf16.mxu0 %v9589_v52 }
  0x6a   :  { %8352 = vmatprep.subr.bf16.mxu1 %v9590_v53 }
  0x6c   :  { %8331 = vmatpush3.bf16.msra.mxu0 %v9591_v54 }
  0x6d   :  { %8353 = vmatpush3.bf16.msra.mxu1 %v9592_v55  ;;  %8332 = vmatprep.subr.bf16.mxu0 %v9593_v56  ;;  %v9627_v56 = vld [vmem:[%s12426_s3 + $0x58] sm:$0xff]  }
  0x6e   :  { %8354 = vmatprep.subr.bf16.mxu1 %v9594_v57  ;;  %v9628_v57 = vld [vmem:[%s12426_s3 + $0x18] sm:$0xff]  }
  0x70   :  { %8333 = vmatpush3.bf16.msra.mxu0 %v9595_v58 }
  0x71   :  { %8355 = vmatpush3.bf16.msra.mxu1 %v9596_v59  ;;  %8334 = vmatprep.subr.bf16.mxu0 %v9597_v60 }
  0x72   :  { %8356 = vmatprep.subr.bf16.mxu1 %v9598_v61 }
  0x74   :  { %8335 = vmatpush3.bf16.msra.mxu0 %v9599_v62  ;;  %v9629_v62 = vld [vmem:[%s12426_s3 + $0x50] sm:$0xff]  }
  0x75   :  { %8357 = vmatpush3.bf16.msra.mxu1 %v9600_v63  ;;  %8336 = vmatprep.subr.bf16.mxu0 %v9601_v0  ;;  %v9630_v63 = vld [vmem:[%s12426_s3 + $0x10] sm:$0xff]  }
  0x76   :  { %8358 = vmatprep.subr.bf16.mxu1 %v9602_v1 }
  0x78   :  { %8337 = vmatpush3.bf16.msra.mxu0 %v9603_v2 }
  0x79   :  { %8359 = vmatpush3.bf16.msra.mxu1 %v9604_v3  ;;  %8338 = vmatprep.subr.bf16.mxu0 %v9605_v4  ;;  %v9631_v4 = vld [vmem:[%s12426_s3 + $0x48] sm:$0xff]  }
  0x7a   :  { %8360 = vmatprep.subr.bf16.mxu1 %v9606_v5  ;;  %v9632_v5 = vld [vmem:[%s12426_s3 + $0x8] sm:$0xff]  }
  0x7c   :  { %8339 = vmatpush3.bf16.msra.mxu0 %v9607_v6 }
  0x7d   :  { %8361 = vmatpush3.bf16.msra.mxu1 %v9608_v7  ;;  %8340 = vmatprep.subr.bf16.mxu0 %v9609_v8 }
  0x7e   :  { %8362 = vmatprep.subr.bf16.mxu1 %v9610_v9 }
  0x80   :  { %8341 = vmatpush3.bf16.msra.mxu0 %v9611_v10 }
  0x81   :  { %8363 = vmatpush3.bf16.msra.mxu1 %v9612_v11  ;;  %8738 = vmatprep.subr.bf16.mxu0 %v10069_v26 }
  0x82   :  { %8758 = vmatprep.subr.bf16.mxu1 %v10069_v26 }
  0x83   :  { %1442 = vmatmul.mubr.bf16.vlgmr.msra.gmra.mxu0 %v9613_v12 }
  0x84   :  { %1649 = vmatmul.mubr.bf16.vlgmr.msra.gmra.mxu1 %v9616_v14  ;;  %8739 = vmatpush3.bf16.msra.mxu0 %v9619_v22 }
  0x85   :  { %8759 = vmatpush3.bf16.msra.mxu1 %v9620_v23  ;;  %8740 = vmatprep.subr.bf16.mxu0 %v10069_v26 }
  0x86   :  { %8760 = vmatprep.subr.bf16.mxu1 %v10069_v26  ;;  %8754 = vmatprep.mubr.msk.bf16.mxu0 %vm10071_vm1, %v10069_v26 }
  0x87   :  { %8774 = vmatprep.mubr.msk.bf16.mxu1 %vm10071_vm1, %v10069_v26 }
  0x88   :  { %8741 = vmatpush3.bf16.msra.mxu0 %v9621_v27 }
  0x89   :  { %8761 = vmatpush3.bf16.msra.mxu1 %v9622_v28  ;;  %8742 = vmatprep.subr.bf16.mxu0 %v10069_v26 }
  0x8a   :  { %8762 = vmatprep.subr.bf16.mxu1 %v10069_v26 }
  0x8c   :  { %8743 = vmatpush3.bf16.msra.mxu0 %v9623_v36 }
  0x8d   :  { %8763 = vmatpush3.bf16.msra.mxu1 %v9624_v37  ;;  %8744 = vmatprep.subr.bf16.mxu0 %v10069_v26 }
  0x8e   :  { %8764 = vmatprep.subr.bf16.mxu1 %v10069_v26 }
  0x90   :  { %8745 = vmatpush3.bf16.msra.mxu0 %v9625_v49 }
  0x91   :  { %8765 = vmatpush3.bf16.msra.mxu1 %v9626_v50  ;;  %8746 = vmatprep.subr.bf16.mxu0 %v10069_v26 }
  0x92   :  { %8766 = vmatprep.subr.bf16.mxu1 %v10069_v26 }
  0x94   :  { %8747 = vmatpush3.bf16.msra.mxu0 %v9627_v56 }
  0x95   :  { %8767 = vmatpush3.bf16.msra.mxu1 %v9628_v57  ;;  %8748 = vmatprep.subr.bf16.mxu0 %v10069_v26 }
  0x96   :  { %8768 = vmatprep.subr.bf16.mxu1 %v10069_v26 }
  0x98   :  { %8749 = vmatpush3.bf16.msra.mxu0 %v9629_v62 }
  0x99   :  { %8769 = vmatpush3.bf16.msra.mxu1 %v9630_v63  ;;  %8750 = vmatprep.subr.bf16.mxu0 %v10069_v26 }
  0x9a   :  { %8770 = vmatprep.subr.bf16.mxu1 %v10069_v26 }
  0x9c   :  { %8751 = vmatpush3.bf16.msra.mxu0 %v9631_v4 }
  0x9d   :  { %8771 = vmatpush3.bf16.msra.mxu1 %v9632_v5  ;;  %8752 = vmatprep.subr.bf16.mxu0 %v10069_v26 }
  0x9e   :  { %8772 = vmatprep.subr.bf16.mxu1 %v10069_v26 }
  0xa0   :  { %8753 = vmatpush3.bf16.msra.mxu0 %v9633_v13 }
  0xa1   :  { %8778 = vmatprep.subr.bf16.mxu0 %v10069_v26 }
  0xe3   :  { %v8210_v16 = vpop.f32.mrf.mxu0 }
  0xe4   :  { %v8232_v18 = vpop.f32.mrf.mxu1 }
  0xe5   :  { %v8211_v19 = vpop.f32.mrf.mxu0 }
  0xe6   :  { %v8212_v20 = vadd.f32 %v8211_v19, %v8210_v16  ;;  %v8233_v21 = vpop.f32.mrf.mxu1  ;;  %v9634_v16 = vld [vmem:[%s12426_s3] sm:$0xff]  }
  0xe7   :  { %v8234_v24 = vadd.f32 %v8233_v21, %v8232_v18  ;;  %v8213_v25 = vpop.f32.mrf.mxu0  ;;  %8773 = vmatpush3.bf16.msra.mxu1 %v9634_v16 }
  0xe8   :  { %v222_v29 = vadd.f32 %v8212_v20, %v10573_v17  ;;  %v8235_v30 = vpop.f32.mrf.mxu1  ;;  %8798 = vmatprep.subr.bf16.mxu1 %v10069_v26 }
  0xe9   :  { %v8214_v31 = vpop.f32.mrf.mxu0  ;;  %v418_v32 = vadd.f32 %v8234_v24, %v10573_v17 }
  0xea   :  { %v228_v33 = vmax.f32 %v222_v29, 0.0  ;;  %v8215_v34 = vadd.f32 %v8214_v31, %v8213_v25  ;;  %v8236_v35 = vpop.f32.mrf.mxu1 }
  0xeb   :  { %v8237_v38 = vadd.f32 %v8236_v35, %v8235_v30  ;;  %v424_v39 = vmax.f32 %v418_v32, 0.0 }
  0xec   :  { %v230_v40 = vpack.c.bf16 %v228_v33, %v228_v33  ;;  %v225_v41 = vadd.f32 %v8215_v34, %v10573_v17 }
  0xed   :  { %v8182_v42 = vpack.c.bf16 %v424_v39, %v424_v39  ;;  %v421_v43 = vadd.f32 %v8237_v38, %v10573_v17 }
  0xee   :  { %v229_v44 = vmax.f32 %v225_v41, 0.0  ;;  %233 = vst.msk [vmem:[#allocation2] sm:$0xf] %vm232_vm0, %v230_v40 }
  0xef   :  { %434 = vrot.lane.b32.xlu0 %v8182_v42, %s10070_s12  ;;  %v425_v45 = vmax.f32 %v421_v43, 0.0 }
  0xf0   :  { %v231_v46 = vpack.c.bf16 %v229_v44, %v229_v44 }
  0xf1   :  { %v8183_v47 = vpack.c.bf16 %v425_v45, %v425_v45 }
  0xf2   :  { %234 = vst.msk [vmem:[#allocation2 + $0x8] sm:$0xf] %vm232_vm0, %v231_v46 }
  0xf3   :  { %436 = vrot.lane.b32.xlu1 %v8183_v47, %s10070_s12 }
 0x103   :  { %v8254_v48 = vpop.f32.mrf.mxu0 }
 0x104   :  { %v8276_v51 = vpop.f32.mrf.mxu1 }
 0x105   :  { %v8255_v52 = vpop.f32.mrf.mxu0 }
 0x106   :  { %v8256_v53 = vadd.f32 %v8255_v52, %v8254_v48  ;;  %v8277_v54 = vpop.f32.mrf.mxu1 }
 0x107   :  { %v8257_v55 = vpop.f32.mrf.mxu0  ;;  %v8278_v59 = vadd.f32 %v8277_v54, %v8276_v51 }
 0x108   :  { %v626_v58 = vadd.f32 %v8256_v53, %v10573_v17  ;;  %v8279_v60 = vpop.f32.mrf.mxu1 }
 0x109   :  { %v8258_v61 = vpop.f32.mrf.mxu0  ;;  %v834_v1 = vadd.f32 %v8278_v59, %v10573_v17 }
 0x10a   :  { %v632_v0 = vmax.f32 %v626_v58, 0.0  ;;  %v8259_v2 = vadd.f32 %v8258_v61, %v8257_v55  ;;  %v8280_v3 = vpop.f32.mrf.mxu1 }
 0x10b   :  { %v840_v7 = vmax.f32 %v834_v1, 0.0  ;;  %v8281_v9 = vadd.f32 %v8280_v3, %v8279_v60 }
 0x10c   :  { %v8184_v6 = vpack.c.bf16 %v632_v0, %v632_v0  ;;  %v629_v8 = vadd.f32 %v8259_v2, %v10573_v17 }
 0x10d   :  { %v8186_v10 = vpack.c.bf16 %v840_v7, %v840_v7  ;;  %v837_v12 = vadd.f32 %v8281_v9, %v10573_v17 }
 0x10e   :  { %v633_v11 = vmax.f32 %v629_v8, 0.0  ;;  %642 = vrot.lane.b32.xlu0 %v8184_v6, %s10072_s26 }
 0x10f   :  { %v841_v15 = vmax.f32 %v837_v12, 0.0  ;;  %850 = vrot.lane.b32.xlu1 %v8186_v10, %s10073_s29 }
 0x110   :  { %v8185_v14 = vpack.c.bf16 %v633_v11, %v633_v11 }
 0x111   :  { %v8187_v18 = vpack.c.bf16 %v841_v15, %v841_v15 }
 0x112   :  { %644 = vrot.lane.b32.xlu0 %v8185_v14, %s10072_s26 }
 0x113   :  { %852 = vrot.lane.b32.xlu1 %v8187_v18, %s10073_s29 }
 0x123   :  { %v8298_v19 = vpop.f32.mrf.mxu0 }
 0x124   :  { %v8320_v20 = vpop.f32.mrf.mxu1 }
 0x125   :  { %v8299_v21 = vpop.f32.mrf.mxu0 }
 0x126   :  { %v8300_v22 = vadd.f32 %v8299_v21, %v8298_v19  ;;  %v8321_v23 = vpop.f32.mrf.mxu1 }
 0x127   :  { %v8322_v24 = vadd.f32 %v8321_v23, %v8320_v20  ;;  %v8301_v25 = vpop.f32.mrf.mxu0 }
 0x128   :  { %v1042_v27 = vadd.f32 %v8300_v22, %v10573_v17  ;;  %v8323_v28 = vpop.f32.mrf.mxu1 }
 0x129   :  { %v1237_v29 = vadd.f32 %v8322_v24, %v10573_v17  ;;  %v8302_v30 = vpop.f32.mrf.mxu0 }
 0x12a   :  { %v1048_v31 = vmax.f32 %v1042_v27, 0.0  ;;  %v8303_v32 = vadd.f32 %v8302_v30, %v8301_v25  ;;  %v8324_v33 = vpop.f32.mrf.mxu1 }
 0x12b   :  { %v1243_v34 = vmax.f32 %v1237_v29, 0.0  ;;  %v8325_v35 = vadd.f32 %v8324_v33, %v8323_v28 }
 0x12c   :  { %v1050_v36 = vpack.c.bf16 %v1048_v31, %v1048_v31  ;;  %v1045_v37 = vadd.f32 %v8303_v32, %v10573_v17 }
 0x12d   :  { %v8188_v38 = vpack.c.bf16 %v1243_v34, %v1243_v34  ;;  %v1240_v39 = vadd.f32 %v8325_v35, %v10573_v17 }
 0x12e   :  { %v1049_v40 = vmax.f32 %v1045_v37, 0.0  ;;  %1052 = vst.msk [vmem:[#allocation2 + $0x4] sm:$0xf] %vm232_vm0, %v1050_v36 }
 0x12f   :  { %v1244_v41 = vmax.f32 %v1240_v39, 0.0  ;;  %1253 = vrot.lane.b32.xlu0 %v8188_v38, %s10070_s12 }
 0x130   :  { %v1051_v42 = vpack.c.bf16 %v1049_v40, %v1049_v40 }
 0x131   :  { %v8189_v43 = vpack.c.bf16 %v1244_v41, %v1244_v41 }
 0x132   :  { %1053 = vst.msk [vmem:[#allocation2 + $0xc] sm:$0xf] %vm232_vm0, %v1051_v42 }
 0x133   :  { %1255 = vrot.lane.b32.xlu0 %v8189_v43, %s10070_s12 }
 0x143   :  { %v8342_v44 = vpop.f32.mrf.mxu0 }
 0x144   :  { %v8364_v45 = vpop.f32.mrf.mxu1 }
 0x145   :  { %v8343_v46 = vpop.f32.mrf.mxu0 }
 0x146   :  { %v8344_v47 = vadd.f32 %v8343_v46, %v8342_v44  ;;  %v8365_v48 = vpop.f32.mrf.mxu1 }
 0x147   :  { %v8366_v49 = vadd.f32 %v8365_v48, %v8364_v45  ;;  %v8345_v50 = vpop.f32.mrf.mxu0 }
 0x148   :  { %v1444_v51 = vadd.f32 %v8344_v47, %v10573_v17  ;;  %v8367_v52 = vpop.f32.mrf.mxu1 }
 0x149   :  { %v1651_v53 = vadd.f32 %v8366_v49, %v10573_v17  ;;  %v8346_v54 = vpop.f32.mrf.mxu0 }
 0x14a   :  { %v1450_v55 = vmax.f32 %v1444_v51, 0.0  ;;  %v8347_v56 = vadd.f32 %v8346_v54, %v8345_v50  ;;  %v8368_v57 = vpop.f32.mrf.mxu1 }
 0x14b   :  { %v1657_v58 = vmax.f32 %v1651_v53, 0.0  ;;  %v8369_v59 = vadd.f32 %v8368_v57, %v8367_v52 }
 0x14c   :  { %v8190_v60 = vpack.c.bf16 %v1450_v55, %v1450_v55  ;;  %v1447_v61 = vadd.f32 %v8347_v56, %v10573_v17 }
 0x14d   :  { %v1654_v62 = vadd.f32 %v8369_v59, %v10573_v17  ;;  %v8192_v1 = vpack.c.bf16 %v1657_v58, %v1657_v58 }
 0x14e   :  { %v1451_v63 = vmax.f32 %v1447_v61, 0.0  ;;  %1460 = vrot.lane.b32.xlu1 %v8190_v60, %s10072_s26 }
 0x14f   :  { %v1658_v0 = vmax.f32 %v1654_v62, 0.0 }
 0x150   :  { %v8191_v2 = vpack.c.bf16 %v1451_v63, %v1451_v63 }
 0x151   :  { %v8193_v3 = vpack.c.bf16 %v1658_v0, %v1658_v0 }
 0x152   :  { %1667 = vrot.lane.b32.xlu1 %v8192_v1, %s10073_s29  ;;  %1462 = vrot.lane.b32.xlu0 %v8191_v2, %s10072_s26 }
 0x156   :  { %1669 = vrot.lane.b32.xlu1 %v8193_v3, %s10073_s29 }
 0x161   :  { %v435_v4 = vpop.permute.xlu0 %434 }
 0x162   :  { %441 = vst.msk [vmem:[#allocation2] sm:$0xf] %vm440_vm2, %v435_v4 }
 0x165   :  { %v437_v5 = vpop.permute.xlu1 %436 }
 0x166   :  { %442 = vst.msk [vmem:[#allocation2 + $0x8] sm:$0xf] %vm440_vm2, %v437_v5 }
 0x180   :  { %v643_v17 = vpop.permute.xlu0 %642 }
 0x181   :  { %649 = vst.msk [vmem:[#allocation2] sm:$0xf] %vm648_vm3, %v643_v17  ;;  %v851_v6 = vpop.permute.xlu1 %850 }
 0x182   :  { %857 = vst.msk [vmem:[#allocation2] sm:$0xf] %vm856_vm4, %v851_v6 }
 0x184   :  { %v645_v7 = vpop.permute.xlu0 %644 }
 0x185   :  { %650 = vst.msk [vmem:[#allocation2 + $0x8] sm:$0xf] %vm648_vm3, %v645_v7  ;;  %v853_v8 = vpop.permute.xlu1 %852 }
 0x186   :  { %16 = vsyncpa [#allocation6], 0  ;;  %858 = vst.msk [vmem:[#allocation2 + $0x8] sm:$0xf] %vm856_vm4, %v853_v8  ;;  %vm1718_vm5 = vcmask 1041409   ;;  %v9637_v15 = vld [vmem:[%s12426_s3 + $0xb8] sm:$0xff]  }
 0x187   :  { %v9638_v20 = vld [vmem:[%s12426_s3 + $0xf8] sm:$0xff]   ;;  %v9639_v22 = vld [vmem:[%s12426_s3 + $0xb0] sm:$0xff]   ;;  %v9641_v24 = vld [vmem:[%s12426_s3 + $0xa8] sm:$0xff]   ;;  %vm2244_vm6 = vcmask 523264   ;;  %vm2177_vm7 = vcmask 516096   ;;  %vm2738_vm10 = vcmask 1040896  }
 0x188   :  { %v9640_v23 = vld [vmem:[%s12426_s3 + $0xf0] sm:$0xff]   ;;  %v9642_v25 = vld [vmem:[%s12426_s3 + $0xe8] sm:$0xff]   ;;  %v9643_v27 = vld [vmem:[%s12426_s3 + $0xa0] sm:$0xff]   ;;  %vm2178_vm8 = vsmask.f32 256  ;;  %vm5338_vm15 = vcmask 517121  }
 0x189   :  { %v9635_v9 = vld [vmem:[#allocation2] ss:$0 sps:$4 sm:$0x11]   ;;  %v9645_v29 = vld [vmem:[%s12426_s3 + $0x98] sm:$0xff]   ;;  %v9647_v33 = vld [vmem:[%s12426_s3 + $0x90] sm:$0xff]   ;;  %s10077_s13 = smov [#allocation5]  }
 0x18a   :  { %v1715_v10 = vunpack.c.l.b16 %v9635_v9  ;;  %v9644_v28 = vld [vmem:[%s12426_s3 + $0xe0] sm:$0xff]   ;;  %v9646_v31 = vld [vmem:[%s12426_s3 + $0xd8] sm:$0xff]   ;;  %v9648_v36 = vld [vmem:[%s12426_s3 + $0xd0] sm:$0xff]   ;;  %vm3756_vm12 = vsmask.f32 7938  ;;  %s7544_s12 = sshll.u32 %s10077_s13, 4  ;;  %s7545_s12 = int_to_ptr.vmem [resolvable:$true] %s7544_s12 }
 0x18b   :  { %v9653_v34 = vld [vmem:[#allocation2] ss:$0 sps:$4 sm:$0x22]   ;;  %v9649_v38 = vld [vmem:[%s12426_s3 + $0x88] sm:$0xff]   ;;  %v9679_v49 = vld [vmem:[%s12426_s3 + $0x78] sm:$0xff]   ;;  %s10047_s14 = scalar_lea.vmem %s7545_s12, 32  ;;  %p10052_p1 = scmp.lt.s32.totalorder %s7545_s12, %s7545_s12 }
 0x18c   :  { %v1717_v12 = vrot.slane %v1715_v10, 1  ;;  %v1926_v39 = vunpack.c.l.b16 %v9653_v34  ;;  %v9650_v40 = vld [vmem:[%s12426_s3 + $0xc8] sm:$0xff]   ;;  %v9651_v42 = vld [vmem:[%s12426_s3 + $0x80] sm:$0xff]   ;;  %v9681_v51 = vld [vmem:[%s12426_s3 + $0x38] sm:$0xff]   ;;  %vm5339_vm0 = vsmask.f32 1280  ;;  %p10048_p0 = scmp.ne.s32.totalorder %s7545_s12, %s10047_s14  ;;  %p10053_p2 = scmp.lt.s32.totalorder %s10047_s14, %s10047_s14 }
 0x18d   :  { %v9636_v11 = vld [vmem:[#allocation2 + $0x8] ss:$0 sps:$4 sm:$0x11]   ;;  %v9652_v45 = vld [vmem:[%s12426_s3 + $0xc0] sm:$0xff]   ;;  %v9680_v53 = vld [vmem:[%s12426_s3 + $0x70] sm:$0xff]  }
 0x18e   :  { %v1716_v13 = vunpack.c.l.b16 %v9636_v11  ;;  %v9654_v32 = vld [vmem:[#allocation2 + $0x8] ss:$0 sps:$4 sm:$0x22]   ;;  %v1928_v43 = vrot.slane %v1926_v39, 2  ;;  %v2038_v47 = vrot.slane %v1926_v39, 3  ;;  %v9683_v54 = vld [vmem:[%s12426_s3 + $0x30] sm:$0xff]   ;;  %vm11010_vm9 = vmand %vm2177_vm7, %vm2178_vm8  ;;  %p10054_p3 = por %p10053_p2, %p10052_p1 }
 0x18f   :  { %v1927_v37 = vunpack.c.l.b16 %v9654_v32  ;;  %v9682_v55 = vld [vmem:[%s12426_s3 + $0x68] sm:$0xff]   ;;  %v9684_v57 = vld [vmem:[%s12426_s3 + $0x60] sm:$0xff]   ;;  %v9686_v59 = vld [vmem:[%s12426_s3 + $0x58] sm:$0xff]  }
 0x190   :  { %v1719_v14 = vsel %vm1718_vm5, %v1716_v13, %v1717_v12  ;;  %v1810_v16 = vrot.slane %v1716_v13, 7  ;;  %v9685_v56 = vld [vmem:[%s12426_s3 + $0x28] sm:$0xff]   ;;  %v9687_v58 = vld [vmem:[%s12426_s3 + $0x20] sm:$0xff]   ;;  %v9689_v60 = vld [vmem:[%s12426_s3 + $0x18] sm:$0xff]   ;;  %p10055_p4 = pnand %p10054_p3, %p10048_p0 }
 0x191   :  { %v1720_v18 = vpack.c.b16 %v1719_v14, %v1719_v14  ;;  %v1929_v41 = vrot.slane %v1927_v37, 1  ;;  %v2039_v44 = vrot.slane %v1927_v37, 2  ;;  %v9688_v62 = vld [vmem:[%s12426_s3 + $0x50] sm:$0xff]   ;;  %v9690_v2 = vld [vmem:[%s12426_s3 + $0x48] sm:$0xff]   ;;  %v9692_v5 = vld [vmem:[%s12426_s3 + $0x40] sm:$0xff]  }
 0x192   :  { %v1811_v19 = vsel %vm1718_vm5, %v1810_v16, %v1715_v10  ;;  %v9691_v63 = vld [vmem:[%s12426_s3 + $0x10] sm:$0xff]   ;;  %v9693_v3 = vld [vmem:[%s12426_s3 + $0x8] sm:$0xff]   ;;  %v9694_v9 = vld [vmem:[%s12426_s3] sm:$0xff]  }
 0x193   :  { %8755 = vmatmul.mubr.bf16.vlgmr.msra.gmra.mxu0 %v1720_v18  ;;  %v1812_v21 = vpack.c.b16 %v1811_v19, %v1811_v19  ;;  %v1930_v46 = vsel %vm1718_vm5, %v1929_v41, %v1928_v43  ;;  %v2040_v48 = vsel %vm1718_vm5, %v2039_v44, %v2038_v47  ;;  %vm11743_vm11 = vmand %vm2738_vm10, %vm2178_vm8 }
 0x194   :  { %8779 = vmatpush3.bf16.msra.mxu0 %v9637_v15  ;;  %8794 = vmatprep.mubr.msk.bf16.mxu0 %vm10071_vm1, %v10069_v26  ;;  %v1931_v50 = vpack.c.b16 %v1930_v46, %v1930_v46  ;;  %v2041_v52 = vpack.c.b16 %v2040_v48, %v2040_v48  ;;  %vm11784_vm13 = vmand %vm2177_vm7, %vm3756_vm12 }
 0x195   :  { %8775 = vmatmul.mubr.bf16.vlgmr.msra.gmra.mxu1 %v1812_v21  ;;  %8780 = vmatprep.subr.bf16.mxu0 %v10069_v26  ;;  %vm4319_vm14 = vmand %vm2738_vm10, %vm3756_vm12 }
 0x196   :  { %8799 = vmatpush3.bf16.msra.mxu1 %v9638_v20  ;;  %8814 = vmatprep.mubr.msk.bf16.mxu1 %vm10071_vm1, %v10069_v26 }
 0x197   :  { %8800 = vmatprep.subr.bf16.mxu1 %v10069_v26 }
 0x198   :  { %8781 = vmatpush3.bf16.msra.mxu0 %v9639_v22 }
 0x199   :  { %8782 = vmatprep.subr.bf16.mxu0 %v10069_v26 }
 0x19a   :  { %8801 = vmatpush3.bf16.msra.mxu1 %v9640_v23 }
 0x19b   :  { %8802 = vmatprep.subr.bf16.mxu1 %v10069_v26 }
 0x19c   :  { %8783 = vmatpush3.bf16.msra.mxu0 %v9641_v24 }
 0x19d   :  { %8784 = vmatprep.subr.bf16.mxu0 %v10069_v26 }
 0x19e   :  { %8803 = vmatpush3.bf16.msra.mxu1 %v9642_v25 }
 0x19f   :  { %8804 = vmatprep.subr.bf16.mxu1 %v10069_v26 }
 0x1a0   :  { %8785 = vmatpush3.bf16.msra.mxu0 %v9643_v27 }
 0x1a1   :  { %8786 = vmatprep.subr.bf16.mxu0 %v10069_v26  ;;  %v1254_v30 = vpop.permute.xlu0 %1253 }
 0x1a2   :  { %8805 = vmatpush3.bf16.msra.mxu1 %v9644_v28  ;;  %1259 = vst.msk [vmem:[#allocation2 + $0x4] sm:$0xf] %vm440_vm2, %v1254_v30 }
 0x1a3   :  { %8806 = vmatprep.subr.bf16.mxu1 %v10069_v26 }
 0x1a4   :  { %8787 = vmatpush3.bf16.msra.mxu0 %v9645_v29 }
 0x1a5   :  { %8788 = vmatprep.subr.bf16.mxu0 %v10069_v26  ;;  %v1256_v35 = vpop.permute.xlu0 %1255 }
 0x1a6   :  { %8807 = vmatpush3.bf16.msra.mxu1 %v9646_v31  ;;  %1260 = vst.msk [vmem:[#allocation2 + $0xc] sm:$0xf] %vm440_vm2, %v1256_v35  ;;  %vm5902_vm2 = vcmask 1041921  }
 0x1a7   :  { %8808 = vmatprep.subr.bf16.mxu1 %v10069_v26 }
 0x1a8   :  { %8789 = vmatpush3.bf16.msra.mxu0 %v9647_v33 }
 0x1a9   :  { %8790 = vmatprep.subr.bf16.mxu0 %v10069_v26 }
 0x1aa   :  { %8809 = vmatpush3.bf16.msra.mxu1 %v9648_v36 }
 0x1ab   :  { %8810 = vmatprep.subr.bf16.mxu1 %v10069_v26 }
 0x1ac   :  { %8791 = vmatpush3.bf16.msra.mxu0 %v9649_v38 }
 0x1ad   :  { %8792 = vmatprep.subr.bf16.mxu0 %v10069_v26 }
 0x1ae   :  { %8811 = vmatpush3.bf16.msra.mxu1 %v9650_v40 }
 0x1af   :  { %8812 = vmatprep.subr.bf16.mxu1 %v10069_v26 }
 0x1b0   :  { %8793 = vmatpush3.bf16.msra.mxu0 %v9651_v42 }
 0x1b1   :  { %8818 = vmatprep.subr.bf16.mxu0 %v10069_v26 }
 0x1b2   :  { %8813 = vmatpush3.bf16.msra.mxu1 %v9652_v45 }
 0x1b3   :  { %8795 = vmatmul.mubr.bf16.vlgmr.msra.gmra.mxu0 %v1931_v50  ;;  %8838 = vmatprep.subr.bf16.mxu1 %v10069_v26 }
 0x1b4   :  { %8819 = vmatpush3.bf16.msra.mxu0 %v9679_v49  ;;  %8834 = vmatprep.mubr.msk.bf16.mxu0 %vm10071_vm1, %v10069_v26 }
 0x1b5   :  { %8815 = vmatmul.mubr.bf16.vlgmr.msra.gmra.mxu1 %v2041_v52  ;;  %8820 = vmatprep.subr.bf16.mxu0 %v10069_v26 }
 0x1b6   :  { %8839 = vmatpush3.bf16.msra.mxu1 %v9681_v51  ;;  %8854 = vmatprep.mubr.msk.bf16.mxu1 %vm10071_vm1, %v10069_v26 }
 0x1b7   :  { %8840 = vmatprep.subr.bf16.mxu1 %v10069_v26 }
 0x1b8   :  { %8821 = vmatpush3.bf16.msra.mxu0 %v9680_v53 }
 0x1b9   :  { %8822 = vmatprep.subr.bf16.mxu0 %v10069_v26 }
 0x1ba   :  { %8841 = vmatpush3.bf16.msra.mxu1 %v9683_v54 }
 0x1bb   :  { %8842 = vmatprep.subr.bf16.mxu1 %v10069_v26 }
 0x1bc   :  { %8823 = vmatpush3.bf16.msra.mxu0 %v9682_v55 }
 0x1bd   :  { %8824 = vmatprep.subr.bf16.mxu0 %v10069_v26 }
 0x1be   :  { %8843 = vmatpush3.bf16.msra.mxu1 %v9685_v56 }
 0x1bf   :  { %8844 = vmatprep.subr.bf16.mxu1 %v10069_v26 }
 0x1c0   :  { %8825 = vmatpush3.bf16.msra.mxu0 %v9684_v57  ;;  %v1461_v61 = vpop.permute.xlu1 %1460 }
 0x1c1   :  { %8826 = vmatprep.subr.bf16.mxu0 %v10069_v26  ;;  %1466 = vst.msk [vmem:[#allocation2 + $0x4] sm:$0xf] %vm648_vm3, %v1461_v61 }
 0x1c2   :  { %8845 = vmatpush3.bf16.msra.mxu1 %v9687_v58 }
 0x1c3   :  { %8846 = vmatprep.subr.bf16.mxu1 %v10069_v26 }
 0x1c4   :  { %8827 = vmatpush3.bf16.msra.mxu0 %v9686_v59  ;;  %v1668_v0 = vpop.permute.xlu1 %1667  ;;  %v1463_v1 = vpop.permute.xlu0 %1462 }
 0x1c5   :  { %8828 = vmatprep.subr.bf16.mxu0 %v10069_v26  ;;  %1673 = vst.msk [vmem:[#allocation2 + $0x4] sm:$0xf] %vm856_vm4, %v1668_v0 }
 0x1c6   :  { %8847 = vmatpush3.bf16.msra.mxu1 %v9689_v60  ;;  %1467 = vst.msk [vmem:[#allocation2 + $0xc] sm:$0xf] %vm648_vm3, %v1463_v1  ;;  %vm5903_vm3 = vmand %vm5902_vm2, %vm5339_vm0 }
 0x1c7   :  { %8848 = vmatprep.subr.bf16.mxu1 %v10069_v26 }
 0x1c8   :  { %8829 = vmatpush3.bf16.msra.mxu0 %v9688_v62  ;;  %v1670_v4 = vpop.permute.xlu1 %1669 }
 0x1c9   :  { %8830 = vmatprep.subr.bf16.mxu0 %v10069_v26  ;;  %1674 = vst.msk [vmem:[#allocation2 + $0xc] sm:$0xf] %vm856_vm4, %v1670_v4 }
 0x1ca   :  { %8849 = vmatpush3.bf16.msra.mxu1 %v9691_v63 }
 0x1cb   :  { %8850 = vmatprep.subr.bf16.mxu1 %v10069_v26 }
 0x1cc   :  { %8831 = vmatpush3.bf16.msra.mxu0 %v9690_v2  ;;  %v2186_v17 = vld [vmem:[#allocation2] sm:$0x11]  ;;  %v2435_v8 = vld [vmem:[#allocation2] sm:$0x22]  ;;  %v4016_v0 = vld [vmem:[#allocation2] sm:$0x44] }
 0x1cd   :  { %8832 = vmatprep.subr.bf16.mxu0 %v10069_v26  ;;  %v7769_v6 = vcombine.high %v2186_v17, %v2186_v17  ;;  %v7768_v7 = vcombine.low %v2186_v17, %v2186_v17  ;;  %v7789_v14 = vcombine.high %v2435_v8, %v2435_v8  ;;  %v7788_v15 = vcombine.low %v2435_v8, %v2435_v8  ;;  %v3764_v37 = vld [vmem:[#allocation2] sm:$0x22] }
 0x1ce   :  { %8851 = vmatpush3.bf16.msra.mxu1 %v9693_v3  ;;  %v7887_v45 = vcombine.high %v3764_v37, %v3764_v37  ;;  %v7886_v46 = vcombine.low %v3764_v37, %v3764_v37  ;;  %v7906_v8 = vcombine.low %v4016_v0, %v4016_v0 }
 0x1cf   :  { %8852 = vmatprep.subr.bf16.mxu1 %v10069_v26  ;;  %v2231_v10 = vunpack.c.l.b16 %v7769_v6  ;;  %v2230_v11 = vunpack.c.l.b16 %v7768_v7  ;;  %v2464_v27 = vunpack.c.l.b16 %v7789_v14  ;;  %v2463_v29 = vunpack.c.l.b16 %v7788_v15 }
 0x1d0   :  { %8833 = vmatpush3.bf16.msra.mxu0 %v9692_v5  ;;  %v2187_v12 = vld [vmem:[#allocation2 + $0x8] sm:$0x11]  ;;  %v2436_v13 = vld [vmem:[#allocation2 + $0x8] sm:$0x22]  ;;  %v4017_v55 = vld [vmem:[#allocation2 + $0x8] sm:$0x44]  ;;  %v3809_v58 = vunpack.c.l.b16 %v7887_v45  ;;  %v3808_v59 = vunpack.c.l.b16 %v7886_v46  ;;  %v7907_v7 = vcombine.high %v4016_v0, %v4016_v0 }
 0x1d1   :  { %8858 = vmatprep.subr.bf16.mxu0 %v10069_v26  ;;  %v7771_v16 = vcombine.high %v2187_v12, %v2187_v12  ;;  %v7770_v18 = vcombine.low %v2187_v12, %v2187_v12  ;;  %v7791_v19 = vcombine.high %v2436_v13, %v2436_v13  ;;  %v7790_v20 = vcombine.low %v2436_v13, %v2436_v13  ;;  %v3765_v25 = vld [vmem:[#allocation2 + $0x8] sm:$0x22]  ;;  %v5600_v45 = vld [vmem:[#allocation2 + $0x8] sm:$0x88] }
 0x1d2   :  { %8853 = vmatpush3.bf16.msra.mxu1 %v9694_v9  ;;  %v2236_v22 = vrot.slane %v2231_v10, 1  ;;  %v2234_v24 = vrot.slane %v2230_v11, 1  ;;  %v7889_v38 = vcombine.high %v3765_v25, %v3765_v25  ;;  %v2470_v43 = vrot.slane %v2464_v27, 2 }
 0x1d3   :  { %8878 = vmatprep.subr.bf16.mxu1 %v10069_v26  ;;  %v2233_v21 = vunpack.c.l.b16 %v7771_v16  ;;  %v2232_v23 = vunpack.c.l.b16 %v7770_v18  ;;  %v2466_v28 = vunpack.c.l.b16 %v7791_v19  ;;  %v2465_v30 = vunpack.c.l.b16 %v7790_v20  ;;  %v5348_v19 = vld [vmem:[#allocation2 + $0x8] sm:$0x44] }
 0x1d4   :  { %v2467_v44 = vrot.slane %v2463_v29, 2  ;;  %v3811_v53 = vunpack.c.l.b16 %v7889_v38  ;;  %v7888_v54 = vcombine.low %v3765_v25, %v3765_v25  ;;  %v2589_v56 = vrot.slane %v2464_v27, 3 }
 0x1d5   :  { %v2237_v31 = vsel %vm1718_vm5, %v2233_v21, %v2236_v22  ;;  %v2235_v32 = vsel %vm1718_vm5, %v2232_v23, %v2234_v24  ;;  %v2337_v33 = vrot.slane %v2233_v21, 7  ;;  %v2335_v34 = vrot.slane %v2232_v23, 7 }
 0x1d6   :  { %v2239_v35 = vpack.c.b16 %v2237_v31, %v2237_v31  ;;  %v2238_v36 = vpack.c.b16 %v2235_v32, %v2235_v32  ;;  %v2471_v41 = vrot.slane %v2466_v28, 1  ;;  %v2468_v42 = vrot.slane %v2465_v30, 1 }
 0x1d7   :  { %v2338_v39 = vsel %vm1718_vm5, %v2337_v33, %v2231_v10  ;;  %v2336_v40 = vsel %vm1718_vm5, %v2335_v34, %v2230_v11  ;;  %v2590_v49 = vrot.slane %v2466_v28, 2  ;;  %v2587_v50 = vrot.slane %v2465_v30, 2  ;;  %v5347_v28 = vld [vmem:[#allocation2] sm:$0x44] }
 0x1d8   :  { %2242 = vrot.lane.b32.xlu1 %v2239_v35, %s10072_s26  ;;  %2240 = vrot.lane.b32.xlu0 %v2238_v36, %s10072_s26  ;;  %v2340_v47 = vpack.c.b16 %v2338_v39, %v2338_v39  ;;  %v2339_v48 = vpack.c.b16 %v2336_v40, %v2336_v40  ;;  %v2472_v51 = vsel %vm1718_vm5, %v2471_v41, %v2470_v43  ;;  %v2586_v57 = vrot.slane %v2463_v29, 3 }
 0x1d9   :  { %v2469_v52 = vsel %vm1718_vm5, %v2468_v42, %v2467_v44  ;;  %v3810_v60 = vunpack.c.l.b16 %v7888_v54  ;;  %v2474_v61 = vpack.c.b16 %v2472_v51, %v2472_v51  ;;  %v2591_v63 = vsel %vm1718_vm5, %v2590_v49, %v2589_v56 }
 0x1da   :  { %v2473_v62 = vpack.c.b16 %v2469_v52, %v2469_v52  ;;  %v7909_v1 = vcombine.high %v4017_v55, %v4017_v55  ;;  %v2588_v2 = vsel %vm1718_vm5, %v2587_v50, %v2586_v57  ;;  %v3816_v3 = vrot.slane %v3811_v53, 2 }
 0x1db   :  { %v3813_v4 = vrot.slane %v3810_v60, 2  ;;  %v7908_v5 = vcombine.low %v4017_v55, %v4017_v55  ;;  %v3815_v17 = vrot.slane %v3809_v58, 3  ;;  %v3812_v6 = vrot.slane %v3808_v59, 3 }
 0x1dc   :  { %2343 = vrot.lane.b32.xlu1 %v2340_v47, %s10072_s26  ;;  %2341 = vrot.lane.b32.xlu0 %v2339_v48, %s10072_s26  ;;  %v2593_v9 = vpack.c.b16 %v2591_v63, %v2591_v63  ;;  %v2592_v10 = vpack.c.b16 %v2588_v2, %v2588_v2  ;;  %v3918_v11 = vrot.slane %v3811_v53, 1  ;;  %v4047_v12 = vunpack.c.l.b16 %v7909_v1  ;;  %v5599_v53 = vld [vmem:[#allocation2] sm:$0x88] }
 0x1dd   :  { %v3817_v13 = vsel %vm1718_vm5, %v3816_v3, %v3815_v17  ;;  %v3814_v14 = vsel %vm1718_vm5, %v3813_v4, %v3812_v6  ;;  %v3915_v15 = vrot.slane %v3810_v60, 1  ;;  %v4046_v16 = vunpack.c.l.b16 %v7908_v5 }
 0x1de   :  { %v3917_v18 = vrot.slane %v3809_v58, 2  ;;  %v3914_v20 = vrot.slane %v3808_v59, 2  ;;  %v4045_v21 = vunpack.c.l.b16 %v7907_v7  ;;  %v4044_v22 = vunpack.c.l.b16 %v7906_v8 }
 0x1df   :  { %v3819_v23 = vpack.c.b16 %v3817_v13, %v3817_v13  ;;  %v3818_v24 = vpack.c.b16 %v3814_v14, %v3814_v14  ;;  %v4052_v27 = vrot.slane %v4047_v12, 3  ;;  %v4049_v30 = vrot.slane %v4046_v16, 3 }
 0x1e0   :  { %2477 = vrot.lane.b32.xlu1 %v2474_v61, %s10072_s26  ;;  %2475 = vrot.lane.b32.xlu0 %v2473_v62, %s10072_s26  ;;  %v3919_v25 = vsel %vm1718_vm5, %v3918_v11, %v3917_v18  ;;  %v3916_v29 = vsel %vm1718_vm5, %v3915_v15, %v3914_v20  ;;  %v8007_v31 = vcombine.high %v5348_v19, %v5348_v19  ;;  %v4051_v33 = vrot.slane %v4045_v21, 4 }
 0x1e1   :  { %v8006_v32 = vcombine.low %v5348_v19, %v5348_v19  ;;  %v4048_v34 = vrot.slane %v4044_v22, 4  ;;  %v8005_v35 = vcombine.high %v5347_v28, %v5347_v28  ;;  %v8004_v36 = vcombine.low %v5347_v28, %v5347_v28 }
 0x1e2   :  { %v3921_v37 = vpack.c.b16 %v3919_v25, %v3919_v25  ;;  %v3920_v38 = vpack.c.b16 %v3916_v29, %v3916_v29  ;;  %v4171_v39 = vrot.slane %v4047_v12, 4  ;;  %v4168_v40 = vrot.slane %v4046_v16, 4 }
 0x1e3   :  { %v4053_v41 = vsel %vm1718_vm5, %v4052_v27, %v4051_v33  ;;  %v4050_v42 = vsel %vm1718_vm5, %v4049_v30, %v4048_v34  ;;  %v5394_v43 = vunpack.c.l.b16 %v8007_v31  ;;  %v5393_v44 = vunpack.c.l.b16 %v8006_v32  ;;  %v9695_v34 = vld [vmem:[%s12426_s3 + $0xb8] sm:$0xff]  }
 0x1e4   :  { %2596 = vrot.lane.b32.xlu1 %v2593_v9, %s10072_s26  ;;  %2594 = vrot.lane.b32.xlu0 %v2592_v10, %s10072_s26  ;;  %v4170_v46 = vrot.slane %v4045_v21, 5  ;;  %v4167_v47 = vrot.slane %v4044_v22, 5  ;;  %v5392_v48 = vunpack.c.l.b16 %v8005_v35  ;;  %v5391_v49 = vunpack.c.l.b16 %v8004_v36 }
 0x1e5   :  { %v4055_v50 = vpack.c.b16 %v4053_v41, %v4053_v41  ;;  %v4054_v51 = vpack.c.b16 %v4050_v42, %v4050_v42  ;;  %v8027_v54 = vcombine.high %v5600_v45, %v5600_v45  ;;  %v5399_v56 = vrot.slane %v5394_v43, 4 }
 0x1e6   :  { %v4172_v52 = vsel %vm1718_vm5, %v4171_v39, %v4170_v46  ;;  %v4169_v55 = vsel %vm1718_vm5, %v4168_v40, %v4167_v47  ;;  %v5396_v57 = vrot.slane %v5393_v44, 4  ;;  %v8026_v58 = vcombine.low %v5600_v45, %v5600_v45  ;;  %v9697_v39 = vld [vmem:[%s12426_s3 + $0xf8] sm:$0xff]   ;;  %v9699_v45 = vld [vmem:[%s12426_s3 + $0xf0] sm:$0xff]  }
 0x1e7   :  { %v5398_v59 = vrot.slane %v5392_v48, 5  ;;  %v5395_v60 = vrot.slane %v5391_v49, 5  ;;  %v8025_v61 = vcombine.high %v5599_v53, %v5599_v53  ;;  %v8024_v62 = vcombine.low %v5599_v53, %v5599_v53 }
 0x1e8   :  { %3822 = vrot.lane.b32.xlu1 %v3819_v23, %s10072_s26  ;;  %3820 = vrot.lane.b32.xlu0 %v3818_v24, %s10072_s26  ;;  %v4174_v63 = vpack.c.b16 %v4172_v52, %v4172_v52  ;;  %v4173_v0 = vpack.c.b16 %v4169_v55, %v4169_v55  ;;  %v5501_v1 = vrot.slane %v5394_v43, 3  ;;  %v5630_v2 = vunpack.c.l.b16 %v8027_v54  ;;  %v9702_v55 = vld [vmem:[%s12426_s3 + $0x98] sm:$0xff]  }
 0x1e9   :  { %v5400_v3 = vsel %vm1718_vm5, %v5399_v56, %v5398_v59  ;;  %v5397_v4 = vsel %vm1718_vm5, %v5396_v57, %v5395_v60  ;;  %v5498_v5 = vrot.slane %v5393_v44, 3  ;;  %v5629_v17 = vunpack.c.l.b16 %v8026_v58  ;;  %v9698_v44 = vld [vmem:[%s12426_s3 + $0xa8] sm:$0xff]   ;;  %v9703_v56 = vld [vmem:[%s12426_s3 + $0xe0] sm:$0xff]   ;;  %v9704_v57 = vld [vmem:[%s12426_s3 + $0x90] sm:$0xff]  }
 0x1ea   :  { %v5500_v6 = vrot.slane %v5392_v48, 4  ;;  %v5497_v7 = vrot.slane %v5391_v49, 4  ;;  %v5628_v8 = vunpack.c.l.b16 %v8025_v61  ;;  %v5627_v9 = vunpack.c.l.b16 %v8024_v62  ;;  %v9705_v58 = vld [vmem:[%s12426_s3 + $0xd8] sm:$0xff]   ;;  %v9706_v59 = vld [vmem:[%s12426_s3 + $0x88] sm:$0xff]   ;;  %v9707_v60 = vld [vmem:[%s12426_s3 + $0xd0] sm:$0xff]  }
 0x1eb   :  { %v5402_v10 = vpack.c.b16 %v5400_v3, %v5400_v3  ;;  %v5401_v11 = vpack.c.b16 %v5397_v4, %v5397_v4  ;;  %v5635_v14 = vrot.slane %v5630_v2, 5  ;;  %v5632_v15 = vrot.slane %v5629_v17, 5  ;;  %v9708_v61 = vld [vmem:[%s12426_s3 + $0x80] sm:$0xff]   ;;  %v9709_v62 = vld [vmem:[%s12426_s3 + $0xc8] sm:$0xff]  }
 0x1ec   :  { %3924 = vrot.lane.b32.xlu1 %v3921_v37, %s10072_s26  ;;  %3922 = vrot.lane.b32.xlu0 %v3920_v38, %s10072_s26  ;;  %v5502_v12 = vsel %vm1718_vm5, %v5501_v1, %v5500_v6  ;;  %v5499_v13 = vsel %vm1718_vm5, %v5498_v5, %v5497_v7  ;;  %v5634_v16 = vrot.slane %v5628_v8, 6  ;;  %v5631_v18 = vrot.slane %v5627_v9, 6  ;;  %v9696_v38 = vld [vmem:[%s12426_s3 + $0xb0] sm:$0xff]   ;;  %v9710_v1 = vld [vmem:[%s12426_s3 + $0xc0] sm:$0xff]  }
 0x1ed   :  { %v5504_v19 = vpack.c.b16 %v5502_v12, %v5502_v12  ;;  %v5503_v20 = vpack.c.b16 %v5499_v13, %v5499_v13  ;;  %v5754_v23 = vrot.slane %v5630_v2, 6  ;;  %v5751_v24 = vrot.slane %v5629_v17, 6  ;;  %v9711_v2 = vld [vmem:[%s12426_s3 + $0x78] sm:$0xff]   ;;  %v9712_v17 = vld [vmem:[%s12426_s3 + $0x70] sm:$0xff]  }
 0x1ee   :  { %v5636_v21 = vsel %vm1718_vm5, %v5635_v14, %v5634_v16  ;;  %v5633_v22 = vsel %vm1718_vm5, %v5632_v15, %v5631_v18  ;;  %v5753_v25 = vrot.slane %v5628_v8, 7  ;;  %v5750_v27 = vrot.slane %v5627_v9, 7  ;;  %v9713_v6 = vld [vmem:[%s12426_s3 + $0x38] sm:$0xff]   ;;  %v9714_v14 = vld [vmem:[%s12426_s3 + $0x68] sm:$0xff]   ;;  %v9715_v15 = vld [vmem:[%s12426_s3 + $0x30] sm:$0xff]  }
 0x1ef   :  { %v5638_v28 = vpack.c.b16 %v5636_v21, %v5636_v21  ;;  %v5637_v29 = vpack.c.b16 %v5633_v22, %v5633_v22  ;;  %v10074_v8 = vmov 1966171168  }
 0x1f0   :  { %4058 = vrot.lane.b32.xlu1 %v4055_v50, %s10072_s26  ;;  %4056 = vrot.lane.b32.xlu0 %v4054_v51, %s10072_s26  ;;  %v5755_v30 = vsel %vm1718_vm5, %v5754_v23, %v5753_v25  ;;  %v5752_v31 = vsel %vm1718_vm5, %v5751_v24, %v5750_v27  ;;  %v9700_v50 = vld [vmem:[%s12426_s3 + $0xa0] sm:$0xff]   ;;  %v9701_v51 = vld [vmem:[%s12426_s3 + $0xe8] sm:$0xff]   ;;  %v2144_v9 = vunpack.c.l.s4 %v10074_v8  ;;  %v10075_v27 = vmov 857870592  }
 0x1f1   :  { %v5757_v32 = vpack.c.b16 %v5755_v30, %v5755_v30  ;;  %v5756_v33 = vpack.c.b16 %v5752_v31, %v5752_v31  ;;  %v9717_v30 = vld [vmem:[%s12426_s3 + $0x28] sm:$0xff]  }
 0x1f2   :  { %v2145_v21 = vunpack.c.0.s8 %v2144_v9  ;;  %v9732_v8 = vld [vmem:[%s12426_s3 + $0xa8] sm:$0xff]   ;;  %v9733_v9 = vld [vmem:[%s12426_s3 + $0xf0] sm:$0xff]  }
 0x1f4   :  { %4177 = vrot.lane.b32.xlu1 %v4174_v63, %s10072_s26  ;;  %4175 = vrot.lane.b32.xlu0 %v4173_v0, %s10072_s26 }
 0x1f8   :  { %5405 = vrot.lane.b32.xlu1 %v5402_v10, %s10072_s26  ;;  %5403 = vrot.lane.b32.xlu0 %v5401_v11, %s10072_s26  ;;  %v2146_v10 = vlaneseq }
 0x1fa   :  { %v10972_v22 = vshrl.u32 %v2146_v10, 7  ;;  %v9734_v10 = vld [vmem:[%s12426_s3 + $0xa0] sm:$0xff]  }
 0x1fc   :  { %5507 = vrot.lane.b32.xlu1 %v5504_v19, %s10072_s26  ;;  %5505 = vrot.lane.b32.xlu0 %v5503_v20, %s10072_s26  ;;  %v7766_v19 = vld [vmem:[%s12427_s4] ss:$0 sm:$0xff] }
 0x200   :  { %5641 = vrot.lane.b32.xlu1 %v5638_v28, %s10072_s26  ;;  %5639 = vrot.lane.b32.xlu0 %v5637_v29, %s10072_s26  ;;  %v2162_v28 = vunpack.c.l.s4 %v10075_v27  ;;  %v9716_v29 = vld [vmem:[%s12426_s3 + $0x60] sm:$0xff]   ;;  %v9743_v27 = vld [vmem:[%s12426_s3 + $0xc8] sm:$0xff]  }
 0x204   :  { %5760 = vrot.lane.b32.xlu1 %v5757_v32, %s10072_s26  ;;  %5758 = vrot.lane.b32.xlu0 %v5756_v33, %s10072_s26 }
 0x24a   :  { %v2243_v35 = vpop.permute.xlu1 %2242  ;;  %v2241_v36 = vpop.permute.xlu0 %2240 }
 0x24b   :  { %v2245_v37 = vsel %vm2244_vm6, %v2241_v36, %v2243_v35 }
 0x24c   :  { %8835 = vmatmul.mubr.bf16.vlgmr.msra.gmra.mxu0 %v2245_v37  ;;  %v2163_v37 = vunpack.c.0.s8 %v2162_v28 }
 0x24d   :  { %8859 = vmatpush3.bf16.msra.mxu0 %v9695_v34  ;;  %8874 = vmatprep.mubr.msk.bf16.mxu0 %vm10071_vm1, %v10069_v26  ;;  %v10983_v34 = vsub.s32 %v2145_v21, %v10972_v22  ;;  %v9741_v21 = vld [vmem:[%s12426_s3 + $0xd0] sm:$0xff]  }
 0x24e   :  { %v2344_v40 = vpop.permute.xlu1 %2343  ;;  %v2342_v41 = vpop.permute.xlu0 %2341  ;;  %8860 = vmatprep.subr.bf16.mxu0 %v10069_v26 }
 0x24f   :  { %v2345_v42 = vsel %vm2244_vm6, %v2342_v41, %v2344_v40 }
 0x250   :  { %8855 = vmatmul.mubr.bf16.vlgmr.msra.gmra.mxu1 %v2345_v42  ;;  %v10998_v42 = vsub.s32 %v2163_v37, %v10972_v22  ;;  %v9748_v37 = vld [vmem:[%s12426_s3 + $0x70] sm:$0xff]  }
 0x251   :  { %8861 = vmatpush3.bf16.msra.mxu0 %v9696_v38  ;;  %8879 = vmatpush3.bf16.msra.mxu1 %v9697_v39  ;;  %v9718_v38 = vld [vmem:[%s12426_s3 + $0x58] sm:$0xff]   ;;  %v9719_v39 = vld [vmem:[%s12426_s3 + $0x20] sm:$0xff]  }
 0x252   :  { %8862 = vmatprep.subr.bf16.mxu0 %v10069_v26  ;;  %8880 = vmatprep.subr.bf16.mxu1 %v10069_v26  ;;  %v2478_v63 = vpop.permute.xlu1 %2477  ;;  %v2476_v0 = vpop.permute.xlu0 %2475 }
 0x253   :  { %v1804_v43 = vpop.f32.mrf.mxu0  ;;  %8894 = vmatprep.mubr.msk.bf16.mxu1 %vm10071_vm1, %v10069_v26  ;;  %v2479_v3 = vsel %vm2244_vm6, %v2476_v0, %v2478_v63 }
 0x255   :  { %v8756_v46 = vpop.f32.mrf.mxu0  ;;  %v1896_v47 = vpop.f32.mrf.mxu1  ;;  %8863 = vmatpush3.bf16.msra.mxu0 %v9698_v44  ;;  %8881 = vmatpush3.bf16.msra.mxu1 %v9699_v45  ;;  %v9721_v44 = vld [vmem:[%s12426_s3 + $0x18] sm:$0xff]   ;;  %v9726_v45 = vld [vmem:[#allocation2 + $0x4] ss:$0 sps:$4 sm:$0x11]  }
 0x256   :  { %8864 = vmatprep.subr.bf16.mxu0 %v10069_v26  ;;  %8882 = vmatprep.subr.bf16.mxu1 %v10069_v26  ;;  %v2597_v4 = vpop.permute.xlu1 %2596  ;;  %v2595_v5 = vpop.permute.xlu0 %2594  ;;  %v1897_v7 = vadd.f32 %v1896_v47, %v1804_v43  ;;  %v9720_v43 = vld [vmem:[%s12426_s3 + $0x50] sm:$0xff]  }
 0x257   :  { %v1807_v48 = vpop.f32.mrf.mxu0  ;;  %v8776_v49 = vpop.f32.mrf.mxu1  ;;  %v2598_v11 = vsel %vm2244_vm6, %v2595_v5, %v2597_v4 }
 0x258   :  { %v9727_v48 = vld [vmem:[#allocation2 + $0xc] ss:$0 sps:$4 sm:$0x11]  }
 0x259   :  { %v8757_v52 = vpop.f32.mrf.mxu0  ;;  %v1899_v53 = vpop.f32.mrf.mxu1  ;;  %8865 = vmatpush3.bf16.msra.mxu0 %v9700_v50  ;;  %8883 = vmatpush3.bf16.msra.mxu1 %v9701_v51  ;;  %v2180_v50 = vld [vmem:[#allocation3] sm:$0x1]  ;;  %v10008_v49 = vld [vmem:[%s12430_s7 + $0x4c] ss:$16 sps:$4 sm:$0xff]  }
 0x25a   :  { %8866 = vmatprep.subr.bf16.mxu0 %v10069_v26  ;;  %8884 = vmatprep.subr.bf16.mxu1 %v10069_v26  ;;  %v9722_v53 = vld [vmem:[%s12426_s3 + $0x48] sm:$0xff]  }
 0x25b   :  { %v8777_v54 = vpop.f32.mrf.mxu1 }
 0x25c   :  { %v9723_v54 = vld [vmem:[%s12426_s3 + $0x10] sm:$0xff]  }
 0x25d   :  { %8867 = vmatpush3.bf16.msra.mxu0 %v9702_v55  ;;  %8885 = vmatpush3.bf16.msra.mxu1 %v9703_v56  ;;  %v2786_v55 = vunpack.c.l.b16 %v9726_v45  ;;  %v2183_v56 = vld [vmem:[#allocation3 + $0x4] sm:$0x1]  ;;  %v9754_v45 = vld [vmem:[%s12426_s3 + $0x58] sm:$0xff]  }
 0x25e   :  { %8868 = vmatprep.subr.bf16.mxu0 %v10069_v26  ;;  %8886 = vmatprep.subr.bf16.mxu1 %v10069_v26 }
 0x25f   :  { %v2788_v63 = vrot.slane %v2786_v55, 1 }
 0x261   :  { %8869 = vmatpush3.bf16.msra.mxu0 %v9704_v57  ;;  %8887 = vmatpush3.bf16.msra.mxu1 %v9705_v58 }
 0x262   :  { %8870 = vmatprep.subr.bf16.mxu0 %v10069_v26  ;;  %8888 = vmatprep.subr.bf16.mxu1 %v10069_v26 }
 0x265   :  { %8871 = vmatpush3.bf16.msra.mxu0 %v9706_v59  ;;  %8889 = vmatpush3.bf16.msra.mxu1 %v9707_v60  ;;  %v2787_v59 = vunpack.c.l.b16 %v9727_v48  ;;  %v9756_v48 = vld [vmem:[%s12426_s3 + $0x50] sm:$0xff]  }
 0x266   :  { %8872 = vmatprep.subr.bf16.mxu0 %v10069_v26  ;;  %8890 = vmatprep.subr.bf16.mxu1 %v10069_v26 }
 0x267   :  { %v2789_v0 = vsel %vm1718_vm5, %v2787_v59, %v2788_v63  ;;  %v9765_v63 = vld [vmem:[%s12426_s3 + $0xb8] sm:$0xff]  }
 0x268   :  { %v2790_v4 = vpack.c.b16 %v2789_v0, %v2789_v0 }
 0x269   :  { %8873 = vmatpush3.bf16.msra.mxu0 %v9708_v61  ;;  %8891 = vmatpush3.bf16.msra.mxu1 %v9709_v62  ;;  %v9724_v61 = vld [vmem:[%s12426_s3 + $0x40] sm:$0xff]   ;;  %v9725_v62 = vld [vmem:[%s12426_s3 + $0x8] sm:$0xff]  }
 0x26a   :  { %8892 = vmatprep.subr.bf16.mxu1 %v10069_v26  ;;  %8898 = vmatprep.subr.bf16.mxu0 %v10069_v26 }
 0x26c   :  { %8875 = vmatmul.mubr.bf16.vlgmr.msra.gmra.mxu0 %v2479_v3  ;;  %v9729_v3 = vld [vmem:[%s12426_s3 + $0xb8] sm:$0xff]  }
 0x26d   :  { %8893 = vmatpush3.bf16.msra.mxu1 %v9710_v1  ;;  %8899 = vmatpush3.bf16.msra.mxu0 %v9711_v2  ;;  %v2880_v1 = vrot.slane %v2787_v59, 7  ;;  %v9728_v2 = vld [vmem:[%s12426_s3] sm:$0xff]  }
 0x26e   :  { %8900 = vmatprep.subr.bf16.mxu0 %v10069_v26  ;;  %8918 = vmatprep.subr.bf16.mxu1 %v10069_v26 }
 0x26f   :  { %8914 = vmatprep.mubr.msk.bf16.mxu0 %vm10071_vm1, %v10069_v26  ;;  %v2881_v5 = vsel %vm1718_vm5, %v2880_v1, %v2786_v55 }
 0x270   :  { %8895 = vmatmul.mubr.bf16.vlgmr.msra.gmra.mxu1 %v2598_v11  ;;  %v9735_v11 = vld [vmem:[%s12426_s3 + $0xe8] sm:$0xff]  }
 0x271   :  { %8901 = vmatpush3.bf16.msra.mxu0 %v9712_v17  ;;  %8919 = vmatpush3.bf16.msra.mxu1 %v9713_v6  ;;  %v9730_v17 = vld [vmem:[%s12426_s3 + $0xb0] sm:$0xff]   ;;  %v9731_v6 = vld [vmem:[%s12426_s3 + $0xf8] sm:$0xff]  }
 0x272   :  { %8902 = vmatprep.subr.bf16.mxu0 %v10069_v26  ;;  %8920 = vmatprep.subr.bf16.mxu1 %v10069_v26 }
 0x273   :  { %v2015_v12 = vpop.f32.mrf.mxu0  ;;  %8934 = vmatprep.mubr.msk.bf16.mxu1 %vm10071_vm1, %v10069_v26 }
 0x274   :  { %v2021_v13 = vadd.f32 %v2015_v12, %v1897_v7  ;;  %v2882_v7 = vpack.c.b16 %v2881_v5, %v2881_v5  ;;  %v9736_v12 = vld [vmem:[%s12426_s3 + $0x98] sm:$0xff]  }
 0x275   :  { %v8796_v16 = vpop.f32.mrf.mxu0  ;;  %v2125_v18 = vpop.f32.mrf.mxu1  ;;  %8903 = vmatpush3.bf16.msra.mxu0 %v9714_v14  ;;  %8921 = vmatpush3.bf16.msra.mxu1 %v9715_v15  ;;  %v9745_v14 = vld [vmem:[#allocation2 + $0xc] ss:$0 sps:$4 sm:$0x22]   ;;  %v9738_v15 = vld [vmem:[%s12426_s3 + $0x90] sm:$0xff]  }
 0x276   :  { %v2131_v20 = vadd.f32 %v2125_v18, %v2021_v13  ;;  %8904 = vmatprep.subr.bf16.mxu0 %v10069_v26  ;;  %8922 = vmatprep.subr.bf16.mxu1 %v10069_v26  ;;  %v9737_v13 = vld [vmem:[%s12426_s3 + $0xe0] sm:$0xff]   ;;  %v9739_v16 = vld [vmem:[%s12426_s3 + $0xd8] sm:$0xff]  }
 0x277   :  { %v2018_v23 = vpop.f32.mrf.mxu0  ;;  %v8816_v24 = vpop.f32.mrf.mxu1  ;;  %v9744_v18 = vld [vmem:[#allocation2 + $0x4] ss:$0 sps:$4 sm:$0x22]  }
 0x278   :  { %v2139_v25 = vadd.f32 %v7766_v19, %v2131_v20  ;;  %v2997_v19 = vunpack.c.l.b16 %v9745_v14  ;;  %v9740_v20 = vld [vmem:[%s12426_s3 + $0x88] sm:$0xff]   ;;  %v2996_v23 = vunpack.c.l.b16 %v9744_v18  ;;  %v9780_v14 = vld [vmem:[#allocation2] ss:$0 sps:$4 sm:$0x44]   ;;  %v9777_v18 = vld [vmem:[%s12426_s3 + $0xd0] sm:$0xff]  }
 0x279   :  { %v8797_v31 = vpop.f32.mrf.mxu0  ;;  %v2128_v32 = vpop.f32.mrf.mxu1  ;;  %8905 = vmatpush3.bf16.msra.mxu0 %v9716_v29  ;;  %8923 = vmatpush3.bf16.msra.mxu1 %v9717_v30 }
 0x27a   :  { %v2140_v33 = vmax.f32 %v2139_v25, 0.0  ;;  %8906 = vmatprep.subr.bf16.mxu0 %v10069_v26  ;;  %8924 = vmatprep.subr.bf16.mxu1 %v10069_v26  ;;  %v2999_v24 = vrot.slane %v2997_v19, 1  ;;  %v9742_v25 = vld [vmem:[%s12426_s3 + $0x80] sm:$0xff]   ;;  %v2998_v28 = vrot.slane %v2996_v23, 2  ;;  %v3109_v30 = vrot.slane %v2997_v19, 2  ;;  %v9747_v32 = vld [vmem:[%s12426_s3 + $0x78] sm:$0xff]  }
 0x27b   :  { %v8817_v35 = vpop.f32.mrf.mxu1  ;;  %v9746_v31 = vld [vmem:[%s12426_s3 + $0xc0] sm:$0xff]   ;;  %v3505_v19 = vunpack.c.l.b16 %v9780_v14 }
 0x27c   :  { %v2141_v36 = vpack.c.bf16 %v2140_v33, %v2140_v33  ;;  %v3000_v29 = vsel %vm1718_vm5, %v2999_v24, %v2998_v28  ;;  %v3108_v33 = vrot.slane %v2996_v23, 3  ;;  %v9779_v23 = vld [vmem:[%s12426_s3 + $0xc8] sm:$0xff]   ;;  %v9782_v28 = vld [vmem:[%s12426_s3 + $0xc0] sm:$0xff]  }
 0x27d   :  { %8907 = vmatpush3.bf16.msra.mxu0 %v9718_v38  ;;  %8925 = vmatpush3.bf16.msra.mxu1 %v9719_v39  ;;  %v3001_v35 = vpack.c.b16 %v3000_v29, %v3000_v29  ;;  %v9749_v38 = vld [vmem:[%s12426_s3 + $0x38] sm:$0xff]   ;;  %v3507_v24 = vrot.slane %v3505_v19, 4 }
 0x27e   :  { %v2149_v40 = vrot.slane %v2141_v36, %v10983_v34  ;;  %8908 = vmatprep.subr.bf16.mxu0 %v10069_v26  ;;  %8926 = vmatprep.subr.bf16.mxu1 %v10069_v26  ;;  %v3110_v36 = vsel %vm1718_vm5, %v3109_v30, %v3108_v33  ;;  %v9783_v29 = vld [vmem:[%s12426_s3 + $0x78] sm:$0xff]   ;;  %v3617_v30 = vrot.slane %v3505_v19, 5  ;;  %v9784_v33 = vld [vmem:[%s12426_s3 + $0x70] sm:$0xff]   ;;  %v9814_v19 = vld [vmem:[%s12426_s3 + $0xc0] sm:$0xff]  }
 0x27f   :  { %v3111_v39 = vpack.c.b16 %v3110_v36, %v3110_v36 }
 0x280   :  { %v2156_v41 = vrot.slane %v2149_v40, %v10983_v34  ;;  %v9750_v40 = vld [vmem:[%s12426_s3 + $0x68] sm:$0xff]  }
 0x281   :  { %8909 = vmatpush3.bf16.msra.mxu0 %v9720_v43  ;;  %8927 = vmatpush3.bf16.msra.mxu1 %v9721_v44  ;;  %v9752_v43 = vld [vmem:[%s12426_s3 + $0x60] sm:$0xff]   ;;  %v9753_v44 = vld [vmem:[%s12426_s3 + $0x28] sm:$0xff]  }
 0x282   :  { %v2158_v46 = vunpack.i.h.s16 %v2156_v41  ;;  %v7767_v47 = vpack.i.b16 %v2156_v41, %v2156_v41  ;;  %8910 = vmatprep.subr.bf16.mxu0 %v10069_v26  ;;  %8928 = vmatprep.subr.bf16.mxu1 %v10069_v26  ;;  %v9751_v41 = vld [vmem:[%s12426_s3 + $0x30] sm:$0xff]  }
 0x284   :  { %v2160_v51 = vpack.i.b16 %v2158_v46, %v2158_v46  ;;  %v2167_v52 = vrot.slane %v7767_v47, %v10998_v42  ;;  %v9755_v46 = vld [vmem:[%s12426_s3 + $0x20] sm:$0xff]   ;;  %v9763_v47 = vld [vmem:[#allocation2 + $0x8] ss:$0 sps:$4 sm:$0x22]  }
 0x285   :  { %8911 = vmatpush3.bf16.msra.mxu0 %v9722_v53  ;;  %8929 = vmatpush3.bf16.msra.mxu1 %v9723_v54  ;;  %v9758_v53 = vld [vmem:[%s12426_s3 + $0x48] sm:$0xff]   ;;  %v9759_v54 = vld [vmem:[%s12426_s3 + $0x10] sm:$0xff]  }
 0x286   :  { %v2174_v57 = vrot.slane %v2160_v51, %v10998_v42  ;;  %v2181_v58 = vsel %vm11010_vm9, %v2167_v52, %v2180_v50  ;;  %8912 = vmatprep.subr.bf16.mxu0 %v10069_v26  ;;  %8930 = vmatprep.subr.bf16.mxu1 %v10069_v26  ;;  %v9757_v50 = vld [vmem:[%s12426_s3 + $0x18] sm:$0xff]   ;;  %v9762_v51 = vld [vmem:[#allocation2] ss:$0 sps:$4 sm:$0x22]   ;;  %v3294_v52 = vunpack.c.l.b16 %v9763_v47  ;;  %v9795_v47 = vld [vmem:[%s12426_s3 + $0x10] sm:$0xff]  }
 0x287   :  { %2182 = vst [vmem:[#allocation3] sm:$0x1] %v2181_v58  ;;  %v3293_v55 = vunpack.c.l.b16 %v9762_v51  ;;  %v9761_v58 = vld [vmem:[%s12426_s3 + $0x8] sm:$0xff]  }
 0x288   :  { %v2184_v60 = vsel %vm11010_vm9, %v2174_v57, %v2183_v56  ;;  %v3296_v56 = vrot.slane %v3294_v52, 2  ;;  %v9760_v57 = vld [vmem:[%s12426_s3 + $0x40] sm:$0xff]   ;;  %v9797_v51 = vld [vmem:[%s12426_s3 + $0x8] sm:$0xff]  }
 0x289   :  { %2185 = vst [vmem:[#allocation3 + $0x4] sm:$0x1] %v2184_v60  ;;  %8913 = vmatpush3.bf16.msra.mxu0 %v9724_v61  ;;  %8931 = vmatpush3.bf16.msra.mxu1 %v9725_v62  ;;  %v3295_v59 = vrot.slane %v3293_v55, 3  ;;  %v3389_v61 = vrot.slane %v3294_v52, 1  ;;  %v9764_v62 = vld [vmem:[%s12426_s3] sm:$0xff]   ;;  %v3388_v0 = vrot.slane %v3293_v55, 2  ;;  %v3821_v52 = vpop.permute.xlu0 %3820 }
 0x28a   :  { %8932 = vmatprep.subr.bf16.mxu1 %v10069_v26  ;;  %8938 = vmatprep.subr.bf16.mxu0 %v10069_v26 }
 0x28b   :  { %v3297_v60 = vsel %vm1718_vm5, %v3296_v56, %v3295_v59  ;;  %v9800_v59 = vld [vmem:[%s12426_s3 + $0xb0] sm:$0xff]  }
 0x28c   :  { %8915 = vmatmul.mubr.bf16.vlgmr.msra.gmra.mxu0 %v2790_v4  ;;  %v3298_v1 = vpack.c.b16 %v3297_v60, %v3297_v60  ;;  %v9767_v4 = vld [vmem:[%s12426_s3 + $0xf8] sm:$0xff]  }
 0x28d   :  { %8933 = vmatpush3.bf16.msra.mxu1 %v9728_v2  ;;  %8939 = vmatpush3.bf16.msra.mxu0 %v9729_v3  ;;  %v3390_v2 = vsel %vm1718_vm5, %v3389_v61, %v3388_v0  ;;  %v9766_v3 = vld [vmem:[%s12426_s3 + $0xb0] sm:$0xff]   ;;  %v9801_v60 = vld [vmem:[%s12426_s3 + $0xf8] sm:$0xff]  }
 0x28e   :  { %8940 = vmatprep.subr.bf16.mxu0 %v10069_v26  ;;  %8958 = vmatprep.subr.bf16.mxu1 %v10069_v26  ;;  %v3391_v5 = vpack.c.b16 %v3390_v2, %v3390_v2  ;;  %v9803_v2 = vld [vmem:[%s12426_s3 + $0xf0] sm:$0xff]  }
 0x28f   :  { %8954 = vmatprep.mubr.msk.bf16.mxu0 %vm10071_vm1, %v10069_v26 }
 0x290   :  { %8935 = vmatmul.mubr.bf16.vlgmr.msra.gmra.mxu1 %v2882_v7  ;;  %v9770_v7 = vld [vmem:[%s12426_s3 + $0xa0] sm:$0xff]  }
 0x291   :  { %8941 = vmatpush3.bf16.msra.mxu0 %v9730_v17  ;;  %8959 = vmatpush3.bf16.msra.mxu1 %v9731_v6  ;;  %v9768_v17 = vld [vmem:[%s12426_s3 + $0xa8] sm:$0xff]   ;;  %v9769_v6 = vld [vmem:[%s12426_s3 + $0xf0] sm:$0xff]  }
 0x292   :  { %8942 = vmatprep.subr.bf16.mxu0 %v10069_v26  ;;  %8960 = vmatprep.subr.bf16.mxu1 %v10069_v26 }
 0x293   :  { %8974 = vmatprep.mubr.msk.bf16.mxu1 %vm10071_vm1, %v10069_v26 }
 0x295   :  { %8943 = vmatpush3.bf16.msra.mxu0 %v9732_v8  ;;  %8961 = vmatpush3.bf16.msra.mxu1 %v9733_v9  ;;  %v9771_v8 = vld [vmem:[%s12426_s3 + $0xe8] sm:$0xff]   ;;  %v9772_v9 = vld [vmem:[%s12426_s3 + $0x98] sm:$0xff]  }
 0x296   :  { %8944 = vmatprep.subr.bf16.mxu0 %v10069_v26  ;;  %8962 = vmatprep.subr.bf16.mxu1 %v10069_v26 }
 0x299   :  { %8945 = vmatpush3.bf16.msra.mxu0 %v9734_v10  ;;  %8963 = vmatpush3.bf16.msra.mxu1 %v9735_v11  ;;  %v9773_v10 = vld [vmem:[%s12426_s3 + $0xe0] sm:$0xff]   ;;  %v9781_v11 = vld [vmem:[#allocation2 + $0x8] ss:$0 sps:$4 sm:$0x44]  }
 0x29a   :  { %8946 = vmatprep.subr.bf16.mxu0 %v10069_v26  ;;  %8964 = vmatprep.subr.bf16.mxu1 %v10069_v26 }
 0x29d   :  { %8947 = vmatpush3.bf16.msra.mxu0 %v9736_v12  ;;  %8965 = vmatpush3.bf16.msra.mxu1 %v9737_v13  ;;  %v9774_v12 = vld [vmem:[%s12426_s3 + $0x90] sm:$0xff]   ;;  %v9775_v13 = vld [vmem:[%s12426_s3 + $0xd8] sm:$0xff]  }
 0x29e   :  { %8948 = vmatprep.subr.bf16.mxu0 %v10069_v26  ;;  %8966 = vmatprep.subr.bf16.mxu1 %v10069_v26 }
 0x2a1   :  { %8949 = vmatpush3.bf16.msra.mxu0 %v9738_v15  ;;  %8967 = vmatpush3.bf16.msra.mxu1 %v9739_v16  ;;  %v3506_v15 = vunpack.c.l.b16 %v9781_v11  ;;  %v9776_v16 = vld [vmem:[%s12426_s3 + $0x88] sm:$0xff]   ;;  %v9809_v11 = vld [vmem:[%s12426_s3 + $0xd8] sm:$0xff]  }
 0x2a2   :  { %8950 = vmatprep.subr.bf16.mxu0 %v10069_v26  ;;  %8968 = vmatprep.subr.bf16.mxu1 %v10069_v26 }
 0x2a5   :  { %8951 = vmatpush3.bf16.msra.mxu0 %v9740_v20  ;;  %8969 = vmatpush3.bf16.msra.mxu1 %v9741_v21  ;;  %v3508_v20 = vrot.slane %v3506_v15, 3  ;;  %v9778_v21 = vld [vmem:[%s12426_s3 + $0x80] sm:$0xff]  }
 0x2a6   :  { %8952 = vmatprep.subr.bf16.mxu0 %v10069_v26  ;;  %8970 = vmatprep.subr.bf16.mxu1 %v10069_v26 }
 0x2a9   :  { %8953 = vmatpush3.bf16.msra.mxu0 %v9742_v25  ;;  %8971 = vmatpush3.bf16.msra.mxu1 %v9743_v27  ;;  %v3509_v25 = vsel %vm1718_vm5, %v3508_v20, %v3507_v24  ;;  %v3618_v27 = vrot.slane %v3506_v15, 4  ;;  %v9812_v15 = vld [vmem:[%s12426_s3 + $0x80] sm:$0xff]   ;;  %v9815_v20 = vld [vmem:[%s12426_s3 + $0x78] sm:$0xff]  }
 0x2aa   :  { %8972 = vmatprep.subr.bf16.mxu1 %v10069_v26  ;;  %8978 = vmatprep.subr.bf16.mxu0 %v10069_v26 }
 0x2ac   :  { %8955 = vmatmul.mubr.bf16.vlgmr.msra.gmra.mxu0 %v3001_v35  ;;  %v9785_v35 = vld [vmem:[%s12426_s3 + $0x38] sm:$0xff]  }
 0x2ad   :  { %8973 = vmatpush3.bf16.msra.mxu1 %v9746_v31  ;;  %8979 = vmatpush3.bf16.msra.mxu0 %v9747_v32  ;;  %v3510_v31 = vpack.c.b16 %v3509_v25, %v3509_v25  ;;  %v3619_v32 = vsel %vm1718_vm5, %v3618_v27, %v3617_v30 }
 0x2ae   :  { %8980 = vmatprep.subr.bf16.mxu0 %v10069_v26  ;;  %8998 = vmatprep.subr.bf16.mxu1 %v10069_v26  ;;  %v3620_v36 = vpack.c.b16 %v3619_v32, %v3619_v32 }
 0x2af   :  { %8994 = vmatprep.mubr.msk.bf16.mxu0 %vm10071_vm1, %v10069_v26 }
 0x2b0   :  { %8975 = vmatmul.mubr.bf16.vlgmr.msra.gmra.mxu1 %v3111_v39  ;;  %v9788_v39 = vld [vmem:[%s12426_s3 + $0x60] sm:$0xff]  }
 0x2b1   :  { %8981 = vmatpush3.bf16.msra.mxu0 %v9748_v37  ;;  %8999 = vmatpush3.bf16.msra.mxu1 %v9749_v38  ;;  %v9786_v37 = vld [vmem:[%s12426_s3 + $0x68] sm:$0xff]   ;;  %v9787_v38 = vld [vmem:[%s12426_s3 + $0x30] sm:$0xff]  }
 0x2b2   :  { %8982 = vmatprep.subr.bf16.mxu0 %v10069_v26  ;;  %9000 = vmatprep.subr.bf16.mxu1 %v10069_v26 }
 0x2b3   :  { %9014 = vmatprep.mubr.msk.bf16.mxu1 %vm10071_vm1, %v10069_v26 }
 0x2b5   :  { %8983 = vmatpush3.bf16.msra.mxu0 %v9750_v40  ;;  %9001 = vmatpush3.bf16.msra.mxu1 %v9751_v41  ;;  %v9789_v40 = vld [vmem:[%s12426_s3 + $0x28] sm:$0xff]   ;;  %v9790_v41 = vld [vmem:[%s12426_s3 + $0x58] sm:$0xff]  }
 0x2b6   :  { %8984 = vmatprep.subr.bf16.mxu0 %v10069_v26  ;;  %9002 = vmatprep.subr.bf16.mxu1 %v10069_v26 }
 0x2b9   :  { %8985 = vmatpush3.bf16.msra.mxu0 %v9752_v43  ;;  %9003 = vmatpush3.bf16.msra.mxu1 %v9753_v44  ;;  %v9791_v43 = vld [vmem:[%s12426_s3 + $0x20] sm:$0xff]   ;;  %v9792_v44 = vld [vmem:[%s12426_s3 + $0x50] sm:$0xff]  }
 0x2ba   :  { %8986 = vmatprep.subr.bf16.mxu0 %v10069_v26  ;;  %9004 = vmatprep.subr.bf16.mxu1 %v10069_v26 }
 0x2bd   :  { %8987 = vmatpush3.bf16.msra.mxu0 %v9754_v45  ;;  %9005 = vmatpush3.bf16.msra.mxu1 %v9755_v46  ;;  %v9793_v45 = vld [vmem:[%s12426_s3 + $0x18] sm:$0xff]   ;;  %v9794_v46 = vld [vmem:[%s12426_s3 + $0x48] sm:$0xff]  }
 0x2be   :  { %8988 = vmatprep.subr.bf16.mxu0 %v10069_v26  ;;  %9006 = vmatprep.subr.bf16.mxu1 %v10069_v26 }
 0x2c1   :  { %8989 = vmatpush3.bf16.msra.mxu0 %v9756_v48  ;;  %9007 = vmatpush3.bf16.msra.mxu1 %v9757_v50  ;;  %v3823_v48 = vpop.permute.xlu1 %3822  ;;  %v9796_v50 = vld [vmem:[%s12426_s3 + $0x40] sm:$0xff]  }
 0x2c2   :  { %8990 = vmatprep.subr.bf16.mxu0 %v10069_v26  ;;  %9008 = vmatprep.subr.bf16.mxu1 %v10069_v26  ;;  %v3824_v55 = vsel %vm2244_vm6, %v3821_v52, %v3823_v48  ;;  %v9822_v52 = vld [vmem:[%s12426_s3 + $0x58] sm:$0xff]  }
 0x2c5   :  { %8991 = vmatpush3.bf16.msra.mxu0 %v9758_v53  ;;  %9009 = vmatpush3.bf16.msra.mxu1 %v9759_v54  ;;  %v9798_v53 = vld [vmem:[%s12426_s3] sm:$0xff]   ;;  %v9799_v54 = vld [vmem:[%s12426_s3 + $0xb8] sm:$0xff]   ;;  %v3925_v56 = vpop.permute.xlu1 %3924 }
 0x2c6   :  { %8992 = vmatprep.subr.bf16.mxu0 %v10069_v26  ;;  %9010 = vmatprep.subr.bf16.mxu1 %v10069_v26 }
 0x2c9   :  { %8993 = vmatpush3.bf16.msra.mxu0 %v9760_v57  ;;  %9011 = vmatpush3.bf16.msra.mxu1 %v9761_v58  ;;  %v3923_v57 = vpop.permute.xlu0 %3922  ;;  %v4059_v14 = vpop.permute.xlu1 %4058 }
 0x2ca   :  { %9012 = vmatprep.subr.bf16.mxu1 %v10069_v26  ;;  %9018 = vmatprep.subr.bf16.mxu0 %v10069_v26 }
 0x2cc   :  { %8995 = vmatmul.mubr.bf16.vlgmr.msra.gmra.mxu0 %v3298_v1  ;;  %v9802_v1 = vld [vmem:[%s12426_s3 + $0xa8] sm:$0xff]  }
 0x2cd   :  { %9013 = vmatpush3.bf16.msra.mxu1 %v9764_v62  ;;  %9019 = vmatpush3.bf16.msra.mxu0 %v9765_v63  ;;  %v3926_v62 = vsel %vm2244_vm6, %v3923_v57, %v3925_v56  ;;  %v9824_v56 = vld [vmem:[%s12426_s3 + $0x50] sm:$0xff]   ;;  %v9825_v57 = vld [vmem:[%s12426_s3 + $0x18] sm:$0xff]  }
 0x2ce   :  { %9020 = vmatprep.subr.bf16.mxu0 %v10069_v26  ;;  %9038 = vmatprep.subr.bf16.mxu1 %v10069_v26 }
 0x2cf   :  { %9034 = vmatprep.mubr.msk.bf16.mxu0 %vm10071_vm1, %v10069_v26 }
 0x2d0   :  { %9015 = vmatmul.mubr.bf16.vlgmr.msra.gmra.mxu1 %v3391_v5 }
 0x2d1   :  { %9021 = vmatpush3.bf16.msra.mxu0 %v9766_v3  ;;  %9039 = vmatpush3.bf16.msra.mxu1 %v9767_v4 }
 0x2d2   :  { %9022 = vmatprep.subr.bf16.mxu0 %v10069_v26  ;;  %9040 = vmatprep.subr.bf16.mxu1 %v10069_v26 }
 0x2d3   :  { %9054 = vmatprep.mubr.msk.bf16.mxu1 %vm10071_vm1, %v10069_v26 }
 0x2d5   :  { %9023 = vmatpush3.bf16.msra.mxu0 %v9768_v17  ;;  %9041 = vmatpush3.bf16.msra.mxu1 %v9769_v6  ;;  %v9804_v17 = vld [vmem:[%s12426_s3 + $0xa0] sm:$0xff]   ;;  %v9805_v6 = vld [vmem:[%s12426_s3 + $0xe8] sm:$0xff]  }
 0x2d6   :  { %9024 = vmatprep.subr.bf16.mxu0 %v10069_v26  ;;  %9042 = vmatprep.subr.bf16.mxu1 %v10069_v26 }
 0x2d9   :  { %9025 = vmatpush3.bf16.msra.mxu0 %v9770_v7  ;;  %9043 = vmatpush3.bf16.msra.mxu1 %v9771_v8  ;;  %v9806_v8 = vld [vmem:[%s12426_s3 + $0x98] sm:$0xff]  }
 0x2da   :  { %9026 = vmatprep.subr.bf16.mxu0 %v10069_v26  ;;  %9044 = vmatprep.subr.bf16.mxu1 %v10069_v26 }
 0x2dd   :  { %9027 = vmatpush3.bf16.msra.mxu0 %v9772_v9  ;;  %9045 = vmatpush3.bf16.msra.mxu1 %v9773_v10  ;;  %v9807_v9 = vld [vmem:[%s12426_s3 + $0xe0] sm:$0xff]   ;;  %v9808_v10 = vld [vmem:[%s12426_s3 + $0x90] sm:$0xff]  }
 0x2de   :  { %9028 = vmatprep.subr.bf16.mxu0 %v10069_v26  ;;  %9046 = vmatprep.subr.bf16.mxu1 %v10069_v26 }
 0x2e1   :  { %9029 = vmatpush3.bf16.msra.mxu0 %v9774_v12  ;;  %9047 = vmatpush3.bf16.msra.mxu1 %v9775_v13  ;;  %v9810_v12 = vld [vmem:[%s12426_s3 + $0x88] sm:$0xff]   ;;  %v9811_v13 = vld [vmem:[%s12426_s3 + $0xd0] sm:$0xff]  }
 0x2e2   :  { %9030 = vmatprep.subr.bf16.mxu0 %v10069_v26  ;;  %9048 = vmatprep.subr.bf16.mxu1 %v10069_v26 }
 0x2e5   :  { %9031 = vmatpush3.bf16.msra.mxu0 %v9776_v16  ;;  %9049 = vmatpush3.bf16.msra.mxu1 %v9777_v18  ;;  %v9813_v16 = vld [vmem:[%s12426_s3 + $0xc8] sm:$0xff]   ;;  %v4057_v18 = vpop.permute.xlu0 %4056 }
 0x2e6   :  { %9032 = vmatprep.subr.bf16.mxu0 %v10069_v26  ;;  %9050 = vmatprep.subr.bf16.mxu1 %v10069_v26 }
 0x2e9   :  { %9033 = vmatpush3.bf16.msra.mxu0 %v9778_v21  ;;  %9051 = vmatpush3.bf16.msra.mxu1 %v9779_v23  ;;  %v4060_v21 = vsel %vm2244_vm6, %v4057_v18, %v4059_v14  ;;  %v4178_v23 = vpop.permute.xlu1 %4177  ;;  %v4176_v24 = vpop.permute.xlu0 %4175 }
 0x2ea   :  { %9052 = vmatprep.subr.bf16.mxu1 %v10069_v26  ;;  %9058 = vmatprep.subr.bf16.mxu0 %v10069_v26 }
 0x2ec   :  { %9035 = vmatmul.mubr.bf16.vlgmr.msra.gmra.mxu0 %v3510_v31  ;;  %v4179_v31 = vsel %vm2244_vm6, %v4176_v24, %v4178_v23  ;;  %v9836_v23 = vld [vmem:[%s12426_s3 + $0xa8] sm:$0xff]   ;;  %v9837_v24 = vld [vmem:[%s12426_s3 + $0xf0] sm:$0xff]  }
 0x2ed   :  { %9053 = vmatpush3.bf16.msra.mxu1 %v9782_v28  ;;  %9059 = vmatpush3.bf16.msra.mxu0 %v9783_v29  ;;  %v9816_v28 = vld [vmem:[%s12426_s3 + $0x70] sm:$0xff]   ;;  %v9817_v29 = vld [vmem:[%s12426_s3 + $0x38] sm:$0xff]  }
 0x2ee   :  { %9060 = vmatprep.subr.bf16.mxu0 %v10069_v26  ;;  %9078 = vmatprep.subr.bf16.mxu1 %v10069_v26 }
 0x2ef   :  { %9074 = vmatprep.mubr.msk.bf16.mxu0 %vm10071_vm1, %v10069_v26 }
 0x2f0   :  { %9055 = vmatmul.mubr.bf16.vlgmr.msra.gmra.mxu1 %v3620_v36  ;;  %v11412_v36 = vld [vmem:[%s12427_s4] ss:$0 sm:$0xff] }
 0x2f1   :  { %9061 = vmatpush3.bf16.msra.mxu0 %v9784_v33  ;;  %9079 = vmatpush3.bf16.msra.mxu1 %v9785_v35 }
 0x2f2   :  { %9062 = vmatprep.subr.bf16.mxu0 %v10069_v26  ;;  %9080 = vmatprep.subr.bf16.mxu1 %v10069_v26 }
 0x2f3   :  { %9094 = vmatprep.mubr.msk.bf16.mxu1 %vm10071_vm1, %v10069_v26 }
 0x2f5   :  { %9063 = vmatpush3.bf16.msra.mxu0 %v9786_v37  ;;  %9081 = vmatpush3.bf16.msra.mxu1 %v9787_v38  ;;  %v9818_v38 = vld [vmem:[%s12426_s3 + $0x68] sm:$0xff]  }
 0x2f6   :  { %9064 = vmatprep.subr.bf16.mxu0 %v10069_v26  ;;  %9082 = vmatprep.subr.bf16.mxu1 %v10069_v26 }
 0x2f9   :  { %9065 = vmatpush3.bf16.msra.mxu0 %v9788_v39  ;;  %9083 = vmatpush3.bf16.msra.mxu1 %v9789_v40  ;;  %v9819_v39 = vld [vmem:[%s12426_s3 + $0x30] sm:$0xff]  }
 0x2fa   :  { %9066 = vmatprep.subr.bf16.mxu0 %v10069_v26  ;;  %9084 = vmatprep.subr.bf16.mxu1 %v10069_v26 }
 0x2fd   :  { %9067 = vmatpush3.bf16.msra.mxu0 %v9790_v41  ;;  %9085 = vmatpush3.bf16.msra.mxu1 %v9791_v43 }
 0x2fe   :  { %9068 = vmatprep.subr.bf16.mxu0 %v10069_v26  ;;  %9086 = vmatprep.subr.bf16.mxu1 %v10069_v26 }
 0x301   :  { %9069 = vmatpush3.bf16.msra.mxu0 %v9792_v44  ;;  %9087 = vmatpush3.bf16.msra.mxu1 %v9793_v45 }
 0x302   :  { %9070 = vmatprep.subr.bf16.mxu0 %v10069_v26  ;;  %9088 = vmatprep.subr.bf16.mxu1 %v10069_v26 }
 0x305   :  { %9071 = vmatpush3.bf16.msra.mxu0 %v9794_v46  ;;  %9089 = vmatpush3.bf16.msra.mxu1 %v9795_v47  ;;  %v9820_v46 = vld [vmem:[%s12426_s3 + $0x60] sm:$0xff]   ;;  %v9821_v47 = vld [vmem:[%s12426_s3 + $0x28] sm:$0xff]  }
 0x306   :  { %9072 = vmatprep.subr.bf16.mxu0 %v10069_v26  ;;  %9090 = vmatprep.subr.bf16.mxu1 %v10069_v26 }
 0x309   :  { %9073 = vmatpush3.bf16.msra.mxu0 %v9796_v50  ;;  %9091 = vmatpush3.bf16.msra.mxu1 %v9797_v51 }
 0x30a   :  { %9092 = vmatprep.subr.bf16.mxu1 %v10069_v26  ;;  %9098 = vmatprep.subr.bf16.mxu0 %v10069_v26 }
 0x30c   :  { %9075 = vmatmul.mubr.bf16.vlgmr.msra.gmra.mxu0 %v3824_v55  ;;  %v11325_v58 = vpop.f32.mrf.mxu0  ;;  %v9831_v55 = vld [vmem:[#allocation2 + $0xc] ss:$0 sps:$4 sm:$0x22]  }
 0x30d   :  { %9093 = vmatpush3.bf16.msra.mxu1 %v9798_v53  ;;  %9099 = vmatpush3.bf16.msra.mxu0 %v9799_v54  ;;  %v9823_v53 = vld [vmem:[%s12426_s3 + $0x20] sm:$0xff]  }
 0x30e   :  { %v8836_v61 = vpop.f32.mrf.mxu0  ;;  %9100 = vmatprep.subr.bf16.mxu0 %v10069_v26  ;;  %9118 = vmatprep.subr.bf16.mxu1 %v10069_v26 }
 0x30f   :  { %9114 = vmatprep.mubr.msk.bf16.mxu0 %vm10071_vm1, %v10069_v26 }
 0x310   :  { %9095 = vmatmul.mubr.bf16.vlgmr.msra.gmra.mxu1 %v3926_v62  ;;  %v2332_v63 = vpop.f32.mrf.mxu0  ;;  %v2429_v0 = vpop.f32.mrf.mxu1 }
 0x311   :  { %9101 = vmatpush3.bf16.msra.mxu0 %v9800_v59  ;;  %9119 = vmatpush3.bf16.msra.mxu1 %v9801_v60  ;;  %v2430_v27 = vadd.f32 %v2429_v0, %v11325_v58  ;;  %v9830_v60 = vld [vmem:[#allocation2 + $0x4] ss:$0 sps:$4 sm:$0x22]   ;;  %v4367_v63 = vunpack.c.l.b16 %v9831_v55 }
 0x312   :  { %v8837_v3 = vpop.f32.mrf.mxu0  ;;  %v8856_v4 = vpop.f32.mrf.mxu1  ;;  %9102 = vmatprep.subr.bf16.mxu0 %v10069_v26  ;;  %9120 = vmatprep.subr.bf16.mxu1 %v10069_v26 }
 0x313   :  { %9134 = vmatprep.mubr.msk.bf16.mxu1 %vm10071_vm1, %v10069_v26  ;;  %v4366_v3 = vunpack.c.l.b16 %v9830_v60  ;;  %v4369_v4 = vrot.slane %v4367_v63, 2  ;;  %v9853_v60 = vld [vmem:[%s12426_s3 + $0x38] sm:$0xff]  }
 0x314   :  { %v2432_v5 = vpop.f32.mrf.mxu1 }
 0x315   :  { %9103 = vmatpush3.bf16.msra.mxu0 %v9802_v1  ;;  %9121 = vmatpush3.bf16.msra.mxu1 %v9803_v2  ;;  %v9826_v1 = vld [vmem:[%s12426_s3 + $0x48] sm:$0xff]   ;;  %v9827_v2 = vld [vmem:[%s12426_s3 + $0x10] sm:$0xff]   ;;  %v9828_v5 = vld [vmem:[%s12426_s3 + $0x40] sm:$0xff]  }
 0x316   :  { %v8857_v7 = vpop.f32.mrf.mxu1  ;;  %9104 = vmatprep.subr.bf16.mxu0 %v10069_v26  ;;  %9122 = vmatprep.subr.bf16.mxu1 %v10069_v26 }
 0x319   :  { %9105 = vmatpush3.bf16.msra.mxu0 %v9804_v17  ;;  %9123 = vmatpush3.bf16.msra.mxu1 %v9805_v6  ;;  %v9829_v17 = vld [vmem:[%s12426_s3 + $0x8] sm:$0xff]   ;;  %v4368_v6 = vrot.slane %v4366_v3, 3 }
 0x31a   :  { %9106 = vmatprep.subr.bf16.mxu0 %v10069_v26  ;;  %9124 = vmatprep.subr.bf16.mxu1 %v10069_v26 }
 0x31b   :  { %v4370_v7 = vsel %vm1718_vm5, %v4369_v4, %v4368_v6  ;;  %v9855_v4 = vld [vmem:[%s12426_s3 + $0x30] sm:$0xff]  }
 0x31d   :  { %9107 = vmatpush3.bf16.msra.mxu0 %v9806_v8  ;;  %9125 = vmatpush3.bf16.msra.mxu1 %v9807_v9  ;;  %v4462_v8 = vrot.slane %v4367_v63, 1  ;;  %v9832_v9 = vld [vmem:[%s12426_s3] sm:$0xff]  }
 0x31e   :  { %9108 = vmatprep.subr.bf16.mxu0 %v10069_v26  ;;  %9126 = vmatprep.subr.bf16.mxu1 %v10069_v26 }
 0x321   :  { %9109 = vmatpush3.bf16.msra.mxu0 %v9808_v10  ;;  %9127 = vmatpush3.bf16.msra.mxu1 %v9809_v11  ;;  %v9833_v10 = vld [vmem:[%s12426_s3 + $0xb8] sm:$0xff]   ;;  %v4461_v11 = vrot.slane %v4366_v3, 2  ;;  %v9854_v3 = vld [vmem:[%s12426_s3 + $0x68] sm:$0xff]  }
 0x322   :  { %9110 = vmatprep.subr.bf16.mxu0 %v10069_v26  ;;  %9128 = vmatprep.subr.bf16.mxu1 %v10069_v26 }
 0x325   :  { %9111 = vmatpush3.bf16.msra.mxu0 %v9810_v12  ;;  %9129 = vmatpush3.bf16.msra.mxu1 %v9811_v13  ;;  %v4371_v12 = vpack.c.b16 %v4370_v7, %v4370_v7  ;;  %v4463_v13 = vsel %vm1718_vm5, %v4462_v8, %v4461_v11 }
 0x326   :  { %9112 = vmatprep.subr.bf16.mxu0 %v10069_v26  ;;  %9130 = vmatprep.subr.bf16.mxu1 %v10069_v26 }
 0x329   :  { %9113 = vmatpush3.bf16.msra.mxu0 %v9812_v15  ;;  %9131 = vmatpush3.bf16.msra.mxu1 %v9813_v16  ;;  %v9834_v15 = vld [vmem:[%s12426_s3 + $0xb0] sm:$0xff]   ;;  %v9835_v16 = vld [vmem:[%s12426_s3 + $0xf8] sm:$0xff]  }
 0x32a   :  { %9132 = vmatprep.subr.bf16.mxu1 %v10069_v26  ;;  %9138 = vmatprep.subr.bf16.mxu0 %v10069_v26 }
 0x32c   :  { %v2563_v25 = vpop.f32.mrf.mxu0  ;;  %9115 = vmatmul.mubr.bf16.vlgmr.msra.gmra.mxu0 %v4060_v21 }
 0x32d   :  { %9133 = vmatpush3.bf16.msra.mxu1 %v9814_v19  ;;  %9139 = vmatpush3.bf16.msra.mxu0 %v9815_v20  ;;  %v2569_v32 = vadd.f32 %v2563_v25, %v2430_v27  ;;  %v4464_v19 = vpack.c.b16 %v4463_v13, %v4463_v13 }
 0x32e   :  { %v8876_v30 = vpop.f32.mrf.mxu0  ;;  %9140 = vmatprep.subr.bf16.mxu0 %v10069_v26  ;;  %9158 = vmatprep.subr.bf16.mxu1 %v10069_v26 }
 0x32f   :  { %9154 = vmatprep.mubr.msk.bf16.mxu0 %vm10071_vm1, %v10069_v26  ;;  %v9839_v30 = vld [vmem:[%s12426_s3 + $0xe8] sm:$0xff]  }
 0x330   :  { %v2566_v33 = vpop.f32.mrf.mxu0  ;;  %v2682_v35 = vpop.f32.mrf.mxu1  ;;  %9135 = vmatmul.mubr.bf16.vlgmr.msra.gmra.mxu1 %v4179_v31 }
 0x331   :  { %v2688_v37 = vadd.f32 %v2682_v35, %v2569_v32  ;;  %9141 = vmatpush3.bf16.msra.mxu0 %v9816_v28  ;;  %9159 = vmatpush3.bf16.msra.mxu1 %v9817_v29  ;;  %v9838_v29 = vld [vmem:[%s12426_s3 + $0xa0] sm:$0xff]   ;;  %v9840_v32 = vld [vmem:[%s12426_s3 + $0x98] sm:$0xff]   ;;  %v9849_v35 = vld [vmem:[#allocation2 + $0xc] ss:$0 sps:$4 sm:$0x44]  }
 0x332   :  { %v8877_v40 = vpop.f32.mrf.mxu0  ;;  %v8896_v41 = vpop.f32.mrf.mxu1  ;;  %9142 = vmatprep.subr.bf16.mxu0 %v10069_v26  ;;  %9160 = vmatprep.subr.bf16.mxu1 %v10069_v26  ;;  %v9841_v33 = vld [vmem:[%s12426_s3 + $0xe0] sm:$0xff]  }
 0x333   :  { %v2696_v43 = vadd.f32 %v11412_v36, %v2688_v37  ;;  %9174 = vmatprep.mubr.msk.bf16.mxu1 %vm10071_vm1, %v10069_v26  ;;  %v9842_v37 = vld [vmem:[%s12426_s3 + $0x90] sm:$0xff]   ;;  %v4579_v40 = vunpack.c.l.b16 %v9849_v35  ;;  %v9844_v41 = vld [vmem:[%s12426_s3 + $0x88] sm:$0xff]  }
 0x334   :  { %v2685_v44 = vpop.f32.mrf.mxu1 }
 0x335   :  { %v2697_v45 = vmax.f32 %v2696_v43, 0.0  ;;  %9143 = vmatpush3.bf16.msra.mxu0 %v9818_v38  ;;  %9161 = vmatpush3.bf16.msra.mxu1 %v9819_v39  ;;  %v9843_v38 = vld [vmem:[%s12426_s3 + $0xd8] sm:$0xff]   ;;  %v9848_v39 = vld [vmem:[#allocation2 + $0x4] ss:$0 sps:$4 sm:$0x44]   ;;  %v9845_v43 = vld [vmem:[%s12426_s3 + $0xd0] sm:$0xff]  }
 0x336   :  { %v8897_v48 = vpop.f32.mrf.mxu1  ;;  %9144 = vmatprep.subr.bf16.mxu0 %v10069_v26  ;;  %9162 = vmatprep.subr.bf16.mxu1 %v10069_v26  ;;  %v4578_v44 = vunpack.c.l.b16 %v9848_v39 }
 0x337   :  { %v2698_v50 = vpack.c.bf16 %v2697_v45, %v2697_v45  ;;  %v4581_v45 = vrot.slane %v4579_v40, 3 }
 0x338   :  { %v4580_v48 = vrot.slane %v4578_v44, 4 }
 0x339   :  { %v2706_v51 = vrot.slane %v2698_v50, %v10983_v34  ;;  %9145 = vmatpush3.bf16.msra.mxu0 %v9820_v46  ;;  %9163 = vmatpush3.bf16.msra.mxu1 %v9821_v47  ;;  %v9846_v46 = vld [vmem:[%s12426_s3 + $0x80] sm:$0xff]   ;;  %v9847_v47 = vld [vmem:[%s12426_s3 + $0xc8] sm:$0xff]  }
 0x33a   :  { %9146 = vmatprep.subr.bf16.mxu0 %v10069_v26  ;;  %9164 = vmatprep.subr.bf16.mxu1 %v10069_v26  ;;  %v4582_v50 = vsel %vm1718_vm5, %v4581_v45, %v4580_v48 }
 0x33b   :  { %v2713_v54 = vrot.slane %v2706_v51, %v10983_v34  ;;  %v4691_v51 = vrot.slane %v4579_v40, 4  ;;  %v4583_v55 = vpack.c.b16 %v4582_v50, %v4582_v50  ;;  %v9864_v40 = vld [vmem:[%s12426_s3 + $0x40] sm:$0xff]  }
 0x33d   :  { %9147 = vmatpush3.bf16.msra.mxu0 %v9822_v52  ;;  %9165 = vmatpush3.bf16.msra.mxu1 %v9823_v53  ;;  %v7809_v58 = vpack.i.b16 %v2713_v54, %v2713_v54  ;;  %v2715_v59 = vunpack.i.h.s16 %v2713_v54  ;;  %v9850_v52 = vld [vmem:[%s12426_s3 + $0xc0] sm:$0xff]   ;;  %v9851_v53 = vld [vmem:[%s12426_s3 + $0x78] sm:$0xff]   ;;  %v4690_v54 = vrot.slane %v4578_v44, 5 }
 0x33e   :  { %9148 = vmatprep.subr.bf16.mxu0 %v10069_v26  ;;  %9166 = vmatprep.subr.bf16.mxu1 %v10069_v26 }
 0x33f   :  { %v2724_v61 = vrot.slane %v7809_v58, %v10998_v42  ;;  %v2717_v62 = vpack.i.b16 %v2715_v59, %v2715_v59  ;;  %v9852_v59 = vld [vmem:[%s12426_s3 + $0x70] sm:$0xff]  }
 0x341   :  { %9149 = vmatpush3.bf16.msra.mxu0 %v9824_v56  ;;  %9167 = vmatpush3.bf16.msra.mxu1 %v9825_v57  ;;  %v2731_v0 = vrot.slane %v2717_v62, %v10998_v42  ;;  %v4692_v56 = vsel %vm1718_vm5, %v4691_v51, %v4690_v54  ;;  %v9871_v54 = vld [vmem:[%s12426_s3 + $0xf8] sm:$0xff]  }
 0x342   :  { %2732 = vrot.lane.b32.xlu0 %v2724_v61, %s10072_s26  ;;  %9150 = vmatprep.subr.bf16.mxu0 %v10069_v26  ;;  %v4693_v62 = vpack.c.b16 %v4692_v56, %v4692_v56 }
 0x343   :  { %2734 = vrot.lane.b32.xlu1 %v2731_v0, %s10072_s26  ;;  %9168 = vmatprep.subr.bf16.mxu1 %v10069_v26 }
 0x345   :  { %9151 = vmatpush3.bf16.msra.mxu0 %v9826_v1  ;;  %9169 = vmatpush3.bf16.msra.mxu1 %v9827_v2 }
 0x346   :  { %9152 = vmatprep.subr.bf16.mxu0 %v10069_v26  ;;  %9170 = vmatprep.subr.bf16.mxu1 %v10069_v26 }
 0x349   :  { %9153 = vmatpush3.bf16.msra.mxu0 %v9828_v5  ;;  %9171 = vmatpush3.bf16.msra.mxu1 %v9829_v17 }
 0x34a   :  { %9172 = vmatprep.subr.bf16.mxu1 %v10069_v26  ;;  %9178 = vmatprep.subr.bf16.mxu0 %v10069_v26 }
 0x34c   :  { %v11481_v14 = vpop.f32.mrf.mxu0  ;;  %9155 = vmatmul.mubr.bf16.vlgmr.msra.gmra.mxu0 %v4371_v12 }
 0x34d   :  { %9173 = vmatpush3.bf16.msra.mxu1 %v9832_v9  ;;  %9179 = vmatpush3.bf16.msra.mxu0 %v9833_v10  ;;  %v9856_v9 = vld [vmem:[%s12426_s3 + $0x60] sm:$0xff]   ;;  %v9857_v10 = vld [vmem:[%s12426_s3 + $0x28] sm:$0xff]  }
 0x34e   :  { %v8916_v18 = vpop.f32.mrf.mxu0  ;;  %9180 = vmatprep.subr.bf16.mxu0 %v10069_v26  ;;  %9198 = vmatprep.subr.bf16.mxu1 %v10069_v26 }
 0x34f   :  { %9194 = vmatprep.mubr.msk.bf16.mxu0 %vm10071_vm1, %v10069_v26  ;;  %v9867_v18 = vld [vmem:[#allocation2 + $0x8] ss:$0 sps:$4 sm:$0x44]  }
 0x350   :  { %v2877_v20 = vpop.f32.mrf.mxu0  ;;  %v2966_v21 = vpop.f32.mrf.mxu1  ;;  %9175 = vmatmul.mubr.bf16.vlgmr.msra.gmra.mxu1 %v4464_v19 }
 0x351   :  { %9181 = vmatpush3.bf16.msra.mxu0 %v9834_v15  ;;  %9199 = vmatpush3.bf16.msra.mxu1 %v9835_v16  ;;  %v2967_v58 = vadd.f32 %v2966_v21, %v11481_v14  ;;  %v9858_v14 = vld [vmem:[%s12426_s3 + $0x58] sm:$0xff]   ;;  %v9859_v15 = vld [vmem:[%s12426_s3 + $0x20] sm:$0xff]   ;;  %v9860_v21 = vld [vmem:[%s12426_s3 + $0x50] sm:$0xff]  }
 0x352   :  { %v8917_v25 = vpop.f32.mrf.mxu0  ;;  %v8936_v27 = vpop.f32.mrf.mxu1  ;;  %9182 = vmatprep.subr.bf16.mxu0 %v10069_v26  ;;  %9200 = vmatprep.subr.bf16.mxu1 %v10069_v26 }
 0x353   :  { %9214 = vmatprep.mubr.msk.bf16.mxu1 %vm10071_vm1, %v10069_v26  ;;  %v3247_v25 = vld [vmem:[#allocation3 + $0x2] sm:$0x1] }
 0x354   :  { %v2969_v28 = vpop.f32.mrf.mxu1 }
 0x355   :  { %9183 = vmatpush3.bf16.msra.mxu0 %v9836_v23  ;;  %9201 = vmatpush3.bf16.msra.mxu1 %v9837_v24  ;;  %v9861_v23 = vld [vmem:[%s12426_s3 + $0x18] sm:$0xff]   ;;  %v9866_v24 = vld [vmem:[#allocation2] ss:$0 sps:$4 sm:$0x44]  }
 0x356   :  { %v8937_v31 = vpop.f32.mrf.mxu1  ;;  %9184 = vmatprep.subr.bf16.mxu0 %v10069_v26  ;;  %9202 = vmatprep.subr.bf16.mxu1 %v10069_v26  ;;  %v4875_v35 = vunpack.c.l.b16 %v9866_v24 }
 0x358   :  { %v4970_v48 = vrot.slane %v4875_v35, 4 }
 0x359   :  { %9185 = vmatpush3.bf16.msra.mxu0 %v9838_v29  ;;  %9203 = vmatpush3.bf16.msra.mxu1 %v9839_v30  ;;  %v4876_v29 = vunpack.c.l.b16 %v9867_v18  ;;  %v3250_v30 = vld [vmem:[#allocation3 + $0x6] sm:$0x1]  ;;  %v9882_v18 = vld [vmem:[%s12426_s3 + $0x80] sm:$0xff]  }
 0x35a   :  { %9186 = vmatprep.subr.bf16.mxu0 %v10069_v26  ;;  %9204 = vmatprep.subr.bf16.mxu1 %v10069_v26 }
 0x35b   :  { %v4971_v45 = vrot.slane %v4876_v29, 3 }
 0x35d   :  { %9187 = vmatpush3.bf16.msra.mxu0 %v9840_v32  ;;  %9205 = vmatpush3.bf16.msra.mxu1 %v9841_v33  ;;  %v9862_v32 = vld [vmem:[%s12426_s3 + $0x48] sm:$0xff]   ;;  %v9863_v33 = vld [vmem:[%s12426_s3 + $0x10] sm:$0xff]   ;;  %v4972_v51 = vsel %vm1718_vm5, %v4971_v45, %v4970_v48 }
 0x35e   :  { %9188 = vmatprep.subr.bf16.mxu0 %v10069_v26  ;;  %9206 = vmatprep.subr.bf16.mxu1 %v10069_v26  ;;  %v4973_v56 = vpack.c.b16 %v4972_v51, %v4972_v51  ;;  %v9891_v48 = vld [vmem:[%s12426_s3 + $0x30] sm:$0xff]  }
 0x361   :  { %9189 = vmatpush3.bf16.msra.mxu0 %v9842_v37  ;;  %9207 = vmatpush3.bf16.msra.mxu1 %v9843_v38  ;;  %v4878_v38 = vrot.slane %v4876_v29, 4 }
 0x362   :  { %9190 = vmatprep.subr.bf16.mxu0 %v10069_v26  ;;  %9208 = vmatprep.subr.bf16.mxu1 %v10069_v26 }
 0x365   :  { %9191 = vmatpush3.bf16.msra.mxu0 %v9844_v41  ;;  %9209 = vmatpush3.bf16.msra.mxu1 %v9845_v43  ;;  %v9865_v41 = vld [vmem:[%s12426_s3 + $0x8] sm:$0xff]   ;;  %v4877_v43 = vrot.slane %v4875_v35, 5  ;;  %v9888_v35 = vld [vmem:[%s12426_s3 + $0x70] sm:$0xff]  }
 0x366   :  { %9192 = vmatprep.subr.bf16.mxu0 %v10069_v26  ;;  %9210 = vmatprep.subr.bf16.mxu1 %v10069_v26 }
 0x367   :  { %v4879_v44 = vsel %vm1718_vm5, %v4878_v38, %v4877_v43 }
 0x368   :  { %v4880_v50 = vpack.c.b16 %v4879_v44, %v4879_v44 }
 0x369   :  { %9193 = vmatpush3.bf16.msra.mxu0 %v9846_v46  ;;  %9211 = vmatpush3.bf16.msra.mxu1 %v9847_v47  ;;  %v9868_v46 = vld [vmem:[%s12426_s3] sm:$0xff]   ;;  %v9869_v47 = vld [vmem:[%s12426_s3 + $0xb8] sm:$0xff]  }
 0x36a   :  { %9212 = vmatprep.subr.bf16.mxu1 %v10069_v26  ;;  %9218 = vmatprep.subr.bf16.mxu0 %v10069_v26 }
 0x36c   :  { %v3085_v57 = vpop.f32.mrf.mxu0  ;;  %9195 = vmatmul.mubr.bf16.vlgmr.msra.gmra.mxu0 %v4583_v55 }
 0x36d   :  { %9213 = vmatpush3.bf16.msra.mxu1 %v9850_v52  ;;  %9219 = vmatpush3.bf16.msra.mxu0 %v9851_v53  ;;  %v3091_v63 = vadd.f32 %v3085_v57, %v2967_v58  ;;  %v9870_v53 = vld [vmem:[%s12426_s3 + $0xb0] sm:$0xff]  }
 0x36e   :  { %v8956_v61 = vpop.f32.mrf.mxu0  ;;  %9220 = vmatprep.subr.bf16.mxu0 %v10069_v26  ;;  %9238 = vmatprep.subr.bf16.mxu1 %v10069_v26 }
 0x36f   :  { %9234 = vmatprep.mubr.msk.bf16.mxu0 %vm10071_vm1, %v10069_v26 }
 0x370   :  { %v3088_v0 = vpop.f32.mrf.mxu0  ;;  %v3195_v1 = vpop.f32.mrf.mxu1  ;;  %9215 = vmatmul.mubr.bf16.vlgmr.msra.gmra.mxu1 %v4693_v62 }
 0x371   :  { %v3201_v2 = vadd.f32 %v3195_v1, %v3091_v63  ;;  %9221 = vmatpush3.bf16.msra.mxu0 %v9852_v59  ;;  %9239 = vmatpush3.bf16.msra.mxu1 %v9853_v60  ;;  %v9872_v59 = vld [vmem:[%s12426_s3 + $0xa8] sm:$0xff]   ;;  %v9873_v60 = vld [vmem:[%s12426_s3 + $0xf0] sm:$0xff]   ;;  %v9874_v0 = vld [vmem:[%s12426_s3 + $0xa0] sm:$0xff]  }
 0x372   :  { %v8957_v5 = vpop.f32.mrf.mxu0  ;;  %v8976_v17 = vpop.f32.mrf.mxu1  ;;  %9222 = vmatprep.subr.bf16.mxu0 %v10069_v26  ;;  %9240 = vmatprep.subr.bf16.mxu1 %v10069_v26  ;;  %v9875_v1 = vld [vmem:[%s12426_s3 + $0xe8] sm:$0xff]  }
 0x373   :  { %v3209_v6 = vadd.f32 %v11412_v36, %v3201_v2  ;;  %9254 = vmatprep.mubr.msk.bf16.mxu1 %vm10071_vm1, %v10069_v26  ;;  %v9885_v5 = vld [vmem:[#allocation2 + $0x8] ss:$0 sps:$4 sm:$0x88]   ;;  %v11673_v17 = vpop.permute.xlu0 %5403 }
 0x374   :  { %v3198_v7 = vpop.f32.mrf.mxu1 }
 0x375   :  { %v3210_v8 = vmax.f32 %v3209_v6, 0.0  ;;  %9223 = vmatpush3.bf16.msra.mxu0 %v9854_v3  ;;  %9241 = vmatpush3.bf16.msra.mxu1 %v9855_v4  ;;  %v9876_v3 = vld [vmem:[%s12426_s3 + $0x98] sm:$0xff]   ;;  %v9877_v4 = vld [vmem:[%s12426_s3 + $0xe0] sm:$0xff]   ;;  %v9878_v6 = vld [vmem:[%s12426_s3 + $0x90] sm:$0xff]  }
 0x376   :  { %v8977_v11 = vpop.f32.mrf.mxu1  ;;  %9224 = vmatprep.subr.bf16.mxu0 %v10069_v26  ;;  %9242 = vmatprep.subr.bf16.mxu1 %v10069_v26  ;;  %v9879_v7 = vld [vmem:[%s12426_s3 + $0xd8] sm:$0xff]  }
 0x377   :  { %v3211_v12 = vpack.c.bf16 %v3210_v8, %v3210_v8  ;;  %v9884_v8 = vld [vmem:[#allocation2] ss:$0 sps:$4 sm:$0x88]   ;;  %v9880_v11 = vld [vmem:[%s12426_s3 + $0x88] sm:$0xff]  }
 0x379   :  { %v3219_v13 = vrot.slane %v3211_v12, %v10983_v34  ;;  %9225 = vmatpush3.bf16.msra.mxu0 %v9856_v9  ;;  %9243 = vmatpush3.bf16.msra.mxu1 %v9857_v10  ;;  %v11683_v9 = vpop.permute.xlu1 %5405  ;;  %v5088_v10 = vunpack.c.l.b16 %v9885_v5  ;;  %v9881_v12 = vld [vmem:[%s12426_s3 + $0xd0] sm:$0xff]  }
 0x37a   :  { %9226 = vmatprep.subr.bf16.mxu0 %v10069_v26  ;;  %9244 = vmatprep.subr.bf16.mxu1 %v10069_v26 }
 0x37b   :  { %v3226_v16 = vrot.slane %v3219_v13, %v10983_v34  ;;  %v5087_v13 = vunpack.c.l.b16 %v9884_v8  ;;  %v9897_v8 = vld [vmem:[%s12426_s3 + $0x18] sm:$0xff]  }
 0x37d   :  { %v3228_v19 = vunpack.i.h.s16 %v3226_v16  ;;  %v7847_v20 = vpack.i.b16 %v3226_v16, %v3226_v16  ;;  %9227 = vmatpush3.bf16.msra.mxu0 %v9858_v14  ;;  %9245 = vmatpush3.bf16.msra.mxu1 %v9859_v15  ;;  %v11693_v14 = vpop.permute.xlu0 %5505  ;;  %v5090_v15 = vrot.slane %v5088_v10, 5  ;;  %v11695_v16 = vpop.permute.xlu1 %5507 }
 0x37e   :  { %9228 = vmatprep.subr.bf16.mxu0 %v10069_v26  ;;  %9246 = vmatprep.subr.bf16.mxu1 %v10069_v26 }
 0x37f   :  { %v3230_v27 = vpack.i.b16 %v3228_v19, %v3228_v19  ;;  %v3237_v28 = vrot.slane %v7847_v20, %v10998_v42  ;;  %v9883_v19 = vld [vmem:[%s12426_s3 + $0xc8] sm:$0xff]   ;;  %v5089_v20 = vrot.slane %v5087_v13, 6 }
 0x381   :  { %v3244_v31 = vrot.slane %v3230_v27, %v10998_v42  ;;  %9229 = vmatpush3.bf16.msra.mxu0 %v9860_v21  ;;  %9247 = vmatpush3.bf16.msra.mxu1 %v9861_v23  ;;  %v3248_v37 = vsel %vm11010_vm9, %v3237_v28, %v3247_v25  ;;  %v5091_v21 = vsel %vm1718_vm5, %v5090_v15, %v5089_v20  ;;  %v5200_v23 = vrot.slane %v5088_v10, 6  ;;  %v11706_v24 = vpop.permute.xlu0 %5639  ;;  %v9886_v25 = vld [vmem:[%s12426_s3 + $0xc0] sm:$0xff]   ;;  %v9887_v27 = vld [vmem:[%s12426_s3 + $0x78] sm:$0xff]  }
 0x382   :  { %9230 = vmatprep.subr.bf16.mxu0 %v10069_v26  ;;  %9248 = vmatprep.subr.bf16.mxu1 %v10069_v26  ;;  %3249 = vst [vmem:[#allocation3 + $0x2] sm:$0x1] %v3248_v37  ;;  %v5199_v28 = vrot.slane %v5087_v13, 7  ;;  %v5092_v29 = vpack.c.b16 %v5091_v21, %v5091_v21  ;;  %v9889_v37 = vld [vmem:[%s12426_s3 + $0x38] sm:$0xff]   ;;  %v9970_v10 = vld [vmem:[%s12428_s5] sm:$0xff]  }
 0x383   :  { %v3251_v39 = vsel %vm11010_vm9, %v3244_v31, %v3250_v30  ;;  %v11716_v30 = vpop.permute.xlu1 %5641 }
 0x384   :  { %3252 = vst [vmem:[#allocation3 + $0x6] sm:$0x1] %v3251_v39  ;;  %v5201_v31 = vsel %vm1718_vm5, %v5200_v23, %v5199_v28  ;;  %v9902_v28 = vld [vmem:[%s12426_s3] sm:$0xff]  }
 0x385   :  { %9231 = vmatpush3.bf16.msra.mxu0 %v9862_v32  ;;  %9249 = vmatpush3.bf16.msra.mxu1 %v9863_v33  ;;  %v5202_v39 = vpack.c.b16 %v5201_v31, %v5201_v31  ;;  %v5407_v31 = vsel %vm2244_vm6, %v11673_v17, %v11683_v9  ;;  %v5509_v17 = vsel %vm2244_vm6, %v11693_v14, %v11695_v16  ;;  %v9908_v16 = vld [vmem:[%s12426_s3 + $0xa0] sm:$0xff]  }
 0x386   :  { %9232 = vmatprep.subr.bf16.mxu0 %v10069_v26  ;;  %9250 = vmatprep.subr.bf16.mxu1 %v10069_v26 }
 0x387   :  { %v11733_v45 = vpop.permute.xlu1 %5760 }
 0x389   :  { %9233 = vmatpush3.bf16.msra.mxu0 %v9864_v40  ;;  %9251 = vmatpush3.bf16.msra.mxu1 %v9865_v41  ;;  %v11729_v40 = vpop.permute.xlu0 %5758 }
 0x38a   :  { %9252 = vmatprep.subr.bf16.mxu1 %v10069_v26  ;;  %9258 = vmatprep.subr.bf16.mxu0 %v10069_v26 }
 0x38c   :  { %v11633_v52 = vpop.f32.mrf.mxu0  ;;  %9235 = vmatmul.mubr.bf16.vlgmr.msra.gmra.mxu0 %v4880_v50 }
 0x38d   :  { %9253 = vmatpush3.bf16.msra.mxu1 %v9868_v46  ;;  %9259 = vmatpush3.bf16.msra.mxu0 %v9869_v47  ;;  %v9890_v47 = vld [vmem:[%s12426_s3 + $0x68] sm:$0xff]  }
 0x38e   :  { %v8996_v55 = vpop.f32.mrf.mxu0  ;;  %9260 = vmatprep.subr.bf16.mxu0 %v10069_v26  ;;  %9278 = vmatprep.subr.bf16.mxu1 %v10069_v26 }
 0x38f   :  { %9274 = vmatprep.mubr.msk.bf16.mxu0 %vm10071_vm1, %v10069_v26 }
 0x390   :  { %v3385_v57 = vpop.f32.mrf.mxu0  ;;  %v11645_v58 = vpop.f32.mrf.mxu1  ;;  %9255 = vmatmul.mubr.bf16.vlgmr.msra.gmra.mxu1 %v4973_v56 }
 0x391   :  { %9261 = vmatpush3.bf16.msra.mxu0 %v9870_v53  ;;  %9279 = vmatpush3.bf16.msra.mxu1 %v9871_v54  ;;  %v3476_v33 = vadd.f32 %v11645_v58, %v11633_v52  ;;  %v2740_v54 = vld [vmem:[#allocation3] sm:$0x1]  ;;  %v9913_v52 = vld [vmem:[%s12426_s3 + $0xd8] sm:$0xff]  }
 0x392   :  { %v8997_v61 = vpop.f32.mrf.mxu0  ;;  %v9016_v62 = vpop.f32.mrf.mxu1  ;;  %9262 = vmatprep.subr.bf16.mxu0 %v10069_v26  ;;  %9280 = vmatprep.subr.bf16.mxu1 %v10069_v26 }
 0x393   :  { %9294 = vmatprep.mubr.msk.bf16.mxu1 %vm10071_vm1, %v10069_v26  ;;  %v9892_v61 = vld [vmem:[%s12426_s3 + $0x60] sm:$0xff]  }
 0x394   :  { %v3478_v63 = vpop.f32.mrf.mxu1 }
 0x395   :  { %9263 = vmatpush3.bf16.msra.mxu0 %v9872_v59  ;;  %9281 = vmatpush3.bf16.msra.mxu1 %v9873_v60  ;;  %v2743_v59 = vld [vmem:[#allocation3 + $0x4] sm:$0x1] }
 0x396   :  { %v9017_v2 = vpop.f32.mrf.mxu1  ;;  %9264 = vmatprep.subr.bf16.mxu0 %v10069_v26  ;;  %9282 = vmatprep.subr.bf16.mxu1 %v10069_v26 }
 0x397   :  { %v9894_v2 = vld [vmem:[%s12426_s3 + $0x58] sm:$0xff]  }
 0x399   :  { %9265 = vmatpush3.bf16.msra.mxu0 %v9874_v0  ;;  %9283 = vmatpush3.bf16.msra.mxu1 %v9875_v1 }
 0x39a   :  { %9266 = vmatprep.subr.bf16.mxu0 %v10069_v26  ;;  %9284 = vmatprep.subr.bf16.mxu1 %v10069_v26 }
 0x39d   :  { %9267 = vmatpush3.bf16.msra.mxu0 %v9876_v3  ;;  %9285 = vmatpush3.bf16.msra.mxu1 %v9877_v4  ;;  %v9895_v3 = vld [vmem:[%s12426_s3 + $0x20] sm:$0xff]  }
 0x39e   :  { %9268 = vmatprep.subr.bf16.mxu0 %v10069_v26  ;;  %9286 = vmatprep.subr.bf16.mxu1 %v10069_v26 }
 0x3a1   :  { %9269 = vmatpush3.bf16.msra.mxu0 %v9878_v6  ;;  %9287 = vmatpush3.bf16.msra.mxu1 %v9879_v7  ;;  %v9896_v7 = vld [vmem:[%s12426_s3 + $0x50] sm:$0xff]  }
 0x3a2   :  { %9270 = vmatprep.subr.bf16.mxu0 %v10069_v26  ;;  %9288 = vmatprep.subr.bf16.mxu1 %v10069_v26 }
 0x3a5   :  { %9271 = vmatpush3.bf16.msra.mxu0 %v9880_v11  ;;  %9289 = vmatpush3.bf16.msra.mxu1 %v9881_v12 }
 0x3a6   :  { %9272 = vmatprep.subr.bf16.mxu0 %v10069_v26  ;;  %9290 = vmatprep.subr.bf16.mxu1 %v10069_v26 }
 0x3a9   :  { %9273 = vmatpush3.bf16.msra.mxu0 %v9882_v18  ;;  %9291 = vmatpush3.bf16.msra.mxu1 %v9883_v19  ;;  %v9898_v18 = vld [vmem:[%s12426_s3 + $0x48] sm:$0xff]   ;;  %v9899_v19 = vld [vmem:[%s12426_s3 + $0x10] sm:$0xff]  }
 0x3aa   :  { %9292 = vmatprep.subr.bf16.mxu1 %v10069_v26  ;;  %9298 = vmatprep.subr.bf16.mxu0 %v10069_v26 }
 0x3ac   :  { %v3594_v32 = vpop.f32.mrf.mxu0  ;;  %9275 = vmatmul.mubr.bf16.vlgmr.msra.gmra.mxu0 %v5092_v29  ;;  %v9903_v29 = vld [vmem:[%s12426_s3 + $0xb8] sm:$0xff]  }
 0x3ad   :  { %9293 = vmatpush3.bf16.msra.mxu1 %v9886_v25  ;;  %9299 = vmatpush3.bf16.msra.mxu0 %v9887_v27  ;;  %v3600_v41 = vadd.f32 %v3594_v32, %v3476_v33  ;;  %v9900_v25 = vld [vmem:[%s12426_s3 + $0x40] sm:$0xff]   ;;  %v9901_v27 = vld [vmem:[%s12426_s3 + $0x8] sm:$0xff]   ;;  %v9904_v33 = vld [vmem:[%s12426_s3 + $0xb0] sm:$0xff]  }
 0x3ae   :  { %v9036_v38 = vpop.f32.mrf.mxu0  ;;  %9300 = vmatprep.subr.bf16.mxu0 %v10069_v26  ;;  %9318 = vmatprep.subr.bf16.mxu1 %v10069_v26 }
 0x3af   :  { %9314 = vmatprep.mubr.msk.bf16.mxu0 %vm10071_vm1, %v10069_v26 }
 0x3b0   :  { %v3597_v43 = vpop.f32.mrf.mxu0  ;;  %v3704_v44 = vpop.f32.mrf.mxu1  ;;  %9295 = vmatmul.mubr.bf16.vlgmr.msra.gmra.mxu1 %v5202_v39  ;;  %v9906_v39 = vld [vmem:[%s12426_s3 + $0xa8] sm:$0xff]  }
 0x3b1   :  { %v3710_v46 = vadd.f32 %v3704_v44, %v3600_v41  ;;  %9301 = vmatpush3.bf16.msra.mxu0 %v9888_v35  ;;  %9319 = vmatpush3.bf16.msra.mxu1 %v9889_v37  ;;  %v9905_v35 = vld [vmem:[%s12426_s3 + $0xf8] sm:$0xff]   ;;  %v9907_v41 = vld [vmem:[%s12426_s3 + $0xf0] sm:$0xff]  }
 0x3b2   :  { %v9037_v50 = vpop.f32.mrf.mxu0  ;;  %v9056_v51 = vpop.f32.mrf.mxu1  ;;  %9302 = vmatprep.subr.bf16.mxu0 %v10069_v26  ;;  %9320 = vmatprep.subr.bf16.mxu1 %v10069_v26 }
 0x3b3   :  { %v3718_v53 = vadd.f32 %v11412_v36, %v3710_v46  ;;  %9334 = vmatprep.mubr.msk.bf16.mxu1 %vm10071_vm1, %v10069_v26  ;;  %v9893_v36 = vld [vmem:[%s12426_s3 + $0x28] sm:$0xff]   ;;  %v9911_v50 = vld [vmem:[%s12426_s3 + $0xe0] sm:$0xff]   ;;  %v9912_v51 = vld [vmem:[%s12426_s3 + $0x90] sm:$0xff]  }
 0x3b4   :  { %v2733_v55 = vpop.permute.xlu0 %2732  ;;  %v3707_v56 = vpop.f32.mrf.mxu1  ;;  %v9909_v46 = vld [vmem:[%s12426_s3 + $0xe8] sm:$0xff]  }
 0x3b5   :  { %v3719_v57 = vmax.f32 %v3718_v53, 0.0  ;;  %v2741_v58 = vsel %vm11743_vm11, %v2733_v55, %v2740_v54  ;;  %9303 = vmatpush3.bf16.msra.mxu0 %v9890_v47  ;;  %9321 = vmatpush3.bf16.msra.mxu1 %v9891_v48  ;;  %v2735_v60 = vpop.permute.xlu1 %2734  ;;  %v9910_v48 = vld [vmem:[%s12426_s3 + $0x98] sm:$0xff]   ;;  %v9914_v53 = vld [vmem:[%s12426_s3 + $0x88] sm:$0xff]   ;;  %v9915_v54 = vld [vmem:[%s12426_s3 + $0xd0] sm:$0xff]  }
 0x3b6   :  { %2742 = vst [vmem:[#allocation3] sm:$0x1] %v2741_v58  ;;  %v2744_v62 = vsel %vm11743_vm11, %v2735_v60, %v2743_v59  ;;  %v9057_v63 = vpop.f32.mrf.mxu1  ;;  %9304 = vmatprep.subr.bf16.mxu0 %v10069_v26  ;;  %9322 = vmatprep.subr.bf16.mxu1 %v10069_v26  ;;  %v9916_v55 = vld [vmem:[%s12426_s3 + $0x80] sm:$0xff]   ;;  %v9917_v56 = vld [vmem:[%s12426_s3 + $0xc8] sm:$0xff]   ;;  %v9919_v58 = vld [vmem:[%s12426_s3 + $0x78] sm:$0xff]   ;;  %v5643_v59 = vsel %vm2244_vm6, %v11706_v24, %v11716_v30 }
 0x3b7   :  { %v3720_v0 = vpack.c.bf16 %v3719_v57, %v3719_v57  ;;  %2745 = vst [vmem:[#allocation3 + $0x4] sm:$0x1] %v2744_v62  ;;  %v9918_v57 = vld [vmem:[%s12426_s3 + $0xc0] sm:$0xff]   ;;  %v9921_v62 = vld [vmem:[%s12426_s3 + $0x38] sm:$0xff]   ;;  %v5762_v24 = vsel %vm2244_vm6, %v11729_v40, %v11733_v45  ;;  %v9923_v40 = vld [vmem:[%s12426_s3 + $0x30] sm:$0xff]  }
 0x3b9   :  { %v3728_v1 = vrot.slane %v3720_v0, %v10983_v34  ;;  %9305 = vmatpush3.bf16.msra.mxu0 %v9892_v61  ;;  %9323 = vmatpush3.bf16.msra.mxu1 %v9893_v36  ;;  %v9920_v36 = vld [vmem:[%s12426_s3 + $0x70] sm:$0xff]  }
 0x3ba   :  { %9306 = vmatprep.subr.bf16.mxu0 %v10069_v26  ;;  %9324 = vmatprep.subr.bf16.mxu1 %v10069_v26 }
 0x3bb   :  { %v3735_v4 = vrot.slane %v3728_v1, %v10983_v34 }
 0x3bd   :  { %v3737_v5 = vunpack.i.h.s16 %v3735_v4  ;;  %v7885_v6 = vpack.i.b16 %v3735_v4, %v3735_v4  ;;  %9307 = vmatpush3.bf16.msra.mxu0 %v9894_v2  ;;  %9325 = vmatpush3.bf16.msra.mxu1 %v9895_v3  ;;  %v3758_v13 = vld [vmem:[#allocation3] sm:$0x1]  ;;  %v11914_v2 = vld [vmem:[%s12427_s4] ss:$0 sm:$0xff]  ;;  %v9922_v4 = vld [vmem:[%s12426_s3 + $0x68] sm:$0xff]  }
 0x3be   :  { %9308 = vmatprep.subr.bf16.mxu0 %v10069_v26  ;;  %9326 = vmatprep.subr.bf16.mxu1 %v10069_v26  ;;  %v3761_v21 = vld [vmem:[#allocation3 + $0x4] sm:$0x1] }
 0x3bf   :  { %v3739_v11 = vpack.i.b16 %v3737_v5, %v3737_v5  ;;  %v3746_v12 = vrot.slane %v7885_v6, %v10998_v42 }
 0x3c1   :  { %v3753_v15 = vrot.slane %v3739_v11, %v10998_v42  ;;  %9309 = vmatpush3.bf16.msra.mxu0 %v9896_v7  ;;  %9327 = vmatpush3.bf16.msra.mxu1 %v9897_v8  ;;  %v3759_v20 = vsel %vm11784_vm13, %v3746_v12, %v3758_v13  ;;  %v9924_v11 = vld [vmem:[%s12426_s3 + $0x60] sm:$0xff]   ;;  %v9925_v12 = vld [vmem:[%s12426_s3 + $0x28] sm:$0xff]  }
 0x3c2   :  { %9310 = vmatprep.subr.bf16.mxu0 %v10069_v26  ;;  %9328 = vmatprep.subr.bf16.mxu1 %v10069_v26  ;;  %3760 = vst [vmem:[#allocation3] sm:$0x1] %v3759_v20  ;;  %v9927_v20 = vld [vmem:[%s12426_s3 + $0x20] sm:$0xff]  }
 0x3c3   :  { %v3762_v23 = vsel %vm11784_vm13, %v3753_v15, %v3761_v21 }
 0x3c4   :  { %3763 = vst [vmem:[#allocation3 + $0x4] sm:$0x1] %v3762_v23  ;;  %v9935_v23 = vld [vmem:[#allocation2 + $0xc] ss:$0 sps:$4 sm:$0x44]  }
 0x3c5   :  { %9311 = vmatpush3.bf16.msra.mxu0 %v9898_v18  ;;  %9329 = vmatpush3.bf16.msra.mxu1 %v9899_v19  ;;  %v9926_v19 = vld [vmem:[%s12426_s3 + $0x58] sm:$0xff]  }
 0x3c6   :  { %9312 = vmatprep.subr.bf16.mxu0 %v10069_v26  ;;  %9330 = vmatprep.subr.bf16.mxu1 %v10069_v26 }
 0x3c9   :  { %9313 = vmatpush3.bf16.msra.mxu0 %v9900_v25  ;;  %9331 = vmatpush3.bf16.msra.mxu1 %v9901_v27  ;;  %v9928_v25 = vld [vmem:[%s12426_s3 + $0x50] sm:$0xff]   ;;  %v9929_v27 = vld [vmem:[%s12426_s3 + $0x18] sm:$0xff]  }
 0x3ca   :  { %9332 = vmatprep.subr.bf16.mxu1 %v10069_v26  ;;  %9338 = vmatprep.subr.bf16.mxu0 %v10069_v26 }
 0x3cc   :  { %v11821_v32 = vpop.f32.mrf.mxu0  ;;  %9315 = vmatmul.mubr.bf16.vlgmr.msra.gmra.mxu0 %v5407_v31  ;;  %v9934_v31 = vld [vmem:[#allocation2 + $0x4] ss:$0 sps:$4 sm:$0x44]  }
 0x3cd   :  { %9333 = vmatpush3.bf16.msra.mxu1 %v9902_v28  ;;  %9339 = vmatpush3.bf16.msra.mxu0 %v9903_v29 }
 0x3ce   :  { %v9076_v37 = vpop.f32.mrf.mxu0  ;;  %9340 = vmatprep.subr.bf16.mxu0 %v10069_v26  ;;  %9358 = vmatprep.subr.bf16.mxu1 %v10069_v26 }
 0x3cf   :  { %9354 = vmatprep.mubr.msk.bf16.mxu0 %vm10071_vm1, %v10069_v26 }
 0x3d0   :  { %v3911_v9 = vpop.f32.mrf.mxu0  ;;  %v4010_v38 = vpop.f32.mrf.mxu1  ;;  %9335 = vmatmul.mubr.bf16.vlgmr.msra.gmra.mxu1 %v5509_v17  ;;  %v9930_v17 = vld [vmem:[%s12426_s3 + $0x48] sm:$0xff]  }
 0x3d1   :  { %9341 = vmatpush3.bf16.msra.mxu0 %v9904_v33  ;;  %9359 = vmatpush3.bf16.msra.mxu1 %v9905_v35  ;;  %v4011_v61 = vadd.f32 %v4010_v38, %v11821_v32  ;;  %v5951_v35 = vunpack.c.l.b16 %v9935_v23  ;;  %v9931_v9 = vld [vmem:[%s12426_s3 + $0x10] sm:$0xff]   ;;  %v5950_v38 = vunpack.c.l.b16 %v9934_v31  ;;  %v9955_v23 = vld [vmem:[%s12428_s5 + $0x98] sm:$0xff]  }
 0x3d2   :  { %v9077_v43 = vpop.f32.mrf.mxu0  ;;  %v9096_v44 = vpop.f32.mrf.mxu1  ;;  %9342 = vmatprep.subr.bf16.mxu0 %v10069_v26  ;;  %9360 = vmatprep.subr.bf16.mxu1 %v10069_v26 }
 0x3d3   :  { %9374 = vmatprep.mubr.msk.bf16.mxu1 %vm10071_vm1, %v10069_v26  ;;  %v9933_v43 = vld [vmem:[%s12426_s3 + $0x8] sm:$0xff]   ;;  %v5952_v44 = vrot.slane %v5950_v38, 5 }
 0x3d4   :  { %v4013_v14 = vpop.f32.mrf.mxu1 }
 0x3d5   :  { %9343 = vmatpush3.bf16.msra.mxu0 %v9906_v39  ;;  %9361 = vmatpush3.bf16.msra.mxu1 %v9907_v41  ;;  %v5953_v39 = vrot.slane %v5951_v35, 4  ;;  %v9932_v41 = vld [vmem:[%s12426_s3 + $0x40] sm:$0xff]  }
 0x3d6   :  { %v9097_v47 = vpop.f32.mrf.mxu1  ;;  %9344 = vmatprep.subr.bf16.mxu0 %v10069_v26  ;;  %9362 = vmatprep.subr.bf16.mxu1 %v10069_v26 }
 0x3d7   :  { %v5954_v14 = vsel %vm1718_vm5, %v5953_v39, %v5952_v44  ;;  %v9937_v47 = vld [vmem:[%s12426_s3 + $0xb8] sm:$0xff]   ;;  %v9958_v39 = vld [vmem:[%s12428_s5 + $0x30] sm:$0xff]  }
 0x3d9   :  { %9345 = vmatpush3.bf16.msra.mxu0 %v9908_v16  ;;  %9363 = vmatpush3.bf16.msra.mxu1 %v9909_v46  ;;  %v6046_v16 = vrot.slane %v5951_v35, 3  ;;  %v9936_v46 = vld [vmem:[%s12426_s3] sm:$0xff]  }
 0x3da   :  { %9346 = vmatprep.subr.bf16.mxu0 %v10069_v26  ;;  %9364 = vmatprep.subr.bf16.mxu1 %v10069_v26 }
 0x3dd   :  { %9347 = vmatpush3.bf16.msra.mxu0 %v9910_v48  ;;  %9365 = vmatpush3.bf16.msra.mxu1 %v9911_v50  ;;  %v6045_v48 = vrot.slane %v5950_v38, 4  ;;  %v5955_v50 = vpack.c.b16 %v5954_v14, %v5954_v14 }
 0x3de   :  { %9348 = vmatprep.subr.bf16.mxu0 %v10069_v26  ;;  %9366 = vmatprep.subr.bf16.mxu1 %v10069_v26 }
 0x3e1   :  { %9349 = vmatpush3.bf16.msra.mxu0 %v9912_v51  ;;  %9367 = vmatpush3.bf16.msra.mxu1 %v9913_v52  ;;  %v6047_v51 = vsel %vm1718_vm5, %v6046_v16, %v6045_v48  ;;  %v9961_v48 = vld [vmem:[%s12428_s5 + $0x80] sm:$0xff]  }
 0x3e2   :  { %9350 = vmatprep.subr.bf16.mxu0 %v10069_v26  ;;  %9368 = vmatprep.subr.bf16.mxu1 %v10069_v26 }
 0x3e5   :  { %9351 = vmatpush3.bf16.msra.mxu0 %v9914_v53  ;;  %9369 = vmatpush3.bf16.msra.mxu1 %v9915_v54  ;;  %v9938_v53 = vld [vmem:[%s12426_s3 + $0xb0] sm:$0xff]   ;;  %v9939_v54 = vld [vmem:[%s12426_s3 + $0xf8] sm:$0xff]  }
 0x3e6   :  { %9352 = vmatprep.subr.bf16.mxu0 %v10069_v26  ;;  %9370 = vmatprep.subr.bf16.mxu1 %v10069_v26 }
 0x3e9   :  { %9353 = vmatpush3.bf16.msra.mxu0 %v9916_v55  ;;  %9371 = vmatpush3.bf16.msra.mxu1 %v9917_v56  ;;  %v6048_v56 = vpack.c.b16 %v6047_v51, %v6047_v51 }
 0x3ea   :  { %9372 = vmatprep.subr.bf16.mxu1 %v10069_v26  ;;  %9378 = vmatprep.subr.bf16.mxu0 %v10069_v26 }
 0x3ec   :  { %v4144_v60 = vpop.f32.mrf.mxu0  ;;  %9355 = vmatmul.mubr.bf16.vlgmr.msra.gmra.mxu0 %v5643_v59  ;;  %v9940_v59 = vld [vmem:[%s12426_s3 + $0xa8] sm:$0xff]  }
 0x3ed   :  { %9373 = vmatpush3.bf16.msra.mxu1 %v9918_v57  ;;  %9379 = vmatpush3.bf16.msra.mxu0 %v9919_v58  ;;  %v4150_v30 = vadd.f32 %v4144_v60, %v4011_v61  ;;  %v9941_v60 = vld [vmem:[%s12426_s3 + $0xf0] sm:$0xff]  }
 0x3ee   :  { %v9116_v63 = vpop.f32.mrf.mxu0  ;;  %9380 = vmatprep.subr.bf16.mxu0 %v10069_v26  ;;  %9398 = vmatprep.subr.bf16.mxu1 %v10069_v26 }
 0x3ef   :  { %9394 = vmatprep.mubr.msk.bf16.mxu0 %vm10071_vm1, %v10069_v26  ;;  %v9942_v63 = vld [vmem:[%s12426_s3 + $0xa0] sm:$0xff]  }
 0x3f0   :  { %v4147_v0 = vpop.f32.mrf.mxu0  ;;  %v4263_v1 = vpop.f32.mrf.mxu1  ;;  %9375 = vmatmul.mubr.bf16.vlgmr.msra.gmra.mxu1 %v5762_v24  ;;  %v9943_v24 = vld [vmem:[%s12426_s3 + $0xe8] sm:$0xff]  }
 0x3f1   :  { %v4269_v3 = vadd.f32 %v4263_v1, %v4150_v30  ;;  %9381 = vmatpush3.bf16.msra.mxu0 %v9920_v36  ;;  %9399 = vmatpush3.bf16.msra.mxu1 %v9921_v62  ;;  %v9944_v0 = vld [vmem:[%s12426_s3 + $0x98] sm:$0xff]   ;;  %v9945_v1 = vld [vmem:[%s12426_s3 + $0xe0] sm:$0xff]  }
 0x3f2   :  { %v9117_v45 = vpop.f32.mrf.mxu0  ;;  %v9136_v5 = vpop.f32.mrf.mxu1  ;;  %9382 = vmatprep.subr.bf16.mxu0 %v10069_v26  ;;  %9400 = vmatprep.subr.bf16.mxu1 %v10069_v26 }
 0x3f3   :  { %v4277_v6 = vadd.f32 %v11914_v2, %v4269_v3  ;;  %9414 = vmatprep.mubr.msk.bf16.mxu1 %vm10071_vm1, %v10069_v26  ;;  %v9953_v3 = vld [vmem:[#allocation2 + $0xc] ss:$0 sps:$4 sm:$0x88]   ;;  %v9952_v45 = vld [vmem:[#allocation2 + $0x4] ss:$0 sps:$4 sm:$0x88]  }
 0x3f4   :  { %v4266_v7 = vpop.f32.mrf.mxu1  ;;  %v6163_v5 = vunpack.c.l.b16 %v9953_v3  ;;  %v9968_v3 = vld [vmem:[%s12428_s5 + $0x8] sm:$0xff]  }
 0x3f5   :  { %v4278_v8 = vmax.f32 %v4277_v6, 0.0  ;;  %9383 = vmatpush3.bf16.msra.mxu0 %v9922_v4  ;;  %9401 = vmatpush3.bf16.msra.mxu1 %v9923_v40  ;;  %v9946_v4 = vld [vmem:[%s12426_s3 + $0x90] sm:$0xff]   ;;  %v9947_v40 = vld [vmem:[%s12426_s3 + $0xd8] sm:$0xff]   ;;  %v9948_v6 = vld [vmem:[%s12426_s3 + $0x88] sm:$0xff]  }
 0x3f6   :  { %v9137_v13 = vpop.f32.mrf.mxu1  ;;  %9384 = vmatprep.subr.bf16.mxu0 %v10069_v26  ;;  %9402 = vmatprep.subr.bf16.mxu1 %v10069_v26  ;;  %v9949_v7 = vld [vmem:[%s12426_s3 + $0xd0] sm:$0xff]  }
 0x3f7   :  { %v4279_v15 = vpack.c.bf16 %v4278_v8, %v4278_v8  ;;  %v6162_v8 = vunpack.c.l.b16 %v9952_v45  ;;  %v9951_v13 = vld [vmem:[%s12426_s3 + $0xc8] sm:$0xff]  }
 0x3f9   :  { %v4287_v18 = vrot.slane %v4279_v15, %v10983_v34  ;;  %9385 = vmatpush3.bf16.msra.mxu0 %v9924_v11  ;;  %9403 = vmatpush3.bf16.msra.mxu1 %v9925_v12  ;;  %v6165_v11 = vrot.slane %v6163_v5, 5  ;;  %v9950_v12 = vld [vmem:[%s12426_s3 + $0x80] sm:$0xff]   ;;  %v6164_v15 = vrot.slane %v6162_v8, 6 }
 0x3fa   :  { %9386 = vmatprep.subr.bf16.mxu0 %v10069_v26  ;;  %9404 = vmatprep.subr.bf16.mxu1 %v10069_v26 }
 0x3fb   :  { %v4294_v21 = vrot.slane %v4287_v18, %v10983_v34  ;;  %v6166_v18 = vsel %vm1718_vm5, %v6165_v11, %v6164_v15 }
 0x3fd   :  { %9387 = vmatpush3.bf16.msra.mxu0 %v9926_v19  ;;  %9405 = vmatpush3.bf16.msra.mxu1 %v9927_v20  ;;  %v7927_v28 = vpack.i.b16 %v4294_v21, %v4294_v21  ;;  %v4296_v29 = vunpack.i.h.s16 %v4294_v21  ;;  %v6275_v19 = vrot.slane %v6163_v5, 6  ;;  %v9954_v20 = vld [vmem:[%s12426_s3 + $0xc0] sm:$0xff]   ;;  %v6274_v21 = vrot.slane %v6162_v8, 7  ;;  %v9972_v5 = vld [vmem:[%s12428_s5 + $0x58] sm:$0xff]  }
 0x3fe   :  { %9388 = vmatprep.subr.bf16.mxu0 %v10069_v26  ;;  %9406 = vmatprep.subr.bf16.mxu1 %v10069_v26 }
 0x3ff   :  { %v4305_v32 = vrot.slane %v7927_v28, %v10998_v42  ;;  %v4298_v33 = vpack.i.b16 %v4296_v29, %v4296_v29  ;;  %v6276_v28 = vsel %vm1718_vm5, %v6275_v19, %v6274_v21  ;;  %v9977_v21 = vld [vmem:[%s12428_s5 + $0xa0] sm:$0xff]  }
 0x400   :  { %v6277_v35 = vpack.c.b16 %v6276_v28, %v6276_v28 }
 0x401   :  { %9389 = vmatpush3.bf16.msra.mxu0 %v9928_v25  ;;  %9407 = vmatpush3.bf16.msra.mxu1 %v9929_v27  ;;  %v4312_v37 = vrot.slane %v4298_v33, %v10998_v42  ;;  %v6167_v25 = vpack.c.b16 %v6166_v18, %v6166_v18  ;;  %v10076_v27 = vmov 0  }
 0x402   :  { %4313 = vrot.lane.b32.xlu0 %v4305_v32, %s10072_s26  ;;  %9390 = vmatprep.subr.bf16.mxu0 %v10069_v26  ;;  %v9956_v32 = vld [vmem:[%s12428_s5 + $0x38] sm:$0xff]  }
 0x403   :  { %4315 = vrot.lane.b32.xlu1 %v4312_v37, %s10072_s26  ;;  %9408 = vmatprep.subr.bf16.mxu1 %v10069_v26 }
 0x405   :  { %9391 = vmatpush3.bf16.msra.mxu0 %v9930_v17  ;;  %9409 = vmatpush3.bf16.msra.mxu1 %v9931_v9 }
 0x406   :  { %9392 = vmatprep.subr.bf16.mxu0 %v10069_v26  ;;  %9410 = vmatprep.subr.bf16.mxu1 %v10069_v26 }
 0x409   :  { %9393 = vmatpush3.bf16.msra.mxu0 %v9932_v41  ;;  %9411 = vmatpush3.bf16.msra.mxu1 %v9933_v43  ;;  %v9959_v41 = vld [vmem:[%s12428_s5 + $0x88] sm:$0xff]  }
 0x40a   :  { %9412 = vmatprep.subr.bf16.mxu1 %v10069_v26  ;;  %9418 = vmatprep.subr.bf16.mxu0 %v10069_v26 }
 0x40c   :  { %v11983_v52 = vpop.f32.mrf.mxu0  ;;  %9395 = vmatmul.mubr.bf16.vlgmr.msra.gmra.mxu0 %v5955_v50 }
 0x40d   :  { %9413 = vmatpush3.bf16.msra.mxu1 %v9936_v46  ;;  %9419 = vmatpush3.bf16.msra.mxu0 %v9937_v47  ;;  %v9960_v47 = vld [vmem:[%s12428_s5 + $0x28] sm:$0xff]  }
 0x40e   :  { %v9156_v55 = vpop.f32.mrf.mxu0  ;;  %9420 = vmatprep.subr.bf16.mxu0 %v10069_v26  ;;  %9438 = vmatprep.subr.bf16.mxu1 %v10069_v26 }
 0x40f   :  { %9434 = vmatprep.mubr.msk.bf16.mxu0 %vm10071_vm1, %v10069_v26 }
 0x410   :  { %v4458_v57 = vpop.f32.mrf.mxu0  ;;  %v11995_v58 = vpop.f32.mrf.mxu1  ;;  %9415 = vmatmul.mubr.bf16.vlgmr.msra.gmra.mxu1 %v6048_v56 }
 0x411   :  { %9421 = vmatpush3.bf16.msra.mxu0 %v9938_v53  ;;  %9439 = vmatpush3.bf16.msra.mxu1 %v9939_v54  ;;  %v4549_v31 = vadd.f32 %v11995_v58, %v11983_v52  ;;  %v9962_v53 = vld [vmem:[%s12428_s5 + $0x20] sm:$0xff]   ;;  %v9963_v54 = vld [vmem:[%s12428_s5 + $0x78] sm:$0xff]  }
 0x412   :  { %v9157_v61 = vpop.f32.mrf.mxu0  ;;  %v9176_v36 = vpop.f32.mrf.mxu1  ;;  %9422 = vmatprep.subr.bf16.mxu0 %v10069_v26  ;;  %9440 = vmatprep.subr.bf16.mxu1 %v10069_v26  ;;  %v9964_v58 = vld [vmem:[%s12428_s5 + $0x18] sm:$0xff]  }
 0x413   :  { %9454 = vmatprep.mubr.msk.bf16.mxu1 %vm10071_vm1, %v10069_v26  ;;  %v4829_v36 = vld [vmem:[#allocation3 + $0x2] sm:$0x1]  ;;  %vm12167_vm1 = vmand %vm5338_vm15, %vm5339_vm0 }
 0x414   :  { %v4551_v62 = vpop.f32.mrf.mxu1 }
 0x415   :  { %9423 = vmatpush3.bf16.msra.mxu0 %v9940_v59  ;;  %9441 = vmatpush3.bf16.msra.mxu1 %v9941_v60  ;;  %v9965_v59 = vld [vmem:[%s12428_s5 + $0x70] sm:$0xff]  }
 0x416   :  { %v9177_v30 = vpop.f32.mrf.mxu1  ;;  %9424 = vmatprep.subr.bf16.mxu0 %v10069_v26  ;;  %9442 = vmatprep.subr.bf16.mxu1 %v10069_v26 }
 0x419   :  { %9425 = vmatpush3.bf16.msra.mxu0 %v9942_v63  ;;  %9443 = vmatpush3.bf16.msra.mxu1 %v9943_v24  ;;  %v9966_v63 = vld [vmem:[%s12428_s5 + $0x10] sm:$0xff]   ;;  %v9967_v24 = vld [vmem:[%s12428_s5 + $0x68] sm:$0xff]  }
 0x41a   :  { %9426 = vmatprep.subr.bf16.mxu0 %v10069_v26  ;;  %9444 = vmatprep.subr.bf16.mxu1 %v10069_v26 }
 0x41d   :  { %9427 = vmatpush3.bf16.msra.mxu0 %v9944_v0  ;;  %9445 = vmatpush3.bf16.msra.mxu1 %v9945_v1  ;;  %v4832_v0 = vld [vmem:[#allocation3 + $0x6] sm:$0x1] }
 0x41e   :  { %9428 = vmatprep.subr.bf16.mxu0 %v10069_v26  ;;  %9446 = vmatprep.subr.bf16.mxu1 %v10069_v26 }
 0x421   :  { %9429 = vmatpush3.bf16.msra.mxu0 %v9946_v4  ;;  %9447 = vmatpush3.bf16.msra.mxu1 %v9947_v40  ;;  %v9969_v4 = vld [vmem:[%s12428_s5 + $0x60] sm:$0xff]   ;;  %v9971_v40 = vld [vmem:[%s12428_s5 + $0xb8] sm:$0xff]  }
 0x422   :  { %9430 = vmatprep.subr.bf16.mxu0 %v10069_v26  ;;  %9448 = vmatprep.subr.bf16.mxu1 %v10069_v26 }
 0x425   :  { %9431 = vmatpush3.bf16.msra.mxu0 %v9948_v6  ;;  %9449 = vmatpush3.bf16.msra.mxu1 %v9949_v7  ;;  %v9973_v6 = vld [vmem:[%s12428_s5 + $0xb0] sm:$0xff]  }
 0x426   :  { %9432 = vmatprep.subr.bf16.mxu0 %v10069_v26  ;;  %9450 = vmatprep.subr.bf16.mxu1 %v10069_v26 }
 0x429   :  { %9433 = vmatpush3.bf16.msra.mxu0 %v9950_v12  ;;  %9451 = vmatpush3.bf16.msra.mxu1 %v9951_v13  ;;  %v9974_v12 = vld [vmem:[%s12428_s5 + $0x50] sm:$0xff]   ;;  %v9975_v13 = vld [vmem:[%s12428_s5 + $0xa8] sm:$0xff]  }
 0x42a   :  { %9452 = vmatprep.subr.bf16.mxu1 %v10069_v26  ;;  %6574 = vmatprep.subr.bf16.mxu0 %v10076_v27  ;;  %v9957_v26 = vld [vmem:[%s12428_s5 + $0x90] sm:$0xff]  }
 0x42c   :  { %v4667_v29 = vpop.f32.mrf.mxu0  ;;  %9435 = vmatmul.mubr.bf16.vlgmr.msra.gmra.mxu0 %v6167_v25  ;;  %v9978_v25 = vld [vmem:[%s12428_s5 + $0x40] sm:$0xff]  }
 0x42d   :  { %9453 = vmatpush3.bf16.msra.mxu1 %v9954_v20  ;;  %6575 = vmatpush1.bf16.msra.mxu0 %v9955_v23  ;;  %v4673_v37 = vadd.f32 %v4667_v29, %v4549_v31  ;;  %v9976_v20 = vld [vmem:[%s12428_s5 + $0x48] sm:$0xff]  }
 0x42e   :  { %v9196_v33 = vpop.f32.mrf.mxu0  ;;  %6696 = vmatprep.subr.bf16.mxu1 %v10076_v27  ;;  %6576 = vmatprep.subr.bf16.mxu0 %v10076_v27 }
 0x430   :  { %v4670_v17 = vpop.f32.mrf.mxu0  ;;  %v4777_v9 = vpop.f32.mrf.mxu1  ;;  %9455 = vmatmul.mubr.bf16.vlgmr.msra.gmra.mxu1 %v6277_v35 }
 0x431   :  { %v4783_v38 = vadd.f32 %v4777_v9, %v4673_v37  ;;  %6697 = vmatpush1.bf16.msra.mxu1 %v9956_v32  ;;  %6577 = vmatpush1.bf16.msra.mxu0 %v9957_v26 }
 0x432   :  { %v9197_v43 = vpop.f32.mrf.mxu0  ;;  %v9216_v44 = vpop.f32.mrf.mxu1  ;;  %6698 = vmatprep.subr.bf16.mxu1 %v10076_v27  ;;  %6578 = vmatprep.subr.bf16.mxu0 %v10076_v27 }
 0x433   :  { %v4791_v14 = vadd.f32 %v11914_v2, %v4783_v38  ;;  %v4320_v38 = vld [vmem:[#allocation3] sm:$0x1] }
 0x434   :  { %v4780_v16 = vpop.f32.mrf.mxu1 }
 0x435   :  { %v4792_v46 = vmax.f32 %v4791_v14, 0.0  ;;  %6699 = vmatpush1.bf16.msra.mxu1 %v9958_v39  ;;  %6579 = vmatpush1.bf16.msra.mxu0 %v9959_v41  ;;  %v4323_v14 = vld [vmem:[#allocation3 + $0x4] sm:$0x1] }
 0x436   :  { %v9217_v50 = vpop.f32.mrf.mxu1  ;;  %6700 = vmatprep.subr.bf16.mxu1 %v10076_v27  ;;  %6580 = vmatprep.subr.bf16.mxu0 %v10076_v27 }
 0x437   :  { %v4793_v51 = vpack.c.bf16 %v4792_v46, %v4792_v46 }
 0x439   :  { %v4801_v52 = vrot.slane %v4793_v51, %v10983_v34  ;;  %6701 = vmatpush1.bf16.msra.mxu1 %v9960_v47  ;;  %6581 = vmatpush1.bf16.msra.mxu0 %v9961_v48 }
 0x43a   :  { %6702 = vmatprep.subr.bf16.mxu1 %v10076_v27  ;;  %6582 = vmatprep.subr.bf16.mxu0 %v10076_v27 }
 0x43b   :  { %v4808_v55 = vrot.slane %v4801_v52, %v10983_v34 }
 0x43d   :  { %v4810_v56 = vunpack.i.h.s16 %v4808_v55  ;;  %v7965_v57 = vpack.i.b16 %v4808_v55, %v4808_v55  ;;  %6703 = vmatpush1.bf16.msra.mxu1 %v9962_v53  ;;  %6583 = vmatpush1.bf16.msra.mxu0 %v9963_v54 }
 0x43e   :  { %6704 = vmatprep.subr.bf16.mxu1 %v10076_v27  ;;  %6584 = vmatprep.subr.bf16.mxu0 %v10076_v27 }
 0x43f   :  { %v4812_v60 = vpack.i.b16 %v4810_v56, %v4810_v56  ;;  %v4819_v61 = vrot.slane %v7965_v57, %v10998_v42 }
 0x441   :  { %v4826_v62 = vrot.slane %v4812_v60, %v10998_v42  ;;  %6705 = vmatpush1.bf16.msra.mxu1 %v9964_v58  ;;  %6585 = vmatpush1.bf16.msra.mxu0 %v9965_v59  ;;  %v4830_v30 = vsel %vm11784_vm13, %v4819_v61, %v4829_v36  ;;  %v5341_v59 = vld [vmem:[#allocation3] sm:$0x2] }
 0x442   :  { %6706 = vmatprep.subr.bf16.mxu1 %v10076_v27  ;;  %6586 = vmatprep.subr.bf16.mxu0 %v10076_v27  ;;  %4831 = vst [vmem:[#allocation3 + $0x2] sm:$0x1] %v4830_v30  ;;  %v5344_v30 = vld [vmem:[#allocation3 + $0x4] sm:$0x2] }
 0x443   :  { %v4833_v1 = vsel %vm11784_vm13, %v4826_v62, %v4832_v0 }
 0x444   :  { %4834 = vst [vmem:[#allocation3 + $0x6] sm:$0x1] %v4833_v1 }
 0x445   :  { %6707 = vmatpush1.bf16.msra.mxu1 %v9966_v63  ;;  %6587 = vmatpush1.bf16.msra.mxu0 %v9967_v24 }
 0x446   :  { %6708 = vmatprep.subr.bf16.mxu1 %v10076_v27  ;;  %6588 = vmatprep.subr.bf16.mxu0 %v10076_v27 }
 0x449   :  { %6709 = vmatpush1.bf16.msra.mxu1 %v9968_v3  ;;  %6589 = vmatpush1.bf16.msra.mxu0 %v9969_v4 }
 0x44a   :  { %6710 = vmatprep.subr.bf16.mxu1 %v10076_v27  ;;  %6598 = vmatprep.subr.bf16.mxu0 %v10076_v27 }
 0x44c   :  { %v4964_v45 = vpop.f32.mrf.mxu0 }
 0x44d   :  { %6711 = vmatpush1.bf16.msra.mxu1 %v9970_v10  ;;  %6599 = vmatpush2.bf16.msra.mxu0 %v9971_v40 }
 0x44e   :  { %v9236_v7 = vpop.f32.mrf.mxu0  ;;  %6720 = vmatprep.subr.bf16.mxu1 %v10076_v27  ;;  %6600 = vmatprep.subr.bf16.mxu0 %v10076_v27 }
 0x450   :  { %v4967_v8 = vpop.f32.mrf.mxu0  ;;  %v5057_v11 = vpop.f32.mrf.mxu1 }
 0x451   :  { %6721 = vmatpush2.bf16.msra.mxu1 %v9972_v5  ;;  %6601 = vmatpush2.bf16.msra.mxu0 %v9973_v6  ;;  %v5058_v29 = vadd.f32 %v5057_v11, %v4964_v45 }
 0x452   :  { %v9237_v15 = vpop.f32.mrf.mxu0  ;;  %v9256_v18 = vpop.f32.mrf.mxu1  ;;  %6722 = vmatprep.subr.bf16.mxu1 %v10076_v27  ;;  %6602 = vmatprep.subr.bf16.mxu0 %v10076_v27 }
 0x454   :  { %v5060_v19 = vpop.f32.mrf.mxu1 }
 0x455   :  { %6723 = vmatpush2.bf16.msra.mxu1 %v9974_v12  ;;  %6603 = vmatpush2.bf16.msra.mxu0 %v9975_v13  ;;  %v9979_v12 = vld [vmem:[%s12428_s5 + $0xf8] sm:$0xff]   ;;  %v9980_v19 = vld [vmem:[%s12428_s5 + $0xf0] sm:$0xff]  }
 0x456   :  { %v9257_v23 = vpop.f32.mrf.mxu1  ;;  %6724 = vmatprep.subr.bf16.mxu1 %v10076_v27  ;;  %6604 = vmatprep.subr.bf16.mxu0 %v10076_v27 }
 0x459   :  { %6725 = vmatpush2.bf16.msra.mxu1 %v9976_v20  ;;  %6605 = vmatpush2.bf16.msra.mxu0 %v9977_v21  ;;  %v9981_v21 = vld [vmem:[%s12428_s5 + $0xe8] sm:$0xff]  }
 0x45a   :  { %6726 = vmatprep.subr.bf16.mxu1 %v10076_v27  ;;  %6868 = vmatprep.subr.bf16.mxu0 %v10076_v27 }
 0x45d   :  { %6727 = vmatpush2.bf16.msra.mxu1 %v9978_v25 }
 0x46c   :  { %v5176_v28 = vpop.f32.mrf.mxu0 }
 0x46d   :  { %v5182_v32 = vadd.f32 %v5176_v28, %v5058_v29  ;;  %v9982_v29 = vld [vmem:[%s12428_s5 + $0xe0] sm:$0xff]  }
 0x46e   :  { %v9276_v31 = vpop.f32.mrf.mxu0 }
 0x470   :  { %v5179_v26 = vpop.f32.mrf.mxu0  ;;  %v5286_v33 = vpop.f32.mrf.mxu1 }
 0x471   :  { %v5292_v35 = vadd.f32 %v5286_v33, %v5182_v32  ;;  %v9983_v33 = vld [vmem:[%s12428_s5 + $0xd8] sm:$0xff]  }
 0x472   :  { %v9277_v37 = vpop.f32.mrf.mxu0  ;;  %v9296_v17 = vpop.f32.mrf.mxu1 }
 0x473   :  { %v5300_v9 = vadd.f32 %v11914_v2, %v5292_v35  ;;  %v9984_v37 = vld [vmem:[%s12428_s5 + $0xd0] sm:$0xff]   ;;  %v9985_v17 = vld [vmem:[%s12428_s5 + $0xc8] sm:$0xff]  }
 0x474   :  { %v4314_v39 = vpop.permute.xlu0 %4313  ;;  %v5289_v41 = vpop.f32.mrf.mxu1 }
 0x475   :  { %v5301_v43 = vmax.f32 %v5300_v9, 0.0  ;;  %v4321_v44 = vsel %vm4319_vm14, %v4314_v39, %v4320_v38  ;;  %v4316_v16 = vpop.permute.xlu1 %4315 }
 0x476   :  { %4322 = vst [vmem:[#allocation3] sm:$0x1] %v4321_v44  ;;  %v4324_v46 = vsel %vm4319_vm14, %v4316_v16, %v4323_v14  ;;  %v9297_v47 = vpop.f32.mrf.mxu1 }
 0x477   :  { %v5302_v48 = vpack.c.bf16 %v5301_v43, %v5301_v43  ;;  %4325 = vst [vmem:[#allocation3 + $0x4] sm:$0x1] %v4324_v46 }
 0x479   :  { %v5310_v50 = vrot.slane %v5302_v48, %v10983_v34 }
 0x47b   :  { %v5317_v51 = vrot.slane %v5310_v50, %v10983_v34 }
 0x47d   :  { %v5319_v52 = vunpack.i.h.s16 %v5317_v51  ;;  %v8003_v53 = vpack.i.b16 %v5317_v51, %v5317_v51  ;;  %v8084_v54 = vld.sshfl [vmem:[#allocation3] sm:$0x11 pattern:$0x76325410] }
 0x47e   :  { %v8085_v55 = vld.sshfl [vmem:[#allocation3 + $0x4] sm:$0x11 pattern:$0x76325410]  ;;  %v6478_v56 = vcombine.high %v8084_v54, %v8084_v54  ;;  %v6487_v57 = vunpack.c.l.b16 %v8084_v54 }
 0x47f   :  { %v5321_v60 = vpack.i.b16 %v5319_v52, %v5319_v52  ;;  %v5328_v61 = vrot.slane %v8003_v53, %v10998_v42  ;;  %v6486_v36 = vcombine.high %v8085_v55, %v8085_v55  ;;  %v6489_v62 = vunpack.c.l.b16 %v8085_v55  ;;  %v9986_v53 = vld [vmem:[%s12428_s5 + $0xc0] sm:$0xff]   ;;  %v9987_v55 = vld [vmem:[%s12428_s5 + $0x118] sm:$0xff]  }
 0x480   :  { %v6488_v63 = vunpack.c.l.b16 %v6478_v56  ;;  %v6491_v24 = vrot.slane %v6487_v57, 1 }
 0x481   :  { %v5335_v0 = vrot.slane %v5321_v60, %v10998_v42  ;;  %v6490_v1 = vunpack.c.l.b16 %v6486_v36  ;;  %v6614_v3 = vrot.slane %v6489_v62, 7  ;;  %v5342_v4 = vsel %vm12167_vm1, %v5328_v61, %v5341_v59  ;;  %v9988_v60 = vld [vmem:[%s12428_s5 + $0x110] sm:$0xff]  }
 0x482   :  { %v6493_v10 = vrot.slane %v6488_v63, 1  ;;  %5343 = vst [vmem:[#allocation3] sm:$0x2] %v5342_v4  ;;  %v6492_v40 = vsel %vm1718_vm5, %v6489_v62, %v6491_v24  ;;  %v9990_v24 = vld [vmem:[%s12428_s5 + $0x100] sm:$0xff]  }
 0x483   :  { %v6616_v45 = vrot.slane %v6490_v1, 7  ;;  %v5345_v5 = vsel %vm12167_vm1, %v5335_v0, %v5344_v30  ;;  %v6615_v7 = vsel %vm1718_vm5, %v6614_v3, %v6487_v57  ;;  %v6495_v13 = vpack.c.b16 %v6492_v40, %v6492_v40 }
 0x484   :  { %v6494_v6 = vsel %vm1718_vm5, %v6490_v1, %v6493_v10  ;;  %5346 = vst [vmem:[#allocation3 + $0x4] sm:$0x2] %v5345_v5  ;;  %v6618_v18 = vpack.c.b16 %v6615_v7, %v6615_v7 }
 0x485   :  { %v6496_v8 = vpack.c.b16 %v6494_v6, %v6494_v6  ;;  %v6617_v11 = vsel %vm1718_vm5, %v6616_v45, %v6488_v63  ;;  %v9989_v63 = vld [vmem:[%s12428_s5 + $0x108] sm:$0xff]  }
 0x486   :  { %v6619_v15 = vpack.c.b16 %v6617_v11, %v6617_v11 }
 0x487   :  { %8098 = vmatprep.mubr.msk.bf16.mxu0 %vm2244_vm6, %v6496_v8 }
 0x488   :  { %6607 = vmatmul.mubr.bf16.vlgmr.msra.gmra.mxu0 %v6495_v13  ;;  %8111 = vmatprep.mubr.msk.bf16.mxu1 %vm2244_vm6, %v6619_v15 }
 0x489   :  { %6729 = vmatmul.mubr.bf16.vlgmr.msra.gmra.mxu1 %v6618_v18  ;;  %6869 = vmatpush1.bf16.msra.mxu0 %v9979_v12 }
 0x48a   :  { %6870 = vmatprep.subr.bf16.mxu0 %v10076_v27  ;;  %7136 = vmatprep.mubr.bf16.mxu1 %v10076_v27 }
 0x48c   :  { %v5491_v20 = vpop.f32.mrf.mxu0 }
 0x48d   :  { %6871 = vmatpush1.bf16.msra.mxu0 %v9980_v19 }
 0x48e   :  { %v9316_v23 = vpop.f32.mrf.mxu0  ;;  %6872 = vmatprep.subr.bf16.mxu0 %v10076_v27 }
 0x490   :  { %v5494_v25 = vpop.f32.mrf.mxu0  ;;  %v5593_v28 = vpop.f32.mrf.mxu1 }
 0x491   :  { %6873 = vmatpush1.bf16.msra.mxu0 %v9981_v21  ;;  %v5594_v38 = vadd.f32 %v5593_v28, %v5491_v20 }
 0x492   :  { %v9317_v31 = vpop.f32.mrf.mxu0  ;;  %v9336_v32 = vpop.f32.mrf.mxu1  ;;  %6874 = vmatprep.subr.bf16.mxu0 %v10076_v27 }
 0x494   :  { %v5596_v26 = vpop.f32.mrf.mxu1 }
 0x495   :  { %6875 = vmatpush1.bf16.msra.mxu0 %v9982_v29  ;;  %v6413_v26 = vld [vmem:[#allocation3 + $0x2] sm:$0x2] }
 0x496   :  { %v9337_v35 = vpop.f32.mrf.mxu1  ;;  %6876 = vmatprep.subr.bf16.mxu0 %v10076_v27 }
 0x499   :  { %6877 = vmatpush1.bf16.msra.mxu0 %v9983_v33 }
 0x49a   :  { %6878 = vmatprep.subr.bf16.mxu0 %v10076_v27 }
 0x49d   :  { %6879 = vmatpush1.bf16.msra.mxu0 %v9984_v37  ;;  %v6416_v37 = vld [vmem:[#allocation3 + $0x6] sm:$0x2] }
 0x49e   :  { %6880 = vmatprep.subr.bf16.mxu0 %v10076_v27 }
 0x4a1   :  { %6881 = vmatpush1.bf16.msra.mxu0 %v9985_v17 }
 0x4a2   :  { %6882 = vmatprep.subr.bf16.mxu0 %v10076_v27 }
 0x4a5   :  { %6883 = vmatpush1.bf16.msra.mxu0 %v9986_v53 }
 0x4a6   :  { %6892 = vmatprep.subr.bf16.mxu0 %v10076_v27 }
 0x4a9   :  { %6893 = vmatpush2.bf16.msra.mxu0 %v9987_v55 }
 0x4aa   :  { %6894 = vmatprep.subr.bf16.mxu0 %v10076_v27 }
 0x4ac   :  { %v5727_v9 = vpop.f32.mrf.mxu0 }
 0x4ad   :  { %v5733_v41 = vadd.f32 %v5727_v9, %v5594_v38  ;;  %6895 = vmatpush2.bf16.msra.mxu0 %v9988_v60  ;;  %v5904_v38 = vld [vmem:[#allocation3] sm:$0x2] }
 0x4ae   :  { %v9356_v39 = vpop.f32.mrf.mxu0  ;;  %6896 = vmatprep.subr.bf16.mxu0 %v10076_v27 }
 0x4b0   :  { %v5730_v43 = vpop.f32.mrf.mxu0  ;;  %v5846_v44 = vpop.f32.mrf.mxu1 }
 0x4b1   :  { %v5852_v14 = vadd.f32 %v5846_v44, %v5733_v41  ;;  %6897 = vmatpush2.bf16.msra.mxu0 %v9989_v63  ;;  %v5907_v43 = vld [vmem:[#allocation3 + $0x4] sm:$0x2] }
 0x4b2   :  { %v9357_v16 = vpop.f32.mrf.mxu0  ;;  %v9376_v46 = vpop.f32.mrf.mxu1  ;;  %6898 = vmatprep.subr.bf16.mxu0 %v10076_v27 }
 0x4b3   :  { %v5860_v47 = vadd.f32 %v11914_v2, %v5852_v14 }
 0x4b4   :  { %v5849_v48 = vpop.f32.mrf.mxu1 }
 0x4b5   :  { %v5861_v50 = vmax.f32 %v5860_v47, 0.0  ;;  %6899 = vmatpush2.bf16.msra.mxu0 %v9990_v24 }
 0x4b6   :  { %v9377_v51 = vpop.f32.mrf.mxu1 }
 0x4b7   :  { %v5862_v52 = vpack.c.bf16 %v5861_v50, %v5861_v50 }
 0x4b9   :  { %v5870_v54 = vrot.slane %v5862_v52, %v10983_v34 }
 0x4bb   :  { %v5877_v56 = vrot.slane %v5870_v54, %v10983_v34 }
 0x4bd   :  { %v8045_v57 = vpack.i.b16 %v5877_v56, %v5877_v56  ;;  %v5879_v59 = vunpack.i.h.s16 %v5877_v56 }
 0x4bf   :  { %v5888_v61 = vrot.slane %v8045_v57, %v10998_v42  ;;  %v5881_v36 = vpack.i.b16 %v5879_v59, %v5879_v59 }
 0x4c1   :  { %5896 = vrot.lane.b32.xlu0 %v5888_v61, %s10072_s26  ;;  %v5895_v62 = vrot.slane %v5881_v36, %v10998_v42 }
 0x4c3   :  { %5898 = vrot.lane.b32.xlu1 %v5895_v62, %s10072_s26 }
 0x4cc   :  { %v6039_v30 = vpop.f32.mrf.mxu0 }
 0x4ce   :  { %v9396_v0 = vpop.f32.mrf.mxu0 }
 0x4d0   :  { %v6042_v1 = vpop.f32.mrf.mxu0  ;;  %v6132_v3 = vpop.f32.mrf.mxu1 }
 0x4d1   :  { %v6133_v6 = vadd.f32 %v6132_v3, %v6039_v30 }
 0x4d2   :  { %v9397_v4 = vpop.f32.mrf.mxu0  ;;  %v9416_v10 = vpop.f32.mrf.mxu1 }
 0x4d3   :  { %v9991_v4 = vld [vmem:[%s12430_s7 + $0x60] ss:$16 sps:$4 sm:$0xff]   ;;  %v9993_v10 = vld [vmem:[%s12430_s7 + $0x64] ss:$16 sps:$4 sm:$0xff]  }
 0x4d4   :  { %v6135_v40 = vpop.f32.mrf.mxu1  ;;  %7112 = vmatprep.subr.bf16.mxu1 %v9993_v10  ;;  %v10036_v10 = vld [vmem:[%s12432_s9 + $0x40] sm:$0xff]  }
 0x4d5   :  { %v9996_v40 = vld [vmem:[%s12430_s7 + $0x44] ss:$16 sps:$4 sm:$0xff]   ;;  %7113 = vmatpush1.bf16.msra.mxu1 %v9991_v4 }
 0x4d6   :  { %v9417_v45 = vpop.f32.mrf.mxu1  ;;  %7114 = vmatprep.subr.bf16.mxu1 %v9996_v40  ;;  %v10035_v4 = vld [vmem:[%s12432_s9 + $0xe0] sm:$0xff]  }
 0x4d7   :  { %v9994_v45 = vld [vmem:[%s12430_s7 + $0x40] ss:$16 sps:$4 sm:$0xff]  }
 0x4d8   :  { %v10037_v40 = vld [vmem:[%s12432_s9 + $0xa0] sm:$0xff]  }
 0x4d9   :  { %7115 = vmatpush1.bf16.msra.mxu1 %v9994_v45  ;;  %v10038_v45 = vld [vmem:[%s12432_s9] sm:$0xff]  }
 0x4ec   :  { %v6251_v5 = vpop.f32.mrf.mxu0 }
 0x4ed   :  { %v6257_v8 = vadd.f32 %v6251_v5, %v6133_v6  ;;  %v9999_v5 = vld [vmem:[%s12430_s7 + $0x24] ss:$16 sps:$4 sm:$0xff]   ;;  %v9997_v6 = vld [vmem:[%s12430_s7 + $0x20] ss:$16 sps:$4 sm:$0xff]  }
 0x4ee   :  { %v9436_v7 = vpop.f32.mrf.mxu0  ;;  %7116 = vmatprep.subr.bf16.mxu1 %v9999_v5  ;;  %v10039_v5 = vld [vmem:[%s12432_s9 + $0xd8] sm:$0xff]  }
 0x4ef   :  { %v10002_v7 = vld [vmem:[%s12430_s7 + $0x4] ss:$16 sps:$4 sm:$0xff]   ;;  %7117 = vmatpush1.bf16.msra.mxu1 %v9997_v6  ;;  %v10040_v6 = vld [vmem:[%s12432_s9 + $0x98] sm:$0xff]  }
 0x4f0   :  { %v6254_v11 = vpop.f32.mrf.mxu0  ;;  %v6361_v12 = vpop.f32.mrf.mxu1  ;;  %7118 = vmatprep.subr.bf16.mxu1 %v10002_v7  ;;  %v10041_v7 = vld [vmem:[%s12432_s9 + $0xd0] sm:$0xff]  }
 0x4f1   :  { %v6367_v13 = vadd.f32 %v6361_v12, %v6257_v8  ;;  %v10000_v8 = vld [vmem:[%s12430_s7] ss:$16 sps:$4 sm:$0xff]   ;;  %v10005_v11 = vld [vmem:[%s12430_s7 + $0x6c] ss:$16 sps:$4 sm:$0xff]  }
 0x4f2   :  { %v9437_v15 = vpop.f32.mrf.mxu0  ;;  %v9456_v18 = vpop.f32.mrf.mxu1  ;;  %v10023_v12 = vld [vmem:[%s12432_s9 + $0xf8] sm:$0xff]  }
 0x4f3   :  { %v6375_v19 = vadd.f32 %v11914_v2, %v6367_v13  ;;  %7119 = vmatpush1.bf16.msra.mxu1 %v10000_v8  ;;  %v10025_v13 = vld [vmem:[%s12432_s9 + $0xb8] sm:$0xff]   ;;  %8716 = vmatprep.subr.bf16.mxu0 %v10023_v12  ;;  %v10027_v15 = vld [vmem:[%s12432_s9 + $0xf0] sm:$0xff]   ;;  %v10044_v12 = vld [vmem:[%s12432_s9 + $0x88] sm:$0xff]  }
 0x4f4   :  { %v6364_v20 = vpop.f32.mrf.mxu1  ;;  %7153 = vmatprep.subr.bf16.mxu1 %v10005_v11  ;;  %v10029_v18 = vld [vmem:[%s12432_s9 + $0xb0] sm:$0xff]   ;;  %v10043_v11 = vld [vmem:[%s12432_s9 + $0xc8] sm:$0xff]  }
 0x4f5   :  { %v6376_v21 = vmax.f32 %v6375_v19, 0.0  ;;  %v8127_v20 = vld [vmem:[%s12429_s6] ss:$0 sm:$0xff]  ;;  %v10042_v8 = vld [vmem:[%s12432_s9 + $0x90] sm:$0xff]  }
 0x4f6   :  { %v9457_v23 = vpop.f32.mrf.mxu1 }
 0x4f7   :  { %v6377_v25 = vpack.c.bf16 %v6376_v21, %v6376_v21 }
 0x4f9   :  { %v6385_v28 = vrot.slane %v6377_v25, %v10983_v34 }
 0x4fb   :  { %v6392_v29 = vrot.slane %v6385_v28, %v10983_v34 }
 0x4fd   :  { %v6394_v31 = vunpack.i.h.s16 %v6392_v29  ;;  %v8083_v32 = vpack.i.b16 %v6392_v29, %v6392_v29 }
 0x4ff   :  { %v6396_v33 = vpack.i.b16 %v6394_v31, %v6394_v31  ;;  %v6403_v35 = vrot.slane %v8083_v32, %v10998_v42 }
 0x501   :  { %v6410_v17 = vrot.slane %v6396_v33, %v10998_v42  ;;  %v6414_v2 = vsel %vm12167_vm1, %v6403_v35, %v6413_v26  ;;  %v6940_v35 = vld [vmem:[#allocation4] sm:$0x1] }
 0x502   :  { %6415 = vst [vmem:[#allocation3 + $0x2] sm:$0x2] %v6414_v2  ;;  %v6943_v2 = vld [vmem:[#allocation4 + $0x1] sm:$0x1] }
 0x503   :  { %v6417_v9 = vsel %vm12167_vm1, %v6410_v17, %v6416_v37 }
 0x504   :  { %6418 = vst [vmem:[#allocation3 + $0x6] sm:$0x2] %v6417_v9 }
 0x533   :  { %v5897_v39 = vpop.permute.xlu0 %5896 }
 0x534   :  { %v5905_v41 = vsel %vm5903_vm3, %v5897_v39, %v5904_v38 }
 0x535   :  { %5906 = vst [vmem:[#allocation3] sm:$0x2] %v5905_v41  ;;  %v5899_v44 = vpop.permute.xlu1 %5898 }
 0x536   :  { %v5908_v14 = vsel %vm5903_vm3, %v5899_v44, %v5907_v43 }
 0x537   :  { %5909 = vst [vmem:[#allocation3 + $0x4] sm:$0x2] %v5908_v14 }
 0x53c   :  { %v8112_v42 = vld.sshfl [vmem:[#allocation3] sm:$0x22 pattern:$0x76325410] }
 0x53d   :  { %v6771_v16 = vcombine.high %v8112_v42, %v8112_v42  ;;  %v6780_v47 = vunpack.c.l.b16 %v8112_v42 }
 0x53e   :  { %v8113_v46 = vld.sshfl [vmem:[#allocation3 + $0x4] sm:$0x22 pattern:$0x76325410] }
 0x53f   :  { %v6779_v48 = vcombine.high %v8113_v46, %v8113_v46  ;;  %v6781_v50 = vunpack.c.l.b16 %v6771_v16  ;;  %v6782_v58 = vunpack.c.l.b16 %v8113_v46  ;;  %v6784_v53 = vrot.slane %v6780_v47, 2  ;;  %v10003_v47 = vld [vmem:[%s12430_s7 + $0x68] ss:$16 sps:$4 sm:$0xff]  }
 0x541   :  { %v6783_v51 = vunpack.c.l.b16 %v6779_v48  ;;  %v6785_v52 = vrot.slane %v6782_v58, 1  ;;  %v6787_v54 = vrot.slane %v6781_v50, 2  ;;  %v10011_v58 = vld [vmem:[%s12430_s7 + $0x2c] ss:$16 sps:$4 sm:$0xff]  }
 0x543   :  { %v6788_v55 = vrot.slane %v6783_v51, 1  ;;  %v6786_v56 = vsel %vm1718_vm5, %v6785_v52, %v6784_v53  ;;  %v10009_v51 = vld [vmem:[%s12430_s7 + $0x28] ss:$16 sps:$4 sm:$0xff]   ;;  %v10014_v52 = vld [vmem:[%s12430_s7 + $0xc] ss:$16 sps:$4 sm:$0xff]  }
 0x544   :  { %v6790_v60 = vpack.c.b16 %v6786_v56, %v6786_v56  ;;  %v10015_v53 = vld [vmem:[%s12432_s9 + $0x78] sm:$0xff]   ;;  %v10018_v56 = vld [vmem:[%s12432_s9 + $0x30] sm:$0xff]  }
 0x545   :  { %v6789_v57 = vsel %vm1718_vm5, %v6788_v55, %v6787_v54  ;;  %v10016_v54 = vld [vmem:[%s12432_s9 + $0x38] sm:$0xff]   ;;  %v10017_v55 = vld [vmem:[%s12432_s9 + $0x70] sm:$0xff]  }
 0x546   :  { %v6791_v59 = vpack.c.b16 %v6789_v57, %v6789_v57  ;;  %v10019_v57 = vld [vmem:[%s12432_s9 + $0x68] sm:$0xff]  }
 0x548   :  { %v6608_v61 = vpop.f32.mrf.mxu0  ;;  %8126 = vmatprep.mubr.msk.bf16.mxu0 %vm2244_vm6, %v6791_v59  ;;  %v10020_v59 = vld [vmem:[%s12432_s9 + $0x28] sm:$0xff]  }
 0x549   :  { %v6730_v36 = vpop.f32.mrf.mxu1  ;;  %6901 = vmatmul.mubr.bf16.vlgmr.msra.gmra.mxu0 %v6790_v60  ;;  %v10021_v60 = vld [vmem:[%s12432_s9 + $0x60] sm:$0xff]  }
 0x54a   :  { %v6610_v62 = vpop.f32.mrf.mxu0  ;;  %v6731_v63 = vadd.f32 %v6730_v36, %v6608_v61  ;;  %8717 = vmatpush3.bf16.msra.mxu0 %v10025_v13  ;;  %v10022_v61 = vld [vmem:[%s12432_s9 + $0x20] sm:$0xff]   ;;  %v10024_v36 = vld [vmem:[%s12432_s9 + $0x58] sm:$0xff]  }
 0x54b   :  { %v6732_v24 = vpop.f32.mrf.mxu1  ;;  %8718 = vmatprep.subr.bf16.mxu0 %v10027_v15  ;;  %v10026_v62 = vld [vmem:[%s12432_s9 + $0x18] sm:$0xff]   ;;  %v10045_v13 = vld [vmem:[%s12432_s9 + $0xc0] sm:$0xff]  }
 0x54c   :  { %v6611_v30 = vpop.f32.mrf.mxu0  ;;  %v10030_v24 = vld [vmem:[%s12432_s9 + $0x10] sm:$0xff]   ;;  %v10046_v15 = vld [vmem:[%s12432_s9 + $0x80] sm:$0xff]  }
 0x54d   :  { %v6733_v0 = vpop.f32.mrf.mxu1  ;;  %v10031_v30 = vld [vmem:[%s12432_s9 + $0xe8] sm:$0xff]  }
 0x54e   :  { %v6612_v1 = vpop.f32.mrf.mxu0  ;;  %8719 = vmatpush3.bf16.msra.mxu0 %v10029_v18  ;;  %v10032_v0 = vld [vmem:[%s12432_s9 + $0x48] sm:$0xff]   ;;  %v6968_v18 = vsub.s32 0, %v10972_v22 }
 0x54f   :  { %v6734_v3 = vpop.f32.mrf.mxu1  ;;  %8720 = vmatprep.subr.bf16.mxu0 %v10031_v30  ;;  %v10033_v1 = vld [vmem:[%s12432_s9 + $0xa8] sm:$0xff]  }
 0x550   :  { %v10034_v3 = vld [vmem:[%s12432_s9 + $0x8] sm:$0xff]  }
 0x552   :  { %8721 = vmatpush3.bf16.msra.mxu0 %v10033_v1 }
 0x553   :  { %8722 = vmatprep.subr.bf16.mxu0 %v10035_v4 }
 0x556   :  { %8723 = vmatpush3.bf16.msra.mxu0 %v10037_v40 }
 0x557   :  { %8724 = vmatprep.subr.bf16.mxu0 %v10039_v5 }
 0x55a   :  { %8725 = vmatpush3.bf16.msra.mxu0 %v10040_v6 }
 0x55b   :  { %8726 = vmatprep.subr.bf16.mxu0 %v10041_v7 }
 0x55e   :  { %8727 = vmatpush3.bf16.msra.mxu0 %v10042_v8 }
 0x55f   :  { %8728 = vmatprep.subr.bf16.mxu0 %v10043_v11 }
 0x562   :  { %8729 = vmatpush3.bf16.msra.mxu0 %v10044_v12 }
 0x563   :  { %8730 = vmatprep.subr.bf16.mxu0 %v10045_v13 }
 0x566   :  { %8731 = vmatpush3.bf16.msra.mxu0 %v10046_v15 }
 0x609   :  { %v6902_v19 = vpop.f32.mrf.mxu0 }
 0x60a   :  { %v6908_v21 = vadd.f32 %v6902_v19, %v6731_v63  ;;  %v10028_v63 = vld [vmem:[%s12432_s9 + $0x50] sm:$0xff]   ;;  %v6964_v19 = vld [vmem:[%s12431_s8] sm:$0xf] }
 0x60b   :  { %v6904_v23 = vpop.f32.mrf.mxu0 }
 0x60c   :  { %v6916_v25 = vadd.f32 %v8127_v20, %v6908_v21  ;;  %v6972_v20 = vsub.s32 1, %v10972_v22  ;;  %v6969_v21 = vrot.slane %v6964_v19, %v6968_v18 }
 0x60d   :  { %v6905_v28 = vpop.f32.mrf.mxu0 }
 0x60e   :  { %v6917_v29 = vmax.f32 %v6916_v25, 0.0  ;;  %v6973_v23 = vrot.slane %v6964_v19, %v6972_v20 }
 0x60f   :  { %v6906_v31 = vpop.f32.mrf.mxu0 }
 0x610   :  { %v6918_v32 = vpack.c.bf16 %v6917_v29, %v6917_v29 }
 0x612   :  { %v6926_v26 = vrot.slane %v6918_v32, %v10983_v34 }
 0x614   :  { %v6933_v33 = vrot.slane %v6926_v26, %v10983_v34 }
 0x616   :  { %v6935_v37 = vunpack.i.h.s16 %v6933_v33  ;;  %v8128_v17 = vpack.i.b16 %v6933_v33, %v6933_v33 }
 0x618   :  { %v6937_v9 = vpack.i.b16 %v6935_v37, %v6935_v37  ;;  %v6941_v38 = vsel %vm11010_vm9, %v8128_v17, %v6940_v35 }
 0x619   :  { %6942 = vst [vmem:[#allocation4] sm:$0x1] %v6941_v38 }
 0x61a   :  { %v6944_v39 = vsel %vm11010_vm9, %v6937_v9, %v6943_v2  ;;  %v6976_v2 = vsub.s32 2, %v10972_v22  ;;  %v6980_v9 = vsub.s32 3, %v10972_v22  ;;  %v8149_v22 = vld [vmem:[%s12433_s10] ss:$0 sm:$0xff] }
 0x61b   :  { %6945 = vst [vmem:[#allocation4 + $0x1] sm:$0x1] %v6944_v39 }
 0x61c   :  { %v6977_v38 = vrot.slane %v6964_v19, %v6976_v2  ;;  %v6981_v39 = vrot.slane %v6964_v19, %v6980_v9 }
 0x620   :  { %v8129_v41 = vld.sshfl [vmem:[#allocation4] sm:$0x1 pattern:$0x75316420] }
 0x621   :  { %v7001_v44 = vrot.slane %v8129_v41, %v10983_v34 }
 0x622   :  { %v8130_v43 = vld.sshfl [vmem:[#allocation4 + $0x1] sm:$0x1 pattern:$0x75316420] }
 0x623   :  { %v7015_v14 = vrot.slane %v8130_v43, %v10983_v34  ;;  %v7016_v16 = vunpack.c.l.b16 %v7001_v44  ;;  %v10006_v34 = vld [vmem:[%s12430_s7 + $0x48] ss:$16 sps:$4 sm:$0xff]  }
 0x625   :  { %v7017_v42 = vunpack.c.l.b16 %v7015_v14 }
 0x627   :  { %v7018_v46 = vrot.slane %v7017_v42, 7 }
 0x629   :  { %v7019_v48 = vsel %vm1718_vm5, %v7018_v46, %v7016_v16 }
 0x62a   :  { %v7020_v50 = vpack.c.b16 %v7019_v48, %v7019_v48 }
 0x62c   :  { %8147 = vmatmul.mubr.msk.bf16.vlgmr.msra.gmra.mxu1 %vm2244_vm6, %v7020_v50 }
 0x62d   :  { %7154 = vmatpush1.bf16.msra.mxu1 %v10003_v47  ;;  %7177 = vmatprep.mubr.bf16.mxu1 %v10076_v27  ;;  %v10012_v27 = vld [vmem:[%s12430_s7 + $0x8] ss:$16 sps:$4 sm:$0xff]  }
 0x62e   :  { %7155 = vmatprep.subr.bf16.mxu1 %v10008_v49 }
 0x631   :  { %7156 = vmatpush1.bf16.msra.mxu1 %v10006_v34 }
 0x632   :  { %7157 = vmatprep.subr.bf16.mxu1 %v10011_v58 }
 0x635   :  { %7158 = vmatpush1.bf16.msra.mxu1 %v10009_v51 }
 0x636   :  { %7159 = vmatprep.subr.bf16.mxu1 %v10014_v52 }
 0x639   :  { %7160 = vmatpush1.bf16.msra.mxu1 %v10012_v27 }
 0x63a   :  { %8694 = vmatprep.subr.bf16.mxu1 %v10015_v53 }
 0x63c   :  { %8148 = vmatmul.mubr.msk.bf16.vlgmr.msra.gmra.mxu1 %vm2244_vm6, %v7020_v50 }
 0x63d   :  { %8695 = vmatpush3.bf16.msra.mxu1 %v10016_v54 }
 0x63e   :  { %8696 = vmatprep.subr.bf16.mxu1 %v10017_v55 }
 0x641   :  { %8697 = vmatpush3.bf16.msra.mxu1 %v10018_v56 }
 0x642   :  { %8698 = vmatprep.subr.bf16.mxu1 %v10019_v57 }
 0x645   :  { %8699 = vmatpush3.bf16.msra.mxu1 %v10020_v59 }
 0x646   :  { %8700 = vmatprep.subr.bf16.mxu1 %v10021_v60 }
 0x649   :  { %8701 = vmatpush3.bf16.msra.mxu1 %v10022_v61 }
 0x64a   :  { %8702 = vmatprep.subr.bf16.mxu1 %v10024_v36 }
 0x64d   :  { %8703 = vmatpush3.bf16.msra.mxu1 %v10026_v62 }
 0x64e   :  { %8704 = vmatprep.subr.bf16.mxu1 %v10028_v63 }
 0x651   :  { %8705 = vmatpush3.bf16.msra.mxu1 %v10030_v24 }
 0x652   :  { %8706 = vmatprep.subr.bf16.mxu1 %v10032_v0 }
 0x655   :  { %8707 = vmatpush3.bf16.msra.mxu1 %v10034_v3 }
 0x656   :  { %8708 = vmatprep.subr.bf16.mxu1 %v10036_v10 }
 0x659   :  { %8709 = vmatpush3.bf16.msra.mxu1 %v10038_v45 }
 0x6ec   :  { %v7138_v25 = vpop.f32.mrf.mxu1 }
 0x6ed   :  { %v7139_v28 = vadd.f32 %v7138_v25, %v6969_v21 }
 0x6ee   :  { %v7140_v29 = vpop.f32.mrf.mxu1 }
 0x6ef   :  { %v7141_v31 = vadd.f32 %v7140_v29, %v6973_v23  ;;  %v7186_v32 = vmax.f32 %v7139_v28, 0.0 }
 0x6f0   :  { %v7142_v26 = vpop.f32.mrf.mxu1 }
 0x6f1   :  { %v7187_v33 = vmax.f32 %v7141_v31, 0.0  ;;  %v7190_v17 = vpack.c.bf16 %v7186_v32, %v7186_v32 }
 0x6f2   :  { %v7143_v35 = vpop.f32.mrf.mxu1 }
 0x6f3   :  { %v7191_v37 = vpack.c.bf16 %v7187_v33, %v7187_v33 }
 0x6f5   :  { %7489 = vmatprep.mubr.bf16.mxu1 %v7191_v37 }
 0x6f6   :  { %7490 = vmatmul.mubr.bf16.vlgmr.msra.gmra.mxu1 %v7190_v17 }
 0x6fc   :  { %v7179_v41 = vpop.f32.mrf.mxu1 }
 0x6fd   :  { %v7180_v43 = vadd.f32 %v7179_v41, %v6977_v38 }
 0x6fe   :  { %v7181_v44 = vpop.f32.mrf.mxu1 }
 0x6ff   :  { %v7182_v14 = vadd.f32 %v7181_v44, %v6981_v39  ;;  %v7188_v42 = vmax.f32 %v7180_v43, 0.0 }
 0x700   :  { %v7183_v16 = vpop.f32.mrf.mxu1 }
 0x701   :  { %v7189_v46 = vmax.f32 %v7182_v14, 0.0  ;;  %v7192_v50 = vpack.c.bf16 %v7188_v42, %v7188_v42 }
 0x702   :  { %v7184_v47 = vpop.f32.mrf.mxu1 }
 0x703   :  { %v7193_v48 = vpack.c.bf16 %v7189_v46, %v7189_v46 }
 0x705   :  { %7529 = vmatprep.mubr.bf16.mxu0 %v7193_v48 }
 0x706   :  { %7530 = vmatmul.mubr.bf16.vlgmr.msra.gmra.mxu0 %v7192_v50 }
 0x7b6   :  { %v8710_v49 = vpop.f32.mrf.mxu1 }
 0x7b8   :  { %v8711_v34 = vpop.f32.mrf.mxu1 }
 0x7b9   :  { %v8712_v52 = vadd.f32 %v8711_v34, %v8710_v49 }
 0x7ba   :  { %v8713_v58 = vpop.f32.mrf.mxu1 }
 0x7bb   :  { %v7492_v54 = vadd.f32 %v8712_v52, %v8149_v22 }
 0x7bc   :  { %v8714_v51 = vpop.f32.mrf.mxu1 }
 0x7c6   :  { %v8732_v27 = vpop.f32.mrf.mxu0 }
 0x7c8   :  { %v8733_v53 = vpop.f32.mrf.mxu0 }
 0x7c9   :  { %v8734_v55 = vadd.f32 %v8733_v53, %v8732_v27 }
 0x7ca   :  { %v8735_v56 = vpop.f32.mrf.mxu0 }
 0x7cb   :  { %v7532_v57 = vadd.f32 %v8734_v55, %v7492_v54 }
 0x7cc   :  { %v8736_v59 = vpop.f32.mrf.mxu0 }
 0x7cd   :  { %7537 = vst [vmem:[#allocation5] sm:$0x3] %v7532_v57 }
 0x7ce   :  { %10058 = shalt.err (!%p10055_p4)
}
 0x7cf   :  { %7547 = dma.vmem_to_hbm [thread:$0]  %s7545_s12, 32, %s12434_s11, [#allocation6]  }
 0x7d0   :  { %10067 = dma.done.wait [#allocation6], 32  }
 0x7d1   :  { %10068 = vsyncadd [#allocation6], 4294967264 }
 0x7d2   :  { %7551 = vsyncpa [#allocation6], 1 }

</bundles_post_ra>
